<compile_context>
chip_gen: v7x
topology: tpu7x:2x2x1
jax: 0.10.0
libtpu: 0.0.40
codegen_flags: <defaults>
</compile_context>

<pallas_src>
import functools

import jax
import jax.numpy as jnp
from jax import lax
from jax.experimental import pallas as pl
from jax.experimental.pallas import tpu as pltpu


# bf16 operands feed the MXU natively on v5e/v6e/v7x; accumulation is f32.
# Set to jnp.float32 to recover (slower) near-exact PyTorch numerics.
MATMUL_DTYPE = jnp.bfloat16


def _round_up(x, m):
    return ((x + m - 1) // m) * m


# ---------------------------------------------------------------------------
# Kernel 1: fused  (patches @ W_folded) + bias  [+ ReLU], tiled over M
# ---------------------------------------------------------------------------
def _matmul_bias_kernel(x_ref, w_ref, b_ref, o_ref, *, apply_relu):
    acc = jnp.dot(x_ref[...], w_ref[...], preferred_element_type=jnp.float32)
    y = acc + b_ref[...]                       # (1, N) bias broadcasts over rows
    if apply_relu:
        y = jnp.maximum(y, 0.0)
    o_ref[...] = y.astype(o_ref.dtype)


def fused_matmul_bias(x, w, b, *, apply_relu, out_dtype=jnp.float32,
                      tile_m_cap=1024):
    """x: (M, K), w: (K, N), b: (N,) -> (M, N) out_dtype.

    1-D "parallel" grid over M; weights/bias resident across the grid; ragged
    last block is masked by Pallas (no pad / slice HBM copies).
    """
    M, K = x.shape
    Kw, N = w.shape
    assert K == Kw
    x = x.astype(MATMUL_DTYPE)
    w = w.astype(MATMUL_DTYPE)
    b2 = b.reshape(1, N).astype(jnp.float32)

    if M <= 256:
        tm = M                                    # single full-extent block
    else:
        # >= 2 grid steps so both v7x TensorCores get work; cap tile for VMEM.
        tm = min(tile_m_cap, _round_up(pl.cdiv(M, 2), 8))
    grid_m = pl.cdiv(M, tm)                       # ragged last block -> masked

    in_sz = jnp.dtype(MATMUL_DTYPE).itemsize
    out_sz = jnp.dtype(out_dtype).itemsize
    cost = pl.CostEstimate(
        flops=2 * M * K * N,
        transcendentals=0,
        bytes_accessed=int(in_sz * (M * K + K * N) + 4 * N + out_sz * M * N),
    )

    kern = functools.partial(_matmul_bias_kernel, apply_relu=apply_relu)
    return pl.pallas_call(
        kern,
        out_shape=jax.ShapeDtypeStruct((M, N), out_dtype),
        grid_spec=pltpu.PrefetchScalarGridSpec(
            num_scalar_prefetch=0,
            grid=(grid_m,),
            in_specs=[
                pl.BlockSpec((tm, K), lambda i: (i, 0)),   # streamed M tiles
                pl.BlockSpec((K, N), lambda i: (0, 0)),    # resident weights
                pl.BlockSpec((1, N), lambda i: (0, 0)),    # resident bias
            ],
            out_specs=pl.BlockSpec((tm, N), lambda i: (i, 0)),
        ),
        compiler_params=pltpu.CompilerParams(
            dimension_semantics=("parallel",)),
        cost_estimate=cost,
    )(x, w, b2)


# ---------------------------------------------------------------------------
# Kernel 2: fused layer2 + layer3 + head (single invocation, all in VMEM)
# ---------------------------------------------------------------------------
def _conv_tail_kernel(p2_ref, w2_ref, b2_ref, w3_ref, b3_ref, wh_ref, bh_ref,
                      o_ref):
    s2 = p2_ref.shape[0]          # layer-2 output positions (== layer-3 taps)
    n = p2_ref.shape[1]           # batch
    c3 = w3_ref.shape[2]
    acc3 = jnp.zeros((n, c3), jnp.float32)
    # For each layer-2 output position s, compute its (n, c2) activation block
    # and immediately contract it with the matching (c2, c3) layer-3 weight
    # slice.  Nothing is written back to HBM until the final (n, outputs) Q.
    for s in range(s2):           # static unroll (s2 == 25)
        a2 = jnp.dot(p2_ref[s], w2_ref[...],
                     preferred_element_type=jnp.float32)
        a2 = jnp.maximum(a2 + b2_ref[...], 0.0)
        acc3 = acc3 + jnp.dot(a2.astype(w3_ref.dtype), w3_ref[s],
                              preferred_element_type=jnp.float32)
    a3 = jnp.maximum(acc3 + b3_ref[...], 0.0)
    q = jnp.dot(a3, wh_ref[...], preferred_element_type=jnp.float32) + bh_ref[...]
    o_ref[...] = q.astype(o_ref.dtype)


def fused_conv_tail(p2, W2, b2, W3, b3, Wh, bh):
    """p2: (S2, N, K2) layer-2 patches (position-major); returns (N, outputs)."""
    s2, n, k2 = p2.shape
    c2 = W2.shape[1]
    c3 = W3.shape[1]
    n_out = Wh.shape[1]
    assert W2.shape[0] == k2
    assert W3.shape[0] == s2 * c2
    assert Wh.shape[0] == c3
    w3r = W3.reshape(s2, c2, c3)              # w3r[s] = W3[s*c2:(s+1)*c2, :]

    msz = jnp.dtype(MATMUL_DTYPE).itemsize
    cost = pl.CostEstimate(
        flops=2 * n * (s2 * k2 * c2 + s2 * c2 * c3 + c3 * n_out),
        transcendentals=0,
        bytes_accessed=int(msz * (p2.size + W2.size + w3r.size)
                           + 4 * (Wh.size + b2.size + b3.size + bh.size
                                  + n * n_out)),
    )
    return pl.pallas_call(
        _conv_tail_kernel,
        out_shape=jax.ShapeDtypeStruct((n, n_out), jnp.float32),
        cost_estimate=cost,
    )(p2.astype(MATMUL_DTYPE),
      W2.astype(MATMUL_DTYPE),
      b2.reshape(1, c2).astype(jnp.float32),
      w3r.astype(MATMUL_DTYPE),
      b3.reshape(1, c3).astype(jnp.float32),
      Wh.astype(jnp.float32),
      bh.reshape(1, n_out).astype(jnp.float32))


# ---------------------------------------------------------------------------
# JAX glue: im2col (layout plumbing only) and layer composition
# ---------------------------------------------------------------------------
def im2col(x_nhwc, k, stride):
    """(N,H,W,C) -> ((N*Ho*Wo, k*k*C), Ho, Wo); rows (n,h,w), cols (kh,kw,c)."""
    N, H, W, C = x_nhwc.shape
    Ho = (H - k) // stride + 1
    Wo = (W - k) // stride + 1
    cols = []
    for kh in range(k):
        for kw in range(k):
            cols.append(
                x_nhwc[:, kh:kh + stride * (Ho - 1) + 1:stride,
                          kw:kw + stride * (Wo - 1) + 1:stride, :])
    patches = jnp.concatenate(cols, axis=-1)          # (N, Ho, Wo, k*k*C)
    return patches.reshape(N * Ho * Wo, k * k * C), Ho, Wo


def im2col_posmajor(x_nhwc, k, stride):
    """Same gather, but shaped (Ho*Wo, N, k*k*C) so the fused tail kernel can
    index whole (N, K) patch blocks by a static leading index."""
    N, H, W, C = x_nhwc.shape
    Ho = (H - k) // stride + 1
    Wo = (W - k) // stride + 1
    cols = []
    for kh in range(k):
        for kw in range(k):
            cols.append(
                x_nhwc[:, kh:kh + stride * (Ho - 1) + 1:stride,
                          kw:kw + stride * (Wo - 1) + 1:stride, :])
    patches = jnp.concatenate(cols, axis=-1)          # (N, Ho, Wo, k*k*C)
    patches = jnp.transpose(patches, (1, 2, 0, 3))    # (Ho, Wo, N, k*k*C)
    return patches.reshape(Ho * Wo, N, k * k * C), Ho, Wo


def conv_bn_relu(x_nhwc, layer):
    """Generic fallback: Conv2d(k,stride=2) + folded BN (eval) + ReLU."""
    w2d, bias, k, cin, cout = layer
    patches, ho, wo = im2col(x_nhwc, k, 2)
    y = fused_matmul_bias(patches, w2d, bias, apply_relu=True,
                          out_dtype=MATMUL_DTYPE)
    return y.reshape(x_nhwc.shape[0], ho, wo, cout)


def dqn_forward(prepped, x_nchw):
    n = x_nchw.shape[0]
    x = jnp.transpose(x_nchw, (0, 2, 3, 1)).astype(MATMUL_DTYPE)  # NCHW->NHWC once

    W1, b1, k1, cin1, cout1 = prepped["layer1"]
    W2, b2, k2, cin2, cout2 = prepped["layer2"]
    W3, b3, k3, cin3, cout3 = prepped["layer3"]
    Wh, bh = prepped["head"]

    # --- layer 1: XLA im2col on the raw input + fused matmul kernel ----------
    p1, h1o, w1o = im2col(x, k1, 2)
    a1 = fused_matmul_bias(p1, W1, b1, apply_relu=True, out_dtype=MATMUL_DTYPE)
    a1 = a1.reshape(n, h1o, w1o, cout1)

    h2o = (h1o - k2) // 2 + 1
    w2o = (w1o - k2) // 2 + 1
    if h2o == k3 and w2o == k3:
        # conv3's window covers layer2's whole output (layer3 out is 1x1):
        # layer2 -> layer3 -> head fuse into a single pallas_call.
        p2, _, _ = im2col_posmajor(a1, k2, 2)         # (h2o*w2o, n, k2*k2*cin2)
        return fused_conv_tail(p2, W2, b2, W3, b3, Wh, bh)

    # --- generic fallback for other input sizes ------------------------------
    a2 = conv_bn_relu(a1, prepped["layer2"])
    a3 = conv_bn_relu(a2, prepped["layer3"])
    flat = a3.reshape(n, -1)                          # NHWC flatten (head pre-permuted)
    return fused_matmul_bias(flat, Wh, bh, apply_relu=False)


# ---------------------------------------------------------------------------
# One-time parameter preparation: BN fold into weights, head-row permutation
# ---------------------------------------------------------------------------
def _conv2d_size_out(size, kernel_size=5, stride=2):
    return (size - (kernel_size - 1) - 1) // stride + 1


def prepare_params(params, h, w, eps=1e-5):
    prepped = {}
    for name in ("layer1", "layer2", "layer3"):
        Wc, bc, gamma, beta, run_mean, run_var = params[name]
        k, _, cin, cout = Wc.shape                    # (kh, kw, Cin, Cout)
        scale = gamma / jnp.sqrt(run_var + eps)
        # Fold BN scale into the weights; rows match im2col's (kh, kw, c) order.
        w2d = (Wc.reshape(k * k * cin, cout) * scale[None, :]).astype(MATMUL_DTYPE)
        bias = (beta + (bc - run_mean) * scale).astype(jnp.float32)
        prepped[name] = (w2d, bias, k, cin, cout)

    h3 = _conv2d_size_out(_conv2d_size_out(_conv2d_size_out(h)))
    w3 = _conv2d_size_out(_conv2d_size_out(_conv2d_size_out(w)))
    cout3 = prepped["layer3"][4]
    w_head, b_head = params["head"]                   # rows in (c, y, x) order
    w_head_nhwc = (w_head.reshape(cout3, h3, w3, -1)
                   .transpose(1, 2, 0, 3)
                   .reshape(h3 * w3 * cout3, -1)).astype(jnp.float32)
    prepped["head"] = (w_head_nhwc, b_head.astype(jnp.float32))
    return prepped


# ---------------------------------------------------------------------------
# Pure-JAX reference (same folded params, same bf16 operand rounding points)
# ---------------------------------------------------------------------------
def reference_forward(prepped, x_nchw):
    f32 = jnp.float32

    def conv(x, layer):
        w2d, bias, k, cin, cout = layer
        wf = w2d.astype(f32).reshape(k, k, cin, cout)
        y = lax.conv_general_dilated(
            x, wf, (2, 2), "VALID",
            dimension_numbers=("NHWC", "HWIO", "NHWC"))
        return jnp.maximum(y + bias.astype(f32), 0.0)

    x = jnp.transpose(x_nchw, (0, 2, 3, 1)).astype(MATMUL_DTYPE).astype(f32)
    a1 = conv(x, prepped["layer1"]).astype(MATMUL_DTYPE).astype(f32)
    a2 = conv(a1, prepped["layer2"]).astype(MATMUL_DTYPE).astype(f32)
    a3 = conv(a2, prepped["layer3"])
    wh, bh = prepped["head"]
    flat = a3.reshape(a3.shape[0], -1)
    return flat @ wh.astype(f32) + bh.astype(f32)


# ---------------------------------------------------------------------------
# Deterministic parameter construction (shapes follow DQN.__init__)
# ---------------------------------------------------------------------------
def init_params(key, h, w, outputs):
    def conv_layer(key, cin, cout, k=5):
        k1, k2, k3, k4, k5, k6 = jax.random.split(key, 6)
        fan_in = cin * k * k
        bound = 1.0 / (fan_in ** 0.5)
        W = jax.random.uniform(k1, (k, k, cin, cout), jnp.float32, -bound, bound)
        b = jax.random.uniform(k2, (cout,), jnp.float32, -bound, bound)
        gamma = jax.random.uniform(k3, (cout,), jnp.float32, 0.5, 1.5)
        beta = jax.random.uniform(k4, (cout,), jnp.float32, -0.1, 0.1)
        run_mean = jax.random.uniform(k5, (cout,), jnp.float32, -0.1, 0.1)
        run_var = jax.random.uniform(k6, (cout,), jnp.float32, 0.5, 1.5)
        return (W, b, gamma, beta, run_mean, run_var)

    convw = _conv2d_size_out(_conv2d_size_out(_conv2d_size_out(w)))
    convh = _conv2d_size_out(_conv2d_size_out(_conv2d_size_out(h)))
    linear_input_size = convw * convh * 32

    k1, k2, k3, k4 = jax.random.split(key, 4)
    bound = 1.0 / (linear_input_size ** 0.5)
    kw_, kb_ = jax.random.split(k4)
    return {
        "layer1": conv_layer(k1, 3, 16),
        "layer2": conv_layer(k2, 16, 32),
        "layer3": conv_layer(k3, 32, 32),
        "head": (
            jax.random.uniform(kw_, (linear_input_size, outputs), jnp.float32,
                               -bound, bound),
            jax.random.uniform(kb_, (outputs,), jnp.float32, -bound, bound),
        ),
    }


if __name__ == "__main__":
    N, C, H, W = 2, 3, 32, 32     # 32 -> 14 -> 5 -> 1 spatial; linear_input = 32
    OUTPUTS = 4

    key = jax.random.PRNGKey(0)
    kp, kx = jax.random.split(key)
    params = init_params(kp, H, W, OUTPUTS)
    prepped = prepare_params(params, H, W)            # one-time BN fold + permute
    x = jax.random.normal(kx, (N, C, H, W), jnp.float32)

    fwd = jax.jit(lambda inp: dqn_forward(prepped, inp))
    out = fwd(x)
    jax.block_until_ready(out)
    assert out.shape == (N, OUTPUTS), out.shape
    assert out.dtype == jnp.float32

    ref = reference_forward(prepped, x)
    err = float(jnp.max(jnp.abs(out - ref)))
    assert err < 2e-3, f"max abs err vs reference: {err}"
    print("KERNEL_OK")
</pallas_src>

<mosaic_0001>
module attributes {stable_mosaic.version = 11 : i64} {
  func.func @_matmul_bias_kernel(%arg0: i32, %arg1: memref<200x75xbf16, #tpu.memory_space<vmem>>, %arg2: memref<75x16xbf16, #tpu.memory_space<vmem>>, %arg3: memref<1x16xf32, #tpu.memory_space<vmem>>, %arg4: memref<200x16xbf16, #tpu.memory_space<vmem>>) attributes {dimension_semantics = [#tpu.dimension_semantics<parallel>], iteration_bounds = array<i64: 2>, scalar_prefetch = 0 : i64, scratch_operands = 0 : i64, tpu.core_type = #tpu.core_type<tc>, window_params = [{transform_indices = @transform_0, window_bounds = array<i64: 200, 75>}, {pipeline_mode = #tpu.pipeline_mode<synchronous>, transform_indices = @transform_1, window_bounds = array<i64: 75, 16>}, {pipeline_mode = #tpu.pipeline_mode<synchronous>, transform_indices = @transform_2, window_bounds = array<i64: 1, 16>}, {transform_indices = @transform_3, window_bounds = array<i64: 200, 16>}]} {
    %c0 = arith.constant 0 : index
    %c0_0 = arith.constant 0 : index
    %0 = vector.load %arg1[%c0, %c0_0] : memref<200x75xbf16, #tpu.memory_space<vmem>>, vector<200x75xbf16>
    %c0_1 = arith.constant 0 : index
    %c0_2 = arith.constant 0 : index
    %1 = vector.load %arg2[%c0_1, %c0_2] : memref<75x16xbf16, #tpu.memory_space<vmem>>, vector<75x16xbf16>
    %cst = arith.constant dense<0.000000e+00> : vector<200x16xf32>
    %2 = tpu.matmul %0, %1, %cst {dimension_numbers = #tpu.dot_dimension_numbers<[1], [0], [0], [1], [0, 0, 1, 1], [], []>} : vector<200x75xbf16>, vector<75x16xbf16>, vector<200x16xf32> -> vector<200x16xf32>
    %c0_3 = arith.constant 0 : index
    %c0_4 = arith.constant 0 : index
    %3 = vector.load %arg3[%c0_3, %c0_4] : memref<1x16xf32, #tpu.memory_space<vmem>>, vector<1x16xf32>
    %4 = vector.broadcast %3 : vector<1x16xf32> to vector<200x16xf32>
    %5 = arith.addf %2, %4 : vector<200x16xf32>
    %cst_5 = arith.constant 0.000000e+00 : f32
    %6 = vector.broadcast %cst_5 : f32 to vector<200x16xf32>
    %7 = arith.maximumf %5, %6 : vector<200x16xf32>
    %8 = arith.truncf %7 : vector<200x16xf32> to vector<200x16xbf16>
    %c0_6 = arith.constant 0 : index
    %c0_7 = arith.constant 0 : index
    %9 = vector.load %arg4[%c0_6, %c0_7] : memref<200x16xbf16, #tpu.memory_space<vmem>>, vector<200x16xbf16>
    tpu.vector_store %arg4[%c0_6, %c0_7], %8 {strides = array<i32>} : memref<200x16xbf16, #tpu.memory_space<vmem>>, vector<200x16xbf16>,
    return
  }
  func.func @transform_0(%arg0: i32) -> (i32, i32) {
    %c0_i32 = arith.constant 0 : i32
    %c0_i32_0 = arith.constant 0 : i32
    return %arg0, %c0_i32 : i32, i32
  }
  func.func @transform_1(%arg0: i32) -> (i32, i32) {
    %c0_i32 = arith.constant 0 : i32
    %c0_i32_0 = arith.constant 0 : i32
    %c0_i32_1 = arith.constant 0 : i32
    return %c0_i32, %c0_i32_0 : i32, i32
  }
  func.func @transform_2(%arg0: i32) -> (i32, i32) {
    %c0_i32 = arith.constant 0 : i32
    %c0_i32_0 = arith.constant 0 : i32
    %c0_i32_1 = arith.constant 0 : i32
    return %c0_i32, %c0_i32_0 : i32, i32
  }
  func.func @transform_3(%arg0: i32) -> (i32, i32) {
    %c0_i32 = arith.constant 0 : i32
    %c0_i32_0 = arith.constant 0 : i32
    return %arg0, %c0_i32 : i32, i32
  }
}

module attributes {stable_mosaic.version = 11 : i64} {
  func.func @_conv_tail_kernel(%arg0: memref<25x2x400xbf16, #tpu.memory_space<vmem>>, %arg1: memref<400x32xbf16, #tpu.memory_space<vmem>>, %arg2: memref<1x32xf32, #tpu.memory_space<vmem>>, %arg3: memref<25x32x32xbf16, #tpu.memory_space<vmem>>, %arg4: memref<1x32xf32, #tpu.memory_space<vmem>>, %arg5: memref<32x4xf32, #tpu.memory_space<vmem>>, %arg6: memref<1x4xf32, #tpu.memory_space<vmem>>, %arg7: memref<2x4xf32, #tpu.memory_space<vmem>>) attributes {dimension_semantics = [], scalar_prefetch = 0 : i64, scratch_operands = 0 : i64, tpu.core_type = #tpu.core_type<tc>} {
    %cst = arith.constant 0.000000e+00 : f32
    %0 = vector.broadcast %cst : f32 to vector<2x32xf32>
    %c0 = arith.constant 0 : index
    %c0_0 = arith.constant 0 : index
    %c0_1 = arith.constant 0 : index
    %1 = vector.load %arg0[%c0, %c0_0, %c0_1] : memref<25x2x400xbf16, #tpu.memory_space<vmem>>, vector<1x2x400xbf16>
    %2 = vector.shape_cast %1 : vector<1x2x400xbf16> to vector<2x400xbf16>
    %c0_2 = arith.constant 0 : index
    %c0_3 = arith.constant 0 : index
    %3 = vector.load %arg1[%c0_2, %c0_3] : memref<400x32xbf16, #tpu.memory_space<vmem>>, vector<400x32xbf16>
    %cst_4 = arith.constant dense<0.000000e+00> : vector<2x32xf32>
    %4 = tpu.matmul %2, %3, %cst_4 {dimension_numbers = #tpu.dot_dimension_numbers<[1], [0], [0], [1], [0, 0, 1, 1], [], []>} : vector<2x400xbf16>, vector<400x32xbf16>, vector<2x32xf32> -> vector<2x32xf32>
    %c0_5 = arith.constant 0 : index
    %c0_6 = arith.constant 0 : index
    %5 = vector.load %arg2[%c0_5, %c0_6] : memref<1x32xf32, #tpu.memory_space<vmem>>, vector<1x32xf32>
    %6 = vector.broadcast %5 : vector<1x32xf32> to vector<2x32xf32>
    %7 = arith.addf %4, %6 : vector<2x32xf32>
    %cst_7 = arith.constant 0.000000e+00 : f32
    %8 = vector.broadcast %cst_7 : f32 to vector<2x32xf32>
    %9 = arith.maximumf %7, %8 : vector<2x32xf32>
    %10 = arith.truncf %9 : vector<2x32xf32> to vector<2x32xbf16>
    %c0_8 = arith.constant 0 : index
    %c0_9 = arith.constant 0 : index
    %c0_10 = arith.constant 0 : index
    %11 = vector.load %arg3[%c0_8, %c0_9, %c0_10] : memref<25x32x32xbf16, #tpu.memory_space<vmem>>, vector<1x32x32xbf16>
    %12 = vector.shape_cast %11 : vector<1x32x32xbf16> to vector<32x32xbf16>
    %cst_11 = arith.constant dense<0.000000e+00> : vector<2x32xf32>
    %13 = tpu.matmul %10, %12, %cst_11 {dimension_numbers = #tpu.dot_dimension_numbers<[1], [0], [0], [1], [0, 0, 1, 1], [], []>} : vector<2x32xbf16>, vector<32x32xbf16>, vector<2x32xf32> -> vector<2x32xf32>
    %14 = arith.addf %0, %13 : vector<2x32xf32>
    %c1 = arith.constant 1 : index
    %c0_12 = arith.constant 0 : index
    %c0_13 = arith.constant 0 : index
    %15 = vector.load %arg0[%c1, %c0_12, %c0_13] : memref<25x2x400xbf16, #tpu.memory_space<vmem>>, vector<1x2x400xbf16>
    %16 = vector.shape_cast %15 : vector<1x2x400xbf16> to vector<2x400xbf16>
    %c0_14 = arith.constant 0 : index
    %c0_15 = arith.constant 0 : index
    %17 = vector.load %arg1[%c0_14, %c0_15] : memref<400x32xbf16, #tpu.memory_space<vmem>>, vector<400x32xbf16>
    %cst_16 = arith.constant dense<0.000000e+00> : vector<2x32xf32>
    %18 = tpu.matmul %16, %17, %cst_16 {dimension_numbers = #tpu.dot_dimension_numbers<[1], [0], [0], [1], [0, 0, 1, 1], [], []>} : vector<2x400xbf16>, vector<400x32xbf16>, vector<2x32xf32> -> vector<2x32xf32>
    %c0_17 = arith.constant 0 : index
    %c0_18 = arith.constant 0 : index
    %19 = vector.load %arg2[%c0_17, %c0_18] : memref<1x32xf32, #tpu.memory_space<vmem>>, vector<1x32xf32>
    %20 = vector.broadcast %19 : vector<1x32xf32> to vector<2x32xf32>
    %21 = arith.addf %18, %20 : vector<2x32xf32>
    %cst_19 = arith.constant 0.000000e+00 : f32
    %22 = vector.broadcast %cst_19 : f32 to vector<2x32xf32>
    %23 = arith.maximumf %21, %22 : vector<2x32xf32>
    %24 = arith.truncf %23 : vector<2x32xf32> to vector<2x32xbf16>
    %c1_20 = arith.constant 1 : index
    %c0_21 = arith.constant 0 : index
    %c0_22 = arith.constant 0 : index
    %25 = vector.load %arg3[%c1_20, %c0_21, %c0_22] : memref<25x32x32xbf16, #tpu.memory_space<vmem>>, vector<1x32x32xbf16>
    %26 = vector.shape_cast %25 : vector<1x32x32xbf16> to vector<32x32xbf16>
    %cst_23 = arith.constant dense<0.000000e+00> : vector<2x32xf32>
    %27 = tpu.matmul %24, %26, %cst_23 {dimension_numbers = #tpu.dot_dimension_numbers<[1], [0], [0], [1], [0, 0, 1, 1], [], []>} : vector<2x32xbf16>, vector<32x32xbf16>, vector<2x32xf32> -> vector<2x32xf32>
    %28 = arith.addf %14, %27 : vector<2x32xf32>
    %c2 = arith.constant 2 : index
    %c0_24 = arith.constant 0 : index
    %c0_25 = arith.constant 0 : index
    %29 = vector.load %arg0[%c2, %c0_24, %c0_25] : memref<25x2x400xbf16, #tpu.memory_space<vmem>>, vector<1x2x400xbf16>
    %30 = vector.shape_cast %29 : vector<1x2x400xbf16> to vector<2x400xbf16>
    %c0_26 = arith.constant 0 : index
    %c0_27 = arith.constant 0 : index
    %31 = vector.load %arg1[%c0_26, %c0_27] : memref<400x32xbf16, #tpu.memory_space<vmem>>, vector<400x32xbf16>
    %cst_28 = arith.constant dense<0.000000e+00> : vector<2x32xf32>
    %32 = tpu.matmul %30, %31, %cst_28 {dimension_numbers = #tpu.dot_dimension_numbers<[1], [0], [0], [1], [0, 0, 1, 1], [], []>} : vector<2x400xbf16>, vector<400x32xbf16>, vector<2x32xf32> -> vector<2x32xf32>
    %c0_29 = arith.constant 0 : index
    %c0_30 = arith.constant 0 : index
    %33 = vector.load %arg2[%c0_29, %c0_30] : memref<1x32xf32, #tpu.memory_space<vmem>>, vector<1x32xf32>
    %34 = vector.broadcast %33 : vector<1x32xf32> to vector<2x32xf32>
    %35 = arith.addf %32, %34 : vector<2x32xf32>
    %cst_31 = arith.constant 0.000000e+00 : f32
    %36 = vector.broadcast %cst_31 : f32 to vector<2x32xf32>
    %37 = arith.maximumf %35, %36 : vector<2x32xf32>
    %38 = arith.truncf %37 : vector<2x32xf32> to vector<2x32xbf16>
    %c2_32 = arith.constant 2 : index
    %c0_33 = arith.constant 0 : index
    %c0_34 = arith.constant 0 : index
    %39 = vector.load %arg3[%c2_32, %c0_33, %c0_34] : memref<25x32x32xbf16, #tpu.memory_space<vmem>>, vector<1x32x32xbf16>
    %40 = vector.shape_cast %39 : vector<1x32x32xbf16> to vector<32x32xbf16>
    %cst_35 = arith.constant dense<0.000000e+00> : vector<2x32xf32>
    %41 = tpu.matmul %38, %40, %cst_35 {dimension_numbers = #tpu.dot_dimension_numbers<[1], [0], [0], [1], [0, 0, 1, 1], [], []>} : vector<2x32xbf16>, vector<32x32xbf16>, vector<2x32xf32> -> vector<2x32xf32>
    %42 = arith.addf %28, %41 : vector<2x32xf32>
    %c3 = arith.constant 3 : index
    %c0_36 = arith.constant 0 : index
    %c0_37 = arith.constant 0 : index
    %43 = vector.load %arg0[%c3, %c0_36, %c0_37] : memref<25x2x400xbf16, #tpu.memory_space<vmem>>, vector<1x2x400xbf16>
    %44 = vector.shape_cast %43 : vector<1x2x400xbf16> to vector<2x400xbf16>
    %c0_38 = arith.constant 0 : index
    %c0_39 = arith.constant 0 : index
    %45 = vector.load %arg1[%c0_38, %c0_39] : memref<400x32xbf16, #tpu.memory_space<vmem>>, vector<400x32xbf16>
    %cst_40 = arith.constant dense<0.000000e+00> : vector<2x32xf32>
    %46 = tpu.matmul %44, %45, %cst_40 {dimension_numbers = #tpu.dot_dimension_numbers<[1], [0], [0], [1], [0, 0, 1, 1], [], []>} : vector<2x400xbf16>, vector<400x32xbf16>, vector<2x32xf32> -> vector<2x32xf32>
    %c0_41 = arith.constant 0 : index
    %c0_42 = arith.constant 0 : index
    %47 = vector.load %arg2[%c0_41, %c0_42] : memref<1x32xf32, #tpu.memory_space<vmem>>, vector<1x32xf32>
    %48 = vector.broadcast %47 : vector<1x32xf32> to vector<2x32xf32>
    %49 = arith.addf %46, %48 : vector<2x32xf32>
    %cst_43 = arith.constant 0.000000e+00 : f32
    %50 = vector.broadcast %cst_43 : f32 to vector<2x32xf32>
    %51 = arith.maximumf %49, %50 : vector<2x32xf32>
    %52 = arith.truncf %51 : vector<2x32xf32> to vector<2x32xbf16>
    %c3_44 = arith.constant 3 : index
    %c0_45 = arith.constant 0 : index
    %c0_46 = arith.constant 0 : index
    %53 = vector.load %arg3[%c3_44, %c0_45, %c0_46] : memref<25x32x32xbf16, #tpu.memory_space<vmem>>, vector<1x32x32xbf16>
    %54 = vector.shape_cast %53 : vector<1x32x32xbf16> to vector<32x32xbf16>
    %cst_47 = arith.constant dense<0.000000e+00> : vector<2x32xf32>
    %55 = tpu.matmul %52, %54, %cst_47 {dimension_numbers = #tpu.dot_dimension_numbers<[1], [0], [0], [1], [0, 0, 1, 1], [], []>} : vector<2x32xbf16>, vector<32x32xbf16>, vector<2x32xf32> -> vector<2x32xf32>
    %56 = arith.addf %42, %55 : vector<2x32xf32>
    %c4 = arith.constant 4 : index
    %c0_48 = arith.constant 0 : index
    %c0_49 = arith.constant 0 : index
    %57 = vector.load %arg0[%c4, %c0_48, %c0_49] : memref<25x2x400xbf16, #tpu.memory_space<vmem>>, vector<1x2x400xbf16>
    %58 = vector.shape_cast %57 : vector<1x2x400xbf16> to vector<2x400xbf16>
    %c0_50 = arith.constant 0 : index
    %c0_51 = arith.constant 0 : index
    %59 = vector.load %arg1[%c0_50, %c0_51] : memref<400x32xbf16, #tpu.memory_space<vmem>>, vector<400x32xbf16>
    %cst_52 = arith.constant dense<0.000000e+00> : vector<2x32xf32>
    %60 = tpu.matmul %58, %59, %cst_52 {dimension_numbers = #tpu.dot_dimension_numbers<[1], [0], [0], [1], [0, 0, 1, 1], [], []>} : vector<2x400xbf16>, vector<400x32xbf16>, vector<2x32xf32> -> vector<2x32xf32>
    %c0_53 = arith.constant 0 : index
    %c0_54 = arith.constant 0 : index
    %61 = vector.load %arg2[%c0_53, %c0_54] : memref<1x32xf32, #tpu.memory_space<vmem>>, vector<1x32xf32>
    %62 = vector.broadcast %61 : vector<1x32xf32> to vector<2x32xf32>
    %63 = arith.addf %60, %62 : vector<2x32xf32>
    %cst_55 = arith.constant 0.000000e+00 : f32
    %64 = vector.broadcast %cst_55 : f32 to vector<2x32xf32>
    %65 = arith.maximumf %63, %64 : vector<2x32xf32>
    %66 = arith.truncf %65 : vector<2x32xf32> to vector<2x32xbf16>
    %c4_56 = arith.constant 4 : index
    %c0_57 = arith.constant 0 : index
    %c0_58 = arith.constant 0 : index
    %67 = vector.load %arg3[%c4_56, %c0_57, %c0_58] : memref<25x32x32xbf16, #tpu.memory_space<vmem>>, vector<1x32x32xbf16>
    %68 = vector.shape_cast %67 : vector<1x32x32xbf16> to vector<32x32xbf16>
    %cst_59 = arith.constant dense<0.000000e+00> : vector<2x32xf32>
    %69 = tpu.matmul %66, %68, %cst_59 {dimension_numbers = #tpu.dot_dimension_numbers<[1], [0], [0], [1], [0, 0, 1, 1], [], []>} : vector<2x32xbf16>, vector<32x32xbf16>, vector<2x32xf32> -> vector<2x32xf32>
    %70 = arith.addf %56, %69 : vector<2x32xf32>
    %c5 = arith.constant 5 : index
    %c0_60 = arith.constant 0 : index
    %c0_61 = arith.constant 0 : index
    %71 = vector.load %arg0[%c5, %c0_60, %c0_61] : memref<25x2x400xbf16, #tpu.memory_space<vmem>>, vector<1x2x400xbf16>
    %72 = vector.shape_cast %71 : vector<1x2x400xbf16> to vector<2x400xbf16>
    %c0_62 = arith.constant 0 : index
    %c0_63 = arith.constant 0 : index
    %73 = vector.load %arg1[%c0_62, %c0_63] : memref<400x32xbf16, #tpu.memory_space<vmem>>, vector<400x32xbf16>
    %cst_64 = arith.constant dense<0.000000e+00> : vector<2x32xf32>
    %74 = tpu.matmul %72, %73, %cst_64 {dimension_numbers = #tpu.dot_dimension_numbers<[1], [0], [0], [1], [0, 0, 1, 1], [], []>} : vector<2x400xbf16>, vector<400x32xbf16>, vector<2x32xf32> -> vector<2x32xf32>
    %c0_65 = arith.constant 0 : index
    %c0_66 = arith.constant 0 : index
    %75 = vector.load %arg2[%c0_65, %c0_66] : memref<1x32xf32, #tpu.memory_space<vmem>>, vector<1x32xf32>
    %76 = vector.broadcast %75 : vector<1x32xf32> to vector<2x32xf32>
    %77 = arith.addf %74, %76 : vector<2x32xf32>
    %cst_67 = arith.constant 0.000000e+00 : f32
    %78 = vector.broadcast %cst_67 : f32 to vector<2x32xf32>
    %79 = arith.maximumf %77, %78 : vector<2x32xf32>
    %80 = arith.truncf %79 : vector<2x32xf32> to vector<2x32xbf16>
    %c5_68 = arith.constant 5 : index
    %c0_69 = arith.constant 0 : index
    %c0_70 = arith.constant 0 : index
    %81 = vector.load %arg3[%c5_68, %c0_69, %c0_70] : memref<25x32x32xbf16, #tpu.memory_space<vmem>>, vector<1x32x32xbf16>
    %82 = vector.shape_cast %81 : vector<1x32x32xbf16> to vector<32x32xbf16>
    %cst_71 = arith.constant dense<0.000000e+00> : vector<2x32xf32>
    %83 = tpu.matmul %80, %82, %cst_71 {dimension_numbers = #tpu.dot_dimension_numbers<[1], [0], [0], [1], [0, 0, 1, 1], [], []>} : vector<2x32xbf16>, vector<32x32xbf16>, vector<2x32xf32> -> vector<2x32xf32>
    %84 = arith.addf %70, %83 : vector<2x32xf32>
    %c6 = arith.constant 6 : index
    %c0_72 = arith.constant 0 : index
    %c0_73 = arith.constant 0 : index
    %85 = vector.load %arg0[%c6, %c0_72, %c0_73] : memref<25x2x400xbf16, #tpu.memory_space<vmem>>, vector<1x2x400xbf16>
    %86 = vector.shape_cast %85 : vector<1x2x400xbf16> to vector<2x400xbf16>
    %c0_74 = arith.constant 0 : index
    %c0_75 = arith.constant 0 : index
    %87 = vector.load %arg1[%c0_74, %c0_75] : memref<400x32xbf16, #tpu.memory_space<vmem>>, vector<400x32xbf16>
    %cst_76 = arith.constant dense<0.000000e+00> : vector<2x32xf32>
    %88 = tpu.matmul %86, %87, %cst_76 {dimension_numbers = #tpu.dot_dimension_numbers<[1], [0], [0], [1], [0, 0, 1, 1], [], []>} : vector<2x400xbf16>, vector<400x32xbf16>, vector<2x32xf32> -> vector<2x32xf32>
    %c0_77 = arith.constant 0 : index
    %c0_78 = arith.constant 0 : index
    %89 = vector.load %arg2[%c0_77, %c0_78] : memref<1x32xf32, #tpu.memory_space<vmem>>, vector<1x32xf32>
    %90 = vector.broadcast %89 : vector<1x32xf32> to vector<2x32xf32>
    %91 = arith.addf %88, %90 : vector<2x32xf32>
    %cst_79 = arith.constant 0.000000e+00 : f32
    %92 = vector.broadcast %cst_79 : f32 to vector<2x32xf32>
    %93 = arith.maximumf %91, %92 : vector<2x32xf32>
    %94 = arith.truncf %93 : vector<2x32xf32> to vector<2x32xbf16>
    %c6_80 = arith.constant 6 : index
    %c0_81 = arith.constant 0 : index
    %c0_82 = arith.constant 0 : index
    %95 = vector.load %arg3[%c6_80, %c0_81, %c0_82] : memref<25x32x32xbf16, #tpu.memory_space<vmem>>, vector<1x32x32xbf16>
    %96 = vector.shape_cast %95 : vector<1x32x32xbf16> to vector<32x32xbf16>
    %cst_83 = arith.constant dense<0.000000e+00> : vector<2x32xf32>
    %97 = tpu.matmul %94, %96, %cst_83 {dimension_numbers = #tpu.dot_dimension_numbers<[1], [0], [0], [1], [0, 0, 1, 1], [], []>} : vector<2x32xbf16>, vector<32x32xbf16>, vector<2x32xf32> -> vector<2x32xf32>
    %98 = arith.addf %84, %97 : vector<2x32xf32>
    %c7 = arith.constant 7 : index
    %c0_84 = arith.constant 0 : index
    %c0_85 = arith.constant 0 : index
    %99 = vector.load %arg0[%c7, %c0_84, %c0_85] : memref<25x2x400xbf16, #tpu.memory_space<vmem>>, vector<1x2x400xbf16>
    %100 = vector.shape_cast %99 : vector<1x2x400xbf16> to vector<2x400xbf16>
    %c0_86 = arith.constant 0 : index
    %c0_87 = arith.constant 0 : index
    %101 = vector.load %arg1[%c0_86, %c0_87] : memref<400x32xbf16, #tpu.memory_space<vmem>>, vector<400x32xbf16>
    %cst_88 = arith.constant dense<0.000000e+00> : vector<2x32xf32>
    %102 = tpu.matmul %100, %101, %cst_88 {dimension_numbers = #tpu.dot_dimension_numbers<[1], [0], [0], [1], [0, 0, 1, 1], [], []>} : vector<2x400xbf16>, vector<400x32xbf16>, vector<2x32xf32> -> vector<2x32xf32>
    %c0_89 = arith.constant 0 : index
    %c0_90 = arith.constant 0 : index
    %103 = vector.load %arg2[%c0_89, %c0_90] : memref<1x32xf32, #tpu.memory_space<vmem>>, vector<1x32xf32>
    %104 = vector.broadcast %103 : vector<1x32xf32> to vector<2x32xf32>
    %105 = arith.addf %102, %104 : vector<2x32xf32>
    %cst_91 = arith.constant 0.000000e+00 : f32
    %106 = vector.broadcast %cst_91 : f32 to vector<2x32xf32>
    %107 = arith.maximumf %105, %106 : vector<2x32xf32>
    %108 = arith.truncf %107 : vector<2x32xf32> to vector<2x32xbf16>
    %c7_92 = arith.constant 7 : index
    %c0_93 = arith.constant 0 : index
    %c0_94 = arith.constant 0 : index
    %109 = vector.load %arg3[%c7_92, %c0_93, %c0_94] : memref<25x32x32xbf16, #tpu.memory_space<vmem>>, vector<1x32x32xbf16>
    %110 = vector.shape_cast %109 : vector<1x32x32xbf16> to vector<32x32xbf16>
    %cst_95 = arith.constant dense<0.000000e+00> : vector<2x32xf32>
    %111 = tpu.matmul %108, %110, %cst_95 {dimension_numbers = #tpu.dot_dimension_numbers<[1], [0], [0], [1], [0, 0, 1, 1], [], []>} : vector<2x32xbf16>, vector<32x32xbf16>, vector<2x32xf32> -> vector<2x32xf32>
    %112 = arith.addf %98, %111 : vector<2x32xf32>
    %c8 = arith.constant 8 : index
    %c0_96 = arith.constant 0 : index
    %c0_97 = arith.constant 0 : index
    %113 = vector.load %arg0[%c8, %c0_96, %c0_97] : memref<25x2x400xbf16, #tpu.memory_space<vmem>>, vector<1x2x400xbf16>
    %114 = vector.shape_cast %113 : vector<1x2x400xbf16> to vector<2x400xbf16>
    %c0_98 = arith.constant 0 : index
    %c0_99 = arith.constant 0 : index
    %115 = vector.load %arg1[%c0_98, %c0_99] : memref<400x32xbf16, #tpu.memory_space<vmem>>, vector<400x32xbf16>
    %cst_100 = arith.constant dense<0.000000e+00> : vector<2x32xf32>
    %116 = tpu.matmul %114, %115, %cst_100 {dimension_numbers = #tpu.dot_dimension_numbers<[1], [0], [0], [1], [0, 0, 1, 1], [], []>} : vector<2x400xbf16>, vector<400x32xbf16>, vector<2x32xf32> -> vector<2x32xf32>
    %c0_101 = arith.constant 0 : index
    %c0_102 = arith.constant 0 : index
    %117 = vector.load %arg2[%c0_101, %c0_102] : memref<1x32xf32, #tpu.memory_space<vmem>>, vector<1x32xf32>
    %118 = vector.broadcast %117 : vector<1x32xf32> to vector<2x32xf32>
    %119 = arith.addf %116, %118 : vector<2x32xf32>
    %cst_103 = arith.constant 0.000000e+00 : f32
    %120 = vector.broadcast %cst_103 : f32 to vector<2x32xf32>
    %121 = arith.maximumf %119, %120 : vector<2x32xf32>
    %122 = arith.truncf %121 : vector<2x32xf32> to vector<2x32xbf16>
    %c8_104 = arith.constant 8 : index
    %c0_105 = arith.constant 0 : index
    %c0_106 = arith.constant 0 : index
    %123 = vector.load %arg3[%c8_104, %c0_105, %c0_106] : memref<25x32x32xbf16, #tpu.memory_space<vmem>>, vector<1x32x32xbf16>
    %124 = vector.shape_cast %123 : vector<1x32x32xbf16> to vector<32x32xbf16>
    %cst_107 = arith.constant dense<0.000000e+00> : vector<2x32xf32>
    %125 = tpu.matmul %122, %124, %cst_107 {dimension_numbers = #tpu.dot_dimension_numbers<[1], [0], [0], [1], [0, 0, 1, 1], [], []>} : vector<2x32xbf16>, vector<32x32xbf16>, vector<2x32xf32> -> vector<2x32xf32>
    %126 = arith.addf %112, %125 : vector<2x32xf32>
    %c9 = arith.constant 9 : index
    %c0_108 = arith.constant 0 : index
    %c0_109 = arith.constant 0 : index
    %127 = vector.load %arg0[%c9, %c0_108, %c0_109] : memref<25x2x400xbf16, #tpu.memory_space<vmem>>, vector<1x2x400xbf16>
    %128 = vector.shape_cast %127 : vector<1x2x400xbf16> to vector<2x400xbf16>
    %c0_110 = arith.constant 0 : index
    %c0_111 = arith.constant 0 : index
    %129 = vector.load %arg1[%c0_110, %c0_111] : memref<400x32xbf16, #tpu.memory_space<vmem>>, vector<400x32xbf16>
    %cst_112 = arith.constant dense<0.000000e+00> : vector<2x32xf32>
    %130 = tpu.matmul %128, %129, %cst_112 {dimension_numbers = #tpu.dot_dimension_numbers<[1], [0], [0], [1], [0, 0, 1, 1], [], []>} : vector<2x400xbf16>, vector<400x32xbf16>, vector<2x32xf32> -> vector<2x32xf32>
    %c0_113 = arith.constant 0 : index
    %c0_114 = arith.constant 0 : index
    %131 = vector.load %arg2[%c0_113, %c0_114] : memref<1x32xf32, #tpu.memory_space<vmem>>, vector<1x32xf32>
    %132 = vector.broadcast %131 : vector<1x32xf32> to vector<2x32xf32>
    %133 = arith.addf %130, %132 : vector<2x32xf32>
    %cst_115 = arith.constant 0.000000e+00 : f32
    %134 = vector.broadcast %cst_115 : f32 to vector<2x32xf32>
    %135 = arith.maximumf %133, %134 : vector<2x32xf32>
    %136 = arith.truncf %135 : vector<2x32xf32> to vector<2x32xbf16>
    %c9_116 = arith.constant 9 : index
    %c0_117 = arith.constant 0 : index
    %c0_118 = arith.constant 0 : index
    %137 = vector.load %arg3[%c9_116, %c0_117, %c0_118] : memref<25x32x32xbf16, #tpu.memory_space<vmem>>, vector<1x32x32xbf16>
    %138 = vector.shape_cast %137 : vector<1x32x32xbf16> to vector<32x32xbf16>
    %cst_119 = arith.constant dense<0.000000e+00> : vector<2x32xf32>
    %139 = tpu.matmul %136, %138, %cst_119 {dimension_numbers = #tpu.dot_dimension_numbers<[1], [0], [0], [1], [0, 0, 1, 1], [], []>} : vector<2x32xbf16>, vector<32x32xbf16>, vector<2x32xf32> -> vector<2x32xf32>
    %140 = arith.addf %126, %139 : vector<2x32xf32>
    %c10 = arith.constant 10 : index
    %c0_120 = arith.constant 0 : index
    %c0_121 = arith.constant 0 : index
    %141 = vector.load %arg0[%c10, %c0_120, %c0_121] : memref<25x2x400xbf16, #tpu.memory_space<vmem>>, vector<1x2x400xbf16>
    %142 = vector.shape_cast %141 : vector<1x2x400xbf16> to vector<2x400xbf16>
    %c0_122 = arith.constant 0 : index
    %c0_123 = arith.constant 0 : index
    %143 = vector.load %arg1[%c0_122, %c0_123] : memref<400x32xbf16, #tpu.memory_space<vmem>>, vector<400x32xbf16>
    %cst_124 = arith.constant dense<0.000000e+00> : vector<2x32xf32>
    %144 = tpu.matmul %142, %143, %cst_124 {dimension_numbers = #tpu.dot_dimension_numbers<[1], [0], [0], [1], [0, 0, 1, 1], [], []>} : vector<2x400xbf16>, vector<400x32xbf16>, vector<2x32xf32> -> vector<2x32xf32>
    %c0_125 = arith.constant 0 : index
    %c0_126 = arith.constant 0 : index
    %145 = vector.load %arg2[%c0_125, %c0_126] : memref<1x32xf32, #tpu.memory_space<vmem>>, vector<1x32xf32>
    %146 = vector.broadcast %145 : vector<1x32xf32> to vector<2x32xf32>
    %147 = arith.addf %144, %146 : vector<2x32xf32>
    %cst_127 = arith.constant 0.000000e+00 : f32
    %148 = vector.broadcast %cst_127 : f32 to vector<2x32xf32>
    %149 = arith.maximumf %147, %148 : vector<2x32xf32>
    %150 = arith.truncf %149 : vector<2x32xf32> to vector<2x32xbf16>
    %c10_128 = arith.constant 10 : index
    %c0_129 = arith.constant 0 : index
    %c0_130 = arith.constant 0 : index
    %151 = vector.load %arg3[%c10_128, %c0_129, %c0_130] : memref<25x32x32xbf16, #tpu.memory_space<vmem>>, vector<1x32x32xbf16>
    %152 = vector.shape_cast %151 : vector<1x32x32xbf16> to vector<32x32xbf16>
    %cst_131 = arith.constant dense<0.000000e+00> : vector<2x32xf32>
    %153 = tpu.matmul %150, %152, %cst_131 {dimension_numbers = #tpu.dot_dimension_numbers<[1], [0], [0], [1], [0, 0, 1, 1], [], []>} : vector<2x32xbf16>, vector<32x32xbf16>, vector<2x32xf32> -> vector<2x32xf32>
    %154 = arith.addf %140, %153 : vector<2x32xf32>
    %c11 = arith.constant 11 : index
    %c0_132 = arith.constant 0 : index
    %c0_133 = arith.constant 0 : index
    %155 = vector.load %arg0[%c11, %c0_132, %c0_133] : memref<25x2x400xbf16, #tpu.memory_space<vmem>>, vector<1x2x400xbf16>
    %156 = vector.shape_cast %155 : vector<1x2x400xbf16> to vector<2x400xbf16>
    %c0_134 = arith.constant 0 : index
    %c0_135 = arith.constant 0 : index
    %157 = vector.load %arg1[%c0_134, %c0_135] : memref<400x32xbf16, #tpu.memory_space<vmem>>, vector<400x32xbf16>
    %cst_136 = arith.constant dense<0.000000e+00> : vector<2x32xf32>
    %158 = tpu.matmul %156, %157, %cst_136 {dimension_numbers = #tpu.dot_dimension_numbers<[1], [0], [0], [1], [0, 0, 1, 1], [], []>} : vector<2x400xbf16>, vector<400x32xbf16>, vector<2x32xf32> -> vector<2x32xf32>
    %c0_137 = arith.constant 0 : index
    %c0_138 = arith.constant 0 : index
    %159 = vector.load %arg2[%c0_137, %c0_138] : memref<1x32xf32, #tpu.memory_space<vmem>>, vector<1x32xf32>
    %160 = vector.broadcast %159 : vector<1x32xf32> to vector<2x32xf32>
    %161 = arith.addf %158, %160 : vector<2x32xf32>
    %cst_139 = arith.constant 0.000000e+00 : f32
    %162 = vector.broadcast %cst_139 : f32 to vector<2x32xf32>
    %163 = arith.maximumf %161, %162 : vector<2x32xf32>
    %164 = arith.truncf %163 : vector<2x32xf32> to vector<2x32xbf16>
    %c11_140 = arith.constant 11 : index
    %c0_141 = arith.constant 0 : index
    %c0_142 = arith.constant 0 : index
    %165 = vector.load %arg3[%c11_140, %c0_141, %c0_142] : memref<25x32x32xbf16, #tpu.memory_space<vmem>>, vector<1x32x32xbf16>
    %166 = vector.shape_cast %165 : vector<1x32x32xbf16> to vector<32x32xbf16>
    %cst_143 = arith.constant dense<0.000000e+00> : vector<2x32xf32>
    %167 = tpu.matmul %164, %166, %cst_143 {dimension_numbers = #tpu.dot_dimension_numbers<[1], [0], [0], [1], [0, 0, 1, 1], [], []>} : vector<2x32xbf16>, vector<32x32xbf16>, vector<2x32xf32> -> vector<2x32xf32>
    %168 = arith.addf %154, %167 : vector<2x32xf32>
    %c12 = arith.constant 12 : index
    %c0_144 = arith.constant 0 : index
    %c0_145 = arith.constant 0 : index
    %169 = vector.load %arg0[%c12, %c0_144, %c0_145] : memref<25x2x400xbf16, #tpu.memory_space<vmem>>, vector<1x2x400xbf16>
    %170 = vector.shape_cast %169 : vector<1x2x400xbf16> to vector<2x400xbf16>
    %c0_146 = arith.constant 0 : index
    %c0_147 = arith.constant 0 : index
    %171 = vector.load %arg1[%c0_146, %c0_147] : memref<400x32xbf16, #tpu.memory_space<vmem>>, vector<400x32xbf16>
    %cst_148 = arith.constant dense<0.000000e+00> : vector<2x32xf32>
    %172 = tpu.matmul %170, %171, %cst_148 {dimension_numbers = #tpu.dot_dimension_numbers<[1], [0], [0], [1], [0, 0, 1, 1], [], []>} : vector<2x400xbf16>, vector<400x32xbf16>, vector<2x32xf32> -> vector<2x32xf32>
    %c0_149 = arith.constant 0 : index
    %c0_150 = arith.constant 0 : index
    %173 = vector.load %arg2[%c0_149, %c0_150] : memref<1x32xf32, #tpu.memory_space<vmem>>, vector<1x32xf32>
    %174 = vector.broadcast %173 : vector<1x32xf32> to vector<2x32xf32>
    %175 = arith.addf %172, %174 : vector<2x32xf32>
    %cst_151 = arith.constant 0.000000e+00 : f32
    %176 = vector.broadcast %cst_151 : f32 to vector<2x32xf32>
    %177 = arith.maximumf %175, %176 : vector<2x32xf32>
    %178 = arith.truncf %177 : vector<2x32xf32> to vector<2x32xbf16>
    %c12_152 = arith.constant 12 : index
    %c0_153 = arith.constant 0 : index
    %c0_154 = arith.constant 0 : index
    %179 = vector.load %arg3[%c12_152, %c0_153, %c0_154] : memref<25x32x32xbf16, #tpu.memory_space<vmem>>, vector<1x32x32xbf16>
    %180 = vector.shape_cast %179 : vector<1x32x32xbf16> to vector<32x32xbf16>
    %cst_155 = arith.constant dense<0.000000e+00> : vector<2x32xf32>
    %181 = tpu.matmul %178, %180, %cst_155 {dimension_numbers = #tpu.dot_dimension_numbers<[1], [0], [0], [1], [0, 0, 1, 1], [], []>} : vector<2x32xbf16>, vector<32x32xbf16>, vector<2x32xf32> -> vector<2x32xf32>
    %182 = arith.addf %168, %181 : vector<2x32xf32>
    %c13 = arith.constant 13 : index
    %c0_156 = arith.constant 0 : index
    %c0_157 = arith.constant 0 : index
    %183 = vector.load %arg0[%c13, %c0_156, %c0_157] : memref<25x2x400xbf16, #tpu.memory_space<vmem>>, vector<1x2x400xbf16>
    %184 = vector.shape_cast %183 : vector<1x2x400xbf16> to vector<2x400xbf16>
    %c0_158 = arith.constant 0 : index
    %c0_159 = arith.constant 0 : index
    %185 = vector.load %arg1[%c0_158, %c0_159] : memref<400x32xbf16, #tpu.memory_space<vmem>>, vector<400x32xbf16>
    %cst_160 = arith.constant dense<0.000000e+00> : vector<2x32xf32>
    %186 = tpu.matmul %184, %185, %cst_160 {dimension_numbers = #tpu.dot_dimension_numbers<[1], [0], [0], [1], [0, 0, 1, 1], [], []>} : vector<2x400xbf16>, vector<400x32xbf16>, vector<2x32xf32> -> vector<2x32xf32>
    %c0_161 = arith.constant 0 : index
    %c0_162 = arith.constant 0 : index
    %187 = vector.load %arg2[%c0_161, %c0_162] : memref<1x32xf32, #tpu.memory_space<vmem>>, vector<1x32xf32>
    %188 = vector.broadcast %187 : vector<1x32xf32> to vector<2x32xf32>
    %189 = arith.addf %186, %188 : vector<2x32xf32>
    %cst_163 = arith.constant 0.000000e+00 : f32
    %190 = vector.broadcast %cst_163 : f32 to vector<2x32xf32>
    %191 = arith.maximumf %189, %190 : vector<2x32xf32>
    %192 = arith.truncf %191 : vector<2x32xf32> to vector<2x32xbf16>
    %c13_164 = arith.constant 13 : index
    %c0_165 = arith.constant 0 : index
    %c0_166 = arith.constant 0 : index
    %193 = vector.load %arg3[%c13_164, %c0_165, %c0_166] : memref<25x32x32xbf16, #tpu.memory_space<vmem>>, vector<1x32x32xbf16>
    %194 = vector.shape_cast %193 : vector<1x32x32xbf16> to vector<32x32xbf16>
    %cst_167 = arith.constant dense<0.000000e+00> : vector<2x32xf32>
    %195 = tpu.matmul %192, %194, %cst_167 {dimension_numbers = #tpu.dot_dimension_numbers<[1], [0], [0], [1], [0, 0, 1, 1], [], []>} : vector<2x32xbf16>, vector<32x32xbf16>, vector<2x32xf32> -> vector<2x32xf32>
    %196 = arith.addf %182, %195 : vector<2x32xf32>
    %c14 = arith.constant 14 : index
    %c0_168 = arith.constant 0 : index
    %c0_169 = arith.constant 0 : index
    %197 = vector.load %arg0[%c14, %c0_168, %c0_169] : memref<25x2x400xbf16, #tpu.memory_space<vmem>>, vector<1x2x400xbf16>
    %198 = vector.shape_cast %197 : vector<1x2x400xbf16> to vector<2x400xbf16>
    %c0_170 = arith.constant 0 : index
    %c0_171 = arith.constant 0 : index
    %199 = vector.load %arg1[%c0_170, %c0_171] : memref<400x32xbf16, #tpu.memory_space<vmem>>, vector<400x32xbf16>
    %cst_172 = arith.constant dense<0.000000e+00> : vector<2x32xf32>
    %200 = tpu.matmul %198, %199, %cst_172 {dimension_numbers = #tpu.dot_dimension_numbers<[1], [0], [0], [1], [0, 0, 1, 1], [], []>} : vector<2x400xbf16>, vector<400x32xbf16>, vector<2x32xf32> -> vector<2x32xf32>
    %c0_173 = arith.constant 0 : index
    %c0_174 = arith.constant 0 : index
    %201 = vector.load %arg2[%c0_173, %c0_174] : memref<1x32xf32, #tpu.memory_space<vmem>>, vector<1x32xf32>
    %202 = vector.broadcast %201 : vector<1x32xf32> to vector<2x32xf32>
    %203 = arith.addf %200, %202 : vector<2x32xf32>
    %cst_175 = arith.constant 0.000000e+00 : f32
    %204 = vector.broadcast %cst_175 : f32 to vector<2x32xf32>
    %205 = arith.maximumf %203, %204 : vector<2x32xf32>
    %206 = arith.truncf %205 : vector<2x32xf32> to vector<2x32xbf16>
    %c14_176 = arith.constant 14 : index
    %c0_177 = arith.constant 0 : index
    %c0_178 = arith.constant 0 : index
    %207 = vector.load %arg3[%c14_176, %c0_177, %c0_178] : memref<25x32x32xbf16, #tpu.memory_space<vmem>>, vector<1x32x32xbf16>
    %208 = vector.shape_cast %207 : vector<1x32x32xbf16> to vector<32x32xbf16>
    %cst_179 = arith.constant dense<0.000000e+00> : vector<2x32xf32>
    %209 = tpu.matmul %206, %208, %cst_179 {dimension_numbers = #tpu.dot_dimension_numbers<[1], [0], [0], [1], [0, 0, 1, 1], [], []>} : vector<2x32xbf16>, vector<32x32xbf16>, vector<2x32xf32> -> vector<2x32xf32>
    %210 = arith.addf %196, %209 : vector<2x32xf32>
    %c15 = arith.constant 15 : index
    %c0_180 = arith.constant 0 : index
    %c0_181 = arith.constant 0 : index
    %211 = vector.load %arg0[%c15, %c0_180, %c0_181] : memref<25x2x400xbf16, #tpu.memory_space<vmem>>, vector<1x2x400xbf16>
    %212 = vector.shape_cast %211 : vector<1x2x400xbf16> to vector<2x400xbf16>
    %c0_182 = arith.constant 0 : index
    %c0_183 = arith.constant 0 : index
    %213 = vector.load %arg1[%c0_182, %c0_183] : memref<400x32xbf16, #tpu.memory_space<vmem>>, vector<400x32xbf16>
    %cst_184 = arith.constant dense<0.000000e+00> : vector<2x32xf32>
    %214 = tpu.matmul %212, %213, %cst_184 {dimension_numbers = #tpu.dot_dimension_numbers<[1], [0], [0], [1], [0, 0, 1, 1], [], []>} : vector<2x400xbf16>, vector<400x32xbf16>, vector<2x32xf32> -> vector<2x32xf32>
    %c0_185 = arith.constant 0 : index
    %c0_186 = arith.constant 0 : index
    %215 = vector.load %arg2[%c0_185, %c0_186] : memref<1x32xf32, #tpu.memory_space<vmem>>, vector<1x32xf32>
    %216 = vector.broadcast %215 : vector<1x32xf32> to vector<2x32xf32>
    %217 = arith.addf %214, %216 : vector<2x32xf32>
    %cst_187 = arith.constant 0.000000e+00 : f32
    %218 = vector.broadcast %cst_187 : f32 to vector<2x32xf32>
    %219 = arith.maximumf %217, %218 : vector<2x32xf32>
    %220 = arith.truncf %219 : vector<2x32xf32> to vector<2x32xbf16>
    %c15_188 = arith.constant 15 : index
    %c0_189 = arith.constant 0 : index
    %c0_190 = arith.constant 0 : index
    %221 = vector.load %arg3[%c15_188, %c0_189, %c0_190] : memref<25x32x32xbf16, #tpu.memory_space<vmem>>, vector<1x32x32xbf16>
    %222 = vector.shape_cast %221 : vector<1x32x32xbf16> to vector<32x32xbf16>
    %cst_191 = arith.constant dense<0.000000e+00> : vector<2x32xf32>
    %223 = tpu.matmul %220, %222, %cst_191 {dimension_numbers = #tpu.dot_dimension_numbers<[1], [0], [0], [1], [0, 0, 1, 1], [], []>} : vector<2x32xbf16>, vector<32x32xbf16>, vector<2x32xf32> -> vector<2x32xf32>
    %224 = arith.addf %210, %223 : vector<2x32xf32>
    %c16 = arith.constant 16 : index
    %c0_192 = arith.constant 0 : index
    %c0_193 = arith.constant 0 : index
    %225 = vector.load %arg0[%c16, %c0_192, %c0_193] : memref<25x2x400xbf16, #tpu.memory_space<vmem>>, vector<1x2x400xbf16>
    %226 = vector.shape_cast %225 : vector<1x2x400xbf16> to vector<2x400xbf16>
    %c0_194 = arith.constant 0 : index
    %c0_195 = arith.constant 0 : index
    %227 = vector.load %arg1[%c0_194, %c0_195] : memref<400x32xbf16, #tpu.memory_space<vmem>>, vector<400x32xbf16>
    %cst_196 = arith.constant dense<0.000000e+00> : vector<2x32xf32>
    %228 = tpu.matmul %226, %227, %cst_196 {dimension_numbers = #tpu.dot_dimension_numbers<[1], [0], [0], [1], [0, 0, 1, 1], [], []>} : vector<2x400xbf16>, vector<400x32xbf16>, vector<2x32xf32> -> vector<2x32xf32>
    %c0_197 = arith.constant 0 : index
    %c0_198 = arith.constant 0 : index
    %229 = vector.load %arg2[%c0_197, %c0_198] : memref<1x32xf32, #tpu.memory_space<vmem>>, vector<1x32xf32>
    %230 = vector.broadcast %229 : vector<1x32xf32> to vector<2x32xf32>
    %231 = arith.addf %228, %230 : vector<2x32xf32>
    %cst_199 = arith.constant 0.000000e+00 : f32
    %232 = vector.broadcast %cst_199 : f32 to vector<2x32xf32>
    %233 = arith.maximumf %231, %232 : vector<2x32xf32>
    %234 = arith.truncf %233 : vector<2x32xf32> to vector<2x32xbf16>
    %c16_200 = arith.constant 16 : index
    %c0_201 = arith.constant 0 : index
    %c0_202 = arith.constant 0 : index
    %235 = vector.load %arg3[%c16_200, %c0_201, %c0_202] : memref<25x32x32xbf16, #tpu.memory_space<vmem>>, vector<1x32x32xbf16>
    %236 = vector.shape_cast %235 : vector<1x32x32xbf16> to vector<32x32xbf16>
    %cst_203 = arith.constant dense<0.000000e+00> : vector<2x32xf32>
    %237 = tpu.matmul %234, %236, %cst_203 {dimension_numbers = #tpu.dot_dimension_numbers<[1], [0], [0], [1], [0, 0, 1, 1], [], []>} : vector<2x32xbf16>, vector<32x32xbf16>, vector<2x32xf32> -> vector<2x32xf32>
    %238 = arith.addf %224, %237 : vector<2x32xf32>
    %c17 = arith.constant 17 : index
    %c0_204 = arith.constant 0 : index
    %c0_205 = arith.constant 0 : index
    %239 = vector.load %arg0[%c17, %c0_204, %c0_205] : memref<25x2x400xbf16, #tpu.memory_space<vmem>>, vector<1x2x400xbf16>
    %240 = vector.shape_cast %239 : vector<1x2x400xbf16> to vector<2x400xbf16>
    %c0_206 = arith.constant 0 : index
    %c0_207 = arith.constant 0 : index
    %241 = vector.load %arg1[%c0_206, %c0_207] : memref<400x32xbf16, #tpu.memory_space<vmem>>, vector<400x32xbf16>
    %cst_208 = arith.constant dense<0.000000e+00> : vector<2x32xf32>
    %242 = tpu.matmul %240, %241, %cst_208 {dimension_numbers = #tpu.dot_dimension_numbers<[1], [0], [0], [1], [0, 0, 1, 1], [], []>} : vector<2x400xbf16>, vector<400x32xbf16>, vector<2x32xf32> -> vector<2x32xf32>
    %c0_209 = arith.constant 0 : index
    %c0_210 = arith.constant 0 : index
    %243 = vector.load %arg2[%c0_209, %c0_210] : memref<1x32xf32, #tpu.memory_space<vmem>>, vector<1x32xf32>
    %244 = vector.broadcast %243 : vector<1x32xf32> to vector<2x32xf32>
    %245 = arith.addf %242, %244 : vector<2x32xf32>
    %cst_211 = arith.constant 0.000000e+00 : f32
    %246 = vector.broadcast %cst_211 : f32 to vector<2x32xf32>
    %247 = arith.maximumf %245, %246 : vector<2x32xf32>
    %248 = arith.truncf %247 : vector<2x32xf32> to vector<2x32xbf16>
    %c17_212 = arith.constant 17 : index
    %c0_213 = arith.constant 0 : index
    %c0_214 = arith.constant 0 : index
    %249 = vector.load %arg3[%c17_212, %c0_213, %c0_214] : memref<25x32x32xbf16, #tpu.memory_space<vmem>>, vector<1x32x32xbf16>
    %250 = vector.shape_cast %249 : vector<1x32x32xbf16> to vector<32x32xbf16>
    %cst_215 = arith.constant dense<0.000000e+00> : vector<2x32xf32>
    %251 = tpu.matmul %248, %250, %cst_215 {dimension_numbers = #tpu.dot_dimension_numbers<[1], [0], [0], [1], [0, 0, 1, 1], [], []>} : vector<2x32xbf16>, vector<32x32xbf16>, vector<2x32xf32> -> vector<2x32xf32>
    %252 = arith.addf %238, %251 : vector<2x32xf32>
    %c18 = arith.constant 18 : index
    %c0_216 = arith.constant 0 : index
    %c0_217 = arith.constant 0 : index
    %253 = vector.load %arg0[%c18, %c0_216, %c0_217] : memref<25x2x400xbf16, #tpu.memory_space<vmem>>, vector<1x2x400xbf16>
    %254 = vector.shape_cast %253 : vector<1x2x400xbf16> to vector<2x400xbf16>
    %c0_218 = arith.constant 0 : index
    %c0_219 = arith.constant 0 : index
    %255 = vector.load %arg1[%c0_218, %c0_219] : memref<400x32xbf16, #tpu.memory_space<vmem>>, vector<400x32xbf16>
    %cst_220 = arith.constant dense<0.000000e+00> : vector<2x32xf32>
    %256 = tpu.matmul %254, %255, %cst_220 {dimension_numbers = #tpu.dot_dimension_numbers<[1], [0], [0], [1], [0, 0, 1, 1], [], []>} : vector<2x400xbf16>, vector<400x32xbf16>, vector<2x32xf32> -> vector<2x32xf32>
    %c0_221 = arith.constant 0 : index
    %c0_222 = arith.constant 0 : index
    %257 = vector.load %arg2[%c0_221, %c0_222] : memref<1x32xf32, #tpu.memory_space<vmem>>, vector<1x32xf32>
    %258 = vector.broadcast %257 : vector<1x32xf32> to vector<2x32xf32>
    %259 = arith.addf %256, %258 : vector<2x32xf32>
    %cst_223 = arith.constant 0.000000e+00 : f32
    %260 = vector.broadcast %cst_223 : f32 to vector<2x32xf32>
    %261 = arith.maximumf %259, %260 : vector<2x32xf32>
    %262 = arith.truncf %261 : vector<2x32xf32> to vector<2x32xbf16>
    %c18_224 = arith.constant 18 : index
    %c0_225 = arith.constant 0 : index
    %c0_226 = arith.constant 0 : index
    %263 = vector.load %arg3[%c18_224, %c0_225, %c0_226] : memref<25x32x32xbf16, #tpu.memory_space<vmem>>, vector<1x32x32xbf16>
    %264 = vector.shape_cast %263 : vector<1x32x32xbf16> to vector<32x32xbf16>
    %cst_227 = arith.constant dense<0.000000e+00> : vector<2x32xf32>
    %265 = tpu.matmul %262, %264, %cst_227 {dimension_numbers = #tpu.dot_dimension_numbers<[1], [0], [0], [1], [0, 0, 1, 1], [], []>} : vector<2x32xbf16>, vector<32x32xbf16>, vector<2x32xf32> -> vector<2x32xf32>
    %266 = arith.addf %252, %265 : vector<2x32xf32>
    %c19 = arith.constant 19 : index
    %c0_228 = arith.constant 0 : index
    %c0_229 = arith.constant 0 : index
    %267 = vector.load %arg0[%c19, %c0_228, %c0_229] : memref<25x2x400xbf16, #tpu.memory_space<vmem>>, vector<1x2x400xbf16>
    %268 = vector.shape_cast %267 : vector<1x2x400xbf16> to vector<2x400xbf16>
    %c0_230 = arith.constant 0 : index
    %c0_231 = arith.constant 0 : index
    %269 = vector.load %arg1[%c0_230, %c0_231] : memref<400x32xbf16, #tpu.memory_space<vmem>>, vector<400x32xbf16>
    %cst_232 = arith.constant dense<0.000000e+00> : vector<2x32xf32>
    %270 = tpu.matmul %268, %269, %cst_232 {dimension_numbers = #tpu.dot_dimension_numbers<[1], [0], [0], [1], [0, 0, 1, 1], [], []>} : vector<2x400xbf16>, vector<400x32xbf16>, vector<2x32xf32> -> vector<2x32xf32>
    %c0_233 = arith.constant 0 : index
    %c0_234 = arith.constant 0 : index
    %271 = vector.load %arg2[%c0_233, %c0_234] : memref<1x32xf32, #tpu.memory_space<vmem>>, vector<1x32xf32>
    %272 = vector.broadcast %271 : vector<1x32xf32> to vector<2x32xf32>
    %273 = arith.addf %270, %272 : vector<2x32xf32>
    %cst_235 = arith.constant 0.000000e+00 : f32
    %274 = vector.broadcast %cst_235 : f32 to vector<2x32xf32>
    %275 = arith.maximumf %273, %274 : vector<2x32xf32>
    %276 = arith.truncf %275 : vector<2x32xf32> to vector<2x32xbf16>
    %c19_236 = arith.constant 19 : index
    %c0_237 = arith.constant 0 : index
    %c0_238 = arith.constant 0 : index
    %277 = vector.load %arg3[%c19_236, %c0_237, %c0_238] : memref<25x32x32xbf16, #tpu.memory_space<vmem>>, vector<1x32x32xbf16>
    %278 = vector.shape_cast %277 : vector<1x32x32xbf16> to vector<32x32xbf16>
    %cst_239 = arith.constant dense<0.000000e+00> : vector<2x32xf32>
    %279 = tpu.matmul %276, %278, %cst_239 {dimension_numbers = #tpu.dot_dimension_numbers<[1], [0], [0], [1], [0, 0, 1, 1], [], []>} : vector<2x32xbf16>, vector<32x32xbf16>, vector<2x32xf32> -> vector<2x32xf32>
    %280 = arith.addf %266, %279 : vector<2x32xf32>
    %c20 = arith.constant 20 : index
    %c0_240 = arith.constant 0 : index
    %c0_241 = arith.constant 0 : index
    %281 = vector.load %arg0[%c20, %c0_240, %c0_241] : memref<25x2x400xbf16, #tpu.memory_space<vmem>>, vector<1x2x400xbf16>
    %282 = vector.shape_cast %281 : vector<1x2x400xbf16> to vector<2x400xbf16>
    %c0_242 = arith.constant 0 : index
    %c0_243 = arith.constant 0 : index
    %283 = vector.load %arg1[%c0_242, %c0_243] : memref<400x32xbf16, #tpu.memory_space<vmem>>, vector<400x32xbf16>
    %cst_244 = arith.constant dense<0.000000e+00> : vector<2x32xf32>
    %284 = tpu.matmul %282, %283, %cst_244 {dimension_numbers = #tpu.dot_dimension_numbers<[1], [0], [0], [1], [0, 0, 1, 1], [], []>} : vector<2x400xbf16>, vector<400x32xbf16>, vector<2x32xf32> -> vector<2x32xf32>
    %c0_245 = arith.constant 0 : index
    %c0_246 = arith.constant 0 : index
    %285 = vector.load %arg2[%c0_245, %c0_246] : memref<1x32xf32, #tpu.memory_space<vmem>>, vector<1x32xf32>
    %286 = vector.broadcast %285 : vector<1x32xf32> to vector<2x32xf32>
    %287 = arith.addf %284, %286 : vector<2x32xf32>
    %cst_247 = arith.constant 0.000000e+00 : f32
    %288 = vector.broadcast %cst_247 : f32 to vector<2x32xf32>
    %289 = arith.maximumf %287, %288 : vector<2x32xf32>
    %290 = arith.truncf %289 : vector<2x32xf32> to vector<2x32xbf16>
    %c20_248 = arith.constant 20 : index
    %c0_249 = arith.constant 0 : index
    %c0_250 = arith.constant 0 : index
    %291 = vector.load %arg3[%c20_248, %c0_249, %c0_250] : memref<25x32x32xbf16, #tpu.memory_space<vmem>>, vector<1x32x32xbf16>
    %292 = vector.shape_cast %291 : vector<1x32x32xbf16> to vector<32x32xbf16>
    %cst_251 = arith.constant dense<0.000000e+00> : vector<2x32xf32>
    %293 = tpu.matmul %290, %292, %cst_251 {dimension_numbers = #tpu.dot_dimension_numbers<[1], [0], [0], [1], [0, 0, 1, 1], [], []>} : vector<2x32xbf16>, vector<32x32xbf16>, vector<2x32xf32> -> vector<2x32xf32>
    %294 = arith.addf %280, %293 : vector<2x32xf32>
    %c21 = arith.constant 21 : index
    %c0_252 = arith.constant 0 : index
    %c0_253 = arith.constant 0 : index
    %295 = vector.load %arg0[%c21, %c0_252, %c0_253] : memref<25x2x400xbf16, #tpu.memory_space<vmem>>, vector<1x2x400xbf16>
    %296 = vector.shape_cast %295 : vector<1x2x400xbf16> to vector<2x400xbf16>
    %c0_254 = arith.constant 0 : index
    %c0_255 = arith.constant 0 : index
    %297 = vector.load %arg1[%c0_254, %c0_255] : memref<400x32xbf16, #tpu.memory_space<vmem>>, vector<400x32xbf16>
    %cst_256 = arith.constant dense<0.000000e+00> : vector<2x32xf32>
    %298 = tpu.matmul %296, %297, %cst_256 {dimension_numbers = #tpu.dot_dimension_numbers<[1], [0], [0], [1], [0, 0, 1, 1], [], []>} : vector<2x400xbf16>, vector<400x32xbf16>, vector<2x32xf32> -> vector<2x32xf32>
    %c0_257 = arith.constant 0 : index
    %c0_258 = arith.constant 0 : index
    %299 = vector.load %arg2[%c0_257, %c0_258] : memref<1x32xf32, #tpu.memory_space<vmem>>, vector<1x32xf32>
    %300 = vector.broadcast %299 : vector<1x32xf32> to vector<2x32xf32>
    %301 = arith.addf %298, %300 : vector<2x32xf32>
    %cst_259 = arith.constant 0.000000e+00 : f32
    %302 = vector.broadcast %cst_259 : f32 to vector<2x32xf32>
    %303 = arith.maximumf %301, %302 : vector<2x32xf32>
    %304 = arith.truncf %303 : vector<2x32xf32> to vector<2x32xbf16>
    %c21_260 = arith.constant 21 : index
    %c0_261 = arith.constant 0 : index
    %c0_262 = arith.constant 0 : index
    %305 = vector.load %arg3[%c21_260, %c0_261, %c0_262] : memref<25x32x32xbf16, #tpu.memory_space<vmem>>, vector<1x32x32xbf16>
    %306 = vector.shape_cast %305 : vector<1x32x32xbf16> to vector<32x32xbf16>
    %cst_263 = arith.constant dense<0.000000e+00> : vector<2x32xf32>
    %307 = tpu.matmul %304, %306, %cst_263 {dimension_numbers = #tpu.dot_dimension_numbers<[1], [0], [0], [1], [0, 0, 1, 1], [], []>} : vector<2x32xbf16>, vector<32x32xbf16>, vector<2x32xf32> -> vector<2x32xf32>
    %308 = arith.addf %294, %307 : vector<2x32xf32>
    %c22 = arith.constant 22 : index
    %c0_264 = arith.constant 0 : index
    %c0_265 = arith.constant 0 : index
    %309 = vector.load %arg0[%c22, %c0_264, %c0_265] : memref<25x2x400xbf16, #tpu.memory_space<vmem>>, vector<1x2x400xbf16>
    %310 = vector.shape_cast %309 : vector<1x2x400xbf16> to vector<2x400xbf16>
    %c0_266 = arith.constant 0 : index
    %c0_267 = arith.constant 0 : index
    %311 = vector.load %arg1[%c0_266, %c0_267] : memref<400x32xbf16, #tpu.memory_space<vmem>>, vector<400x32xbf16>
    %cst_268 = arith.constant dense<0.000000e+00> : vector<2x32xf32>
    %312 = tpu.matmul %310, %311, %cst_268 {dimension_numbers = #tpu.dot_dimension_numbers<[1], [0], [0], [1], [0, 0, 1, 1], [], []>} : vector<2x400xbf16>, vector<400x32xbf16>, vector<2x32xf32> -> vector<2x32xf32>
    %c0_269 = arith.constant 0 : index
    %c0_270 = arith.constant 0 : index
    %313 = vector.load %arg2[%c0_269, %c0_270] : memref<1x32xf32, #tpu.memory_space<vmem>>, vector<1x32xf32>
    %314 = vector.broadcast %313 : vector<1x32xf32> to vector<2x32xf32>
    %315 = arith.addf %312, %314 : vector<2x32xf32>
    %cst_271 = arith.constant 0.000000e+00 : f32
    %316 = vector.broadcast %cst_271 : f32 to vector<2x32xf32>
    %317 = arith.maximumf %315, %316 : vector<2x32xf32>
    %318 = arith.truncf %317 : vector<2x32xf32> to vector<2x32xbf16>
    %c22_272 = arith.constant 22 : index
    %c0_273 = arith.constant 0 : index
    %c0_274 = arith.constant 0 : index
    %319 = vector.load %arg3[%c22_272, %c0_273, %c0_274] : memref<25x32x32xbf16, #tpu.memory_space<vmem>>, vector<1x32x32xbf16>
    %320 = vector.shape_cast %319 : vector<1x32x32xbf16> to vector<32x32xbf16>
    %cst_275 = arith.constant dense<0.000000e+00> : vector<2x32xf32>
    %321 = tpu.matmul %318, %320, %cst_275 {dimension_numbers = #tpu.dot_dimension_numbers<[1], [0], [0], [1], [0, 0, 1, 1], [], []>} : vector<2x32xbf16>, vector<32x32xbf16>, vector<2x32xf32> -> vector<2x32xf32>
    %322 = arith.addf %308, %321 : vector<2x32xf32>
    %c23 = arith.constant 23 : index
    %c0_276 = arith.constant 0 : index
    %c0_277 = arith.constant 0 : index
    %323 = vector.load %arg0[%c23, %c0_276, %c0_277] : memref<25x2x400xbf16, #tpu.memory_space<vmem>>, vector<1x2x400xbf16>
    %324 = vector.shape_cast %323 : vector<1x2x400xbf16> to vector<2x400xbf16>
    %c0_278 = arith.constant 0 : index
    %c0_279 = arith.constant 0 : index
    %325 = vector.load %arg1[%c0_278, %c0_279] : memref<400x32xbf16, #tpu.memory_space<vmem>>, vector<400x32xbf16>
    %cst_280 = arith.constant dense<0.000000e+00> : vector<2x32xf32>
    %326 = tpu.matmul %324, %325, %cst_280 {dimension_numbers = #tpu.dot_dimension_numbers<[1], [0], [0], [1], [0, 0, 1, 1], [], []>} : vector<2x400xbf16>, vector<400x32xbf16>, vector<2x32xf32> -> vector<2x32xf32>
    %c0_281 = arith.constant 0 : index
    %c0_282 = arith.constant 0 : index
    %327 = vector.load %arg2[%c0_281, %c0_282] : memref<1x32xf32, #tpu.memory_space<vmem>>, vector<1x32xf32>
    %328 = vector.broadcast %327 : vector<1x32xf32> to vector<2x32xf32>
    %329 = arith.addf %326, %328 : vector<2x32xf32>
    %cst_283 = arith.constant 0.000000e+00 : f32
    %330 = vector.broadcast %cst_283 : f32 to vector<2x32xf32>
    %331 = arith.maximumf %329, %330 : vector<2x32xf32>
    %332 = arith.truncf %331 : vector<2x32xf32> to vector<2x32xbf16>
    %c23_284 = arith.constant 23 : index
    %c0_285 = arith.constant 0 : index
    %c0_286 = arith.constant 0 : index
    %333 = vector.load %arg3[%c23_284, %c0_285, %c0_286] : memref<25x32x32xbf16, #tpu.memory_space<vmem>>, vector<1x32x32xbf16>
    %334 = vector.shape_cast %333 : vector<1x32x32xbf16> to vector<32x32xbf16>
    %cst_287 = arith.constant dense<0.000000e+00> : vector<2x32xf32>
    %335 = tpu.matmul %332, %334, %cst_287 {dimension_numbers = #tpu.dot_dimension_numbers<[1], [0], [0], [1], [0, 0, 1, 1], [], []>} : vector<2x32xbf16>, vector<32x32xbf16>, vector<2x32xf32> -> vector<2x32xf32>
    %336 = arith.addf %322, %335 : vector<2x32xf32>
    %c24 = arith.constant 24 : index
    %c0_288 = arith.constant 0 : index
    %c0_289 = arith.constant 0 : index
    %337 = vector.load %arg0[%c24, %c0_288, %c0_289] : memref<25x2x400xbf16, #tpu.memory_space<vmem>>, vector<1x2x400xbf16>
    %338 = vector.shape_cast %337 : vector<1x2x400xbf16> to vector<2x400xbf16>
    %c0_290 = arith.constant 0 : index
    %c0_291 = arith.constant 0 : index
    %339 = vector.load %arg1[%c0_290, %c0_291] : memref<400x32xbf16, #tpu.memory_space<vmem>>, vector<400x32xbf16>
    %cst_292 = arith.constant dense<0.000000e+00> : vector<2x32xf32>
    %340 = tpu.matmul %338, %339, %cst_292 {dimension_numbers = #tpu.dot_dimension_numbers<[1], [0], [0], [1], [0, 0, 1, 1], [], []>} : vector<2x400xbf16>, vector<400x32xbf16>, vector<2x32xf32> -> vector<2x32xf32>
    %c0_293 = arith.constant 0 : index
    %c0_294 = arith.constant 0 : index
    %341 = vector.load %arg2[%c0_293, %c0_294] : memref<1x32xf32, #tpu.memory_space<vmem>>, vector<1x32xf32>
    %342 = vector.broadcast %341 : vector<1x32xf32> to vector<2x32xf32>
    %343 = arith.addf %340, %342 : vector<2x32xf32>
    %cst_295 = arith.constant 0.000000e+00 : f32
    %344 = vector.broadcast %cst_295 : f32 to vector<2x32xf32>
    %345 = arith.maximumf %343, %344 : vector<2x32xf32>
    %346 = arith.truncf %345 : vector<2x32xf32> to vector<2x32xbf16>
    %c24_296 = arith.constant 24 : index
    %c0_297 = arith.constant 0 : index
    %c0_298 = arith.constant 0 : index
    %347 = vector.load %arg3[%c24_296, %c0_297, %c0_298] : memref<25x32x32xbf16, #tpu.memory_space<vmem>>, vector<1x32x32xbf16>
    %348 = vector.shape_cast %347 : vector<1x32x32xbf16> to vector<32x32xbf16>
    %cst_299 = arith.constant dense<0.000000e+00> : vector<2x32xf32>
    %349 = tpu.matmul %346, %348, %cst_299 {dimension_numbers = #tpu.dot_dimension_numbers<[1], [0], [0], [1], [0, 0, 1, 1], [], []>} : vector<2x32xbf16>, vector<32x32xbf16>, vector<2x32xf32> -> vector<2x32xf32>
    %350 = arith.addf %336, %349 : vector<2x32xf32>
    %c0_300 = arith.constant 0 : index
    %c0_301 = arith.constant 0 : index
    %351 = vector.load %arg4[%c0_300, %c0_301] : memref<1x32xf32, #tpu.memory_space<vmem>>, vector<1x32xf32>
    %352 = vector.broadcast %351 : vector<1x32xf32> to vector<2x32xf32>
    %353 = arith.addf %350, %352 : vector<2x32xf32>
    %cst_302 = arith.constant 0.000000e+00 : f32
    %354 = vector.broadcast %cst_302 : f32 to vector<2x32xf32>
    %355 = arith.maximumf %353, %354 : vector<2x32xf32>
    %c0_303 = arith.constant 0 : index
    %c0_304 = arith.constant 0 : index
    %356 = vector.load %arg5[%c0_303, %c0_304] : memref<32x4xf32, #tpu.memory_space<vmem>>, vector<32x4xf32>
    %cst_305 = arith.constant dense<0.000000e+00> : vector<2x4xf32>
    %357 = tpu.matmul %355, %356, %cst_305 {dimension_numbers = #tpu.dot_dimension_numbers<[1], [0], [0], [1], [0, 0, 1, 1], [], []>} : vector<2x32xf32>, vector<32x4xf32>, vector<2x4xf32> -> vector<2x4xf32>
    %c0_306 = arith.constant 0 : index
    %c0_307 = arith.constant 0 : index
    %358 = vector.load %arg6[%c0_306, %c0_307] : memref<1x4xf32, #tpu.memory_space<vmem>>, vector<1x4xf32>
    %359 = vector.broadcast %358 : vector<1x4xf32> to vector<2x4xf32>
    %360 = arith.addf %357, %359 : vector<2x4xf32>
    %c0_308 = arith.constant 0 : index
    %c0_309 = arith.constant 0 : index
    %361 = vector.load %arg7[%c0_308, %c0_309] : memref<2x4xf32, #tpu.memory_space<vmem>>, vector<2x4xf32>
    tpu.vector_store %arg7[%c0_308, %c0_309], %360 {strides = array<i32>} : memref<2x4xf32, #tpu.memory_space<vmem>>, vector<2x4xf32>,
    return
  }
}

</mosaic_0001>

<bundles_post_ra>
// kernel: _lambda_.2
= control target key start
LH: loop header
LB: loop body
LE: loop exit
PB: predicated region body
PF: predicated region fallthrough
CT: control target
= control target key end

     0   :  { %s1390_s12 = smov 0   ;;  %s1392_s13 = smov 0   ;;  %s1705_s0 = inlined_call_operand.vmem [shape: bf16[392,75], index: 0, kind: input, shape index: {}]   ;;  %s1706_s1 = inlined_call_operand.vmem [shape: bf16[75,16], index: 1, kind: input, shape index: {}]   ;;  %s1707_s2 = inlined_call_operand.vmem [shape: f32[1,16], index: 2, kind: input, shape index: {}]   ;;  %s1708_s3 = inlined_call_operand.vmem [shape: bf16[392,16], index: 3, kind: output, shape index: {}]  }
   0x1   :  { %s1394_s14 = smov 0  }
   0x2 LB: > { %s1403_s15 = sadd.s32 4294967295, %s1333_s14   ;;  %s1405_s16 = sadd.s32 1, %s1333_s14   ;;  %s1333_s14 = sphi %s1394_s14, %s1715_s14   ;;  %s1329_s13 = sphi %s1392_s13, %s1714_s13   ;;  %s1325_s12 = sphi %s1390_s12, %s1713_s12  }
   0x3   : > { %s85_s17 = ssub.s32 %s1333_s14, %s1405_s16  ;;  %s88_s18 = sadd.s32 1, %s1329_s13 }
   0x4   : > { %p86_p0 = scmp.eq.s32.totalorder %s85_s17, 0  ;;  %p98_p1 = scmp.ne.s32.totalorder %s1329_s13, %s1325_s12 }
   0x5   : > { %p99_p2 = scmp.eq.s32.totalorder %s1403_s15, 1  ;;  %p977_p3 = scmp.ge.s32.totalorder %s1333_s14, 1 }
   0x6   : > { %s1413_s19 = scalar_select %p86_p0, %s1329_s13, %s88_s18  }
   0x7   : > { %p1415_p4 = por %p99_p2, %p98_p1  ;;  %p146_p5 = scmp.lt.s32.totalorder %s1333_s14, 3 }
   0x9   : > { %p147_p6 = pnand %p977_p3, %p146_p5 }
   0xa   : > { %v1257_v0 = vld [vmem:[%s1706_s1] sm:$0xff] (!%p147_p6)   ;;  %v1367_v1 = vmov (!%p147_p6), 0.0   ;;  %v1258_v2 = vld [vmem:[%s1706_s1 + $0x8] sm:$0xff] (!%p147_p6)   ;;  %vm367_vm0 = vcmask (!%p147_p6), 1044480   ;;  %s1430_s25 = smul.u32 (!%p147_p6), 25, %s1403_s15  ;;  %v1259_v3 = vld [vmem:[%s1706_s1 + $0x10] sm:$0xff] (!%p147_p6)  }
   0xb   : > { %150 = sbr.rel (%p147_p6) target bundleno = 378 (0x17a), region = 32  ;;  %1092 = vmatprep.subr.bf16.mxu0 (!%p147_p6), %v1367_v1  ;;  %1154 = vmatprep.subr.bf16.mxu1 (!%p147_p6), %v1367_v1  ;;  %vm368_vm1 = vcmask (!%p147_p6), 1045504   ;;  %v1368_v4 = vmov (!%p147_p6), 65535   ;;  %vm1369_vm2 = vmmov (!%p147_p6), 0   ;;  %v1260_v6 = vld [vmem:[%s1706_s1 + $0x18] sm:$0xff] (!%p147_p6)   ;;  %vm327_vm3 = vcmask (!%p147_p6), 613376  }
   0xc   : > { %1093 = vmatpush3.bf16.msra.mxu0 (!%p147_p6), %v1257_v0  ;;  %1159 = vmatpush3.bf16.msra.mxu1 (!%p147_p6), %v1257_v0  ;;  %p178_p7 = scmp.lt.s32.totalorder (!%p147_p6), %s1430_s25, 48  ;;  %v369_v5 = vsel (!%p147_p6), %vm367_vm0, 4294967295, %v1368_v4  ;;  %v1261_v7 = vld [vmem:[%s1706_s1 + $0x20] sm:$0x3f] (!%p147_p6)   ;;  %s170_s10 = sand.u32 (!%p147_p6), 1, %s1325_s12   ;;  %vm636_vm4 = vcmask (!%p147_p6), 125952  }
   0xd   : > { %1094 = vmatprep.subr.bf16.mxu0 (!%p147_p6), %v1367_v1  ;;  %1155 = vmatprep.subr.bf16.mxu1 (!%p147_p6), %v1367_v1  ;;  %v370_v8 = vsel (!%p147_p6), %vm368_vm1, %v369_v5, 0  ;;  %v1510_v23 = vld [vmem:[%s1707_s2] ss:$0 sm:$0xff] (!%p147_p6)  ;;  %s1164_s17 = smul.u32 (!%p147_p6), 100, %s170_s10 }
   0xe   : > { %1102 = vmatprep.mubr.msk.bf16.mxu0 (!%p147_p6), %vm1369_vm2, %v1367_v1  ;;  %1130 = vmatprep.mubr.msk.bf16.mxu1 (!%p147_p6), %vm1369_vm2, %v1367_v1  ;;  %v372_v9 = vand.u32 (!%p147_p6), %v1261_v7, %v370_v8 }
   0xf   : > { %s1516_s12 = scalar_lea.vmem (!%p147_p6), [#allocation2], %s1164_s17  }
  0x10   : > { %1095 = vmatpush3.bf16.msra.mxu0 (!%p147_p6), %v1258_v2  ;;  %1160 = vmatpush3.bf16.msra.mxu1 (!%p147_p6), %v1258_v2 }
  0x11   : > { %1096 = vmatprep.subr.bf16.mxu0 (!%p147_p6), %v1367_v1  ;;  %1156 = vmatprep.subr.bf16.mxu1 (!%p147_p6), %v1367_v1 }
  0x12   : > { %s179_s28 = scalar_select %p178_p7, %s1430_s25, 48 }
  0x13   : > { %s670_s18 = ssub.s32 (%p1415_p4), 49, %s1430_s25  ;;  %s1073_s21 = smul.u32 (%p1415_p4), 100, %s1403_s15 }
  0x14   : > { %1097 = vmatpush3.bf16.msra.mxu0 %v1259_v3  ;;  %1161 = vmatpush3.bf16.msra.mxu1 %v1259_v3  ;;  %s978_s6 = sshll.u32 %s179_s28, 2  ;;  %p671_p8 = scmp.lt.s32.totalorder (%p1415_p4), %s670_s18, 25 }
  0x15   : > { %1098 = vmatprep.subr.bf16.mxu0 %v1367_v1  ;;  %1157 = vmatprep.subr.bf16.mxu1 %v1367_v1  ;;  %s1454_s9 = scalar_lea.vmem %s1705_s0, %s978_s6  ;;  %s1596_s24 = scalar_lea.vmem (%p1415_p4), %s1708_s3, %s1073_s21  }
  0x16   : > { %v1262_v10 = vld [vmem:[%s1454_s9] sm:$0xff]   ;;  %v1263_v11 = vld [vmem:[%s1454_s9 + $0x38] sm:$0xff]   ;;  %v1264_v12 = vld [vmem:[%s1454_s9 + $0x8] sm:$0xff]  }
  0x17   : > { %v1265_v13 = vld [vmem:[%s1454_s9 + $0x40] sm:$0xff]   ;;  %v1266_v14 = vld [vmem:[%s1454_s9 + $0x10] sm:$0xff]   ;;  %v1267_v15 = vld [vmem:[%s1454_s9 + $0x48] sm:$0xff]  }
  0x18   : > { %1099 = vmatpush3.bf16.msra.mxu0 %v1260_v6  ;;  %1162 = vmatpush3.bf16.msra.mxu1 %v1260_v6  ;;  %v1268_v16 = vld [vmem:[%s1454_s9 + $0x18] sm:$0xff]   ;;  %v1269_v17 = vld [vmem:[%s1454_s9 + $0x50] sm:$0xff]   ;;  %v1270_v18 = vld [vmem:[%s1454_s9 + $0x20] sm:$0xff]  }
  0x19   : > { %1100 = vmatprep.subr.bf16.mxu0 %v1367_v1  ;;  %1158 = vmatprep.subr.bf16.mxu1 %v1367_v1  ;;  %v1271_v19 = vld [vmem:[%s1454_s9 + $0x58] sm:$0xff]   ;;  %v1272_v20 = vld [vmem:[%s1454_s9 + $0x28] sm:$0xff]   ;;  %v1273_v21 = vld [vmem:[%s1454_s9 + $0x60] ss:$0 sps:$4 sm:$0xff]  }
  0x1a   : > { %v1274_v22 = vld [vmem:[%s1454_s9 + $0x30] sm:$0xff]  }
  0x1c   : > { %1101 = vmatpush3.bf16.msra.mxu0 %v372_v9  ;;  %1163 = vmatpush3.bf16.msra.mxu1 %v372_v9 }
  0x1f   : > { %1103 = vmatmul.mubr.msk.bf16.vlgmr.msra.gmra.mrb[0].mxu0 %vm327_vm3, %v1262_v10  ;;  %1131 = vmatmul.mubr.msk.bf16.vlgmr.msra.gmra.mrb[0].mxu1 %vm327_vm3, %v1263_v11 }
  0x20   : > { %1106 = vmatprep.mubr.msk.bf16.mxu0 %vm1369_vm2, %v1367_v1  ;;  %1134 = vmatprep.mubr.msk.bf16.mxu1 %vm1369_vm2, %v1367_v1 }
  0x27   : > { %1107 = vmatmul.mubr.msk.bf16.gmra.mrb[4].mxu0 %vm327_vm3, %v1264_v12  ;;  %1135 = vmatmul.mubr.msk.bf16.gmra.mrb[4].mxu1 %vm327_vm3, %v1265_v13 }
  0x28   : > { %1110 = vmatprep.mubr.msk.bf16.mxu0 %vm1369_vm2, %v1367_v1  ;;  %1138 = vmatprep.mubr.msk.bf16.mxu1 %vm1369_vm2, %v1367_v1 }
  0x2f   : > { %1111 = vmatmul.mubr.msk.bf16.gmra.mrb[8].mxu0 %vm327_vm3, %v1266_v14  ;;  %1139 = vmatmul.mubr.msk.bf16.gmra.mrb[8].mxu1 %vm327_vm3, %v1267_v15 }
  0x30   : > { %1114 = vmatprep.mubr.msk.bf16.mxu0 %vm1369_vm2, %v1367_v1  ;;  %1142 = vmatprep.mubr.msk.bf16.mxu1 %vm1369_vm2, %v1367_v1 }
  0x37   : > { %1115 = vmatmul.mubr.msk.bf16.gmra.mrb[12].mxu0 %vm327_vm3, %v1268_v16  ;;  %1143 = vmatmul.mubr.msk.bf16.gmra.mrb[12].mxu1 %vm327_vm3, %v1269_v17 }
  0x38   : > { %1118 = vmatprep.mubr.msk.bf16.mxu0 %vm1369_vm2, %v1367_v1  ;;  %1146 = vmatprep.mubr.msk.bf16.mxu1 %vm1369_vm2, %v1367_v1 }
  0x3f   : > { %1119 = vmatmul.mubr.msk.bf16.gmra.mrb[16].mxu0 %vm327_vm3, %v1270_v18  ;;  %1147 = vmatmul.mubr.msk.bf16.gmra.mrb[16].mxu1 %vm327_vm3, %v1271_v19 }
  0x40   : > { %1122 = vmatprep.mubr.msk.bf16.mxu0 %vm1369_vm2, %v1367_v1  ;;  %1150 = vmatprep.mubr.msk.bf16.mxu1 %vm1369_vm2, %v1367_v1 }
  0x47   : > { %1123 = vmatmul.mubr.msk.bf16.gmra.mrb[20].mxu0 %vm327_vm3, %v1272_v20  ;;  %1151 = vmatmul.mubr.msk.bf16.gmra.mrb[20].mxu1 %vm327_vm3, %v1273_v21 }
  0x48   : > { %1126 = vmatprep.mubr.msk.bf16.mxu0 %vm1369_vm2, %v1367_v1 }
  0x4f   : > { %1127 = vmatmul.mubr.msk.bf16.gmra.mrb[24].mxu0 %vm327_vm3, %v1274_v22 }
  0xf2   : > { %v408_v24 = vpop.f32.mrb[0].mxu0  ;;  %v464_v25 = vpop.f32.mrb[0].mxu1 }
  0xf3   : > { %v409_v26 = vadd.f32 %v1510_v23, %v408_v24  ;;  %v1104_v27 = vpop.f32.mrb[1].mxu0  ;;  %v465_v28 = vadd.f32 %v1510_v23, %v464_v25  ;;  %v1132_v29 = vpop.f32.mrb[1].mxu1 }
  0xf4   : > { %v411_v30 = vpop.f32.mrb[2].mxu0  ;;  %v467_v31 = vpop.f32.mrb[2].mxu1 }
  0xf5   : > { %v510_v32 = vmax.f32 %v409_v26, 0.0  ;;  %v412_v33 = vadd.f32 %v1510_v23, %v411_v30  ;;  %v1105_v34 = vpop.f32.mrb[3].mxu0  ;;  %v524_v35 = vmax.f32 %v465_v28, 0.0  ;;  %v468_v36 = vadd.f32 %v1510_v23, %v467_v31  ;;  %v1133_v37 = vpop.f32.mrb[3].mxu1 }
  0xf7   : > { %v1048_v38 = vpack.c.bf16 %v510_v32, %v510_v32  ;;  %v511_v39 = vmax.f32 %v412_v33, 0.0  ;;  %v1062_v40 = vpack.c.bf16 %v524_v35, %v524_v35  ;;  %v525_v41 = vmax.f32 %v468_v36, 0.0 }
  0xf9   : > { %637 = vst.msk [vmem:[%s1516_s12] sm:$0xf] %vm636_vm4, %v1048_v38  ;;  %v1049_v42 = vpack.c.bf16 %v511_v39, %v511_v39  ;;  %651 = vst.msk [vmem:[%s1516_s12 + $0x38] sm:$0xf] %vm636_vm4, %v1062_v40  ;;  %v1063_v43 = vpack.c.bf16 %v525_v41, %v525_v41 }
  0xfa   : > { %v416_v44 = vpop.f32.mrb[4].mxu0  ;;  %v472_v45 = vpop.f32.mrb[4].mxu1 }
  0xfb   : > { %638 = vst.msk [vmem:[%s1516_s12 + $0x4] sm:$0xf] %vm636_vm4, %v1049_v42  ;;  %v417_v46 = vadd.f32 %v1510_v23, %v416_v44  ;;  %v1108_v47 = vpop.f32.mrb[5].mxu0  ;;  %652 = vst.msk [vmem:[%s1516_s12 + $0x3c] sm:$0xf] %vm636_vm4, %v1063_v43  ;;  %v473_v48 = vadd.f32 %v1510_v23, %v472_v45  ;;  %v1136_v49 = vpop.f32.mrb[5].mxu1 }
  0xfc   : > { %v419_v50 = vpop.f32.mrb[6].mxu0  ;;  %v475_v51 = vpop.f32.mrb[6].mxu1 }
  0xfd   : > { %v512_v52 = vmax.f32 %v417_v46, 0.0  ;;  %v420_v53 = vadd.f32 %v1510_v23, %v419_v50  ;;  %v1109_v54 = vpop.f32.mrb[7].mxu0  ;;  %v526_v55 = vmax.f32 %v473_v48, 0.0  ;;  %v476_v56 = vadd.f32 %v1510_v23, %v475_v51  ;;  %v1137_v57 = vpop.f32.mrb[7].mxu1 }
  0xff   : > { %v1050_v58 = vpack.c.bf16 %v512_v52, %v512_v52  ;;  %v513_v59 = vmax.f32 %v420_v53, 0.0  ;;  %v1064_v60 = vpack.c.bf16 %v526_v55, %v526_v55  ;;  %v527_v61 = vmax.f32 %v476_v56, 0.0 }
 0x101   : > { %639 = vst.msk [vmem:[%s1516_s12 + $0x8] sm:$0xf] %vm636_vm4, %v1050_v58  ;;  %v1051_v62 = vpack.c.bf16 %v513_v59, %v513_v59  ;;  %653 = vst.msk [vmem:[%s1516_s12 + $0x40] sm:$0xf] %vm636_vm4, %v1064_v60  ;;  %v1065_v63 = vpack.c.bf16 %v527_v61, %v527_v61 }
 0x102   : > { %v424_v0 = vpop.f32.mrb[8].mxu0  ;;  %v480_v1 = vpop.f32.mrb[8].mxu1 }
 0x103   : > { %640 = vst.msk [vmem:[%s1516_s12 + $0xc] sm:$0xf] %vm636_vm4, %v1051_v62  ;;  %v425_v2 = vadd.f32 %v1510_v23, %v424_v0  ;;  %v1112_v3 = vpop.f32.mrb[9].mxu0  ;;  %654 = vst.msk [vmem:[%s1516_s12 + $0x44] sm:$0xf] %vm636_vm4, %v1065_v63  ;;  %v481_v4 = vadd.f32 %v1510_v23, %v480_v1  ;;  %v1140_v5 = vpop.f32.mrb[9].mxu1 }
 0x104   : > { %v427_v6 = vpop.f32.mrb[10].mxu0  ;;  %v483_v7 = vpop.f32.mrb[10].mxu1 }
 0x105   : > { %v514_v8 = vmax.f32 %v425_v2, 0.0  ;;  %v428_v9 = vadd.f32 %v1510_v23, %v427_v6  ;;  %v1113_v10 = vpop.f32.mrb[11].mxu0  ;;  %v528_v11 = vmax.f32 %v481_v4, 0.0  ;;  %v484_v12 = vadd.f32 %v1510_v23, %v483_v7  ;;  %v1141_v13 = vpop.f32.mrb[11].mxu1 }
 0x107   : > { %v1052_v14 = vpack.c.bf16 %v514_v8, %v514_v8  ;;  %v515_v15 = vmax.f32 %v428_v9, 0.0  ;;  %v1066_v16 = vpack.c.bf16 %v528_v11, %v528_v11  ;;  %v529_v17 = vmax.f32 %v484_v12, 0.0 }
 0x109   : > { %641 = vst.msk [vmem:[%s1516_s12 + $0x10] sm:$0xf] %vm636_vm4, %v1052_v14  ;;  %v1053_v18 = vpack.c.bf16 %v515_v15, %v515_v15  ;;  %655 = vst.msk [vmem:[%s1516_s12 + $0x48] sm:$0xf] %vm636_vm4, %v1066_v16  ;;  %v1067_v19 = vpack.c.bf16 %v529_v17, %v529_v17 }
 0x10a   : > { %v432_v20 = vpop.f32.mrb[12].mxu0  ;;  %v488_v21 = vpop.f32.mrb[12].mxu1 }
 0x10b   : > { %642 = vst.msk [vmem:[%s1516_s12 + $0x14] sm:$0xf] %vm636_vm4, %v1053_v18  ;;  %v433_v22 = vadd.f32 %v1510_v23, %v432_v20  ;;  %v1116_v24 = vpop.f32.mrb[13].mxu0  ;;  %656 = vst.msk [vmem:[%s1516_s12 + $0x4c] sm:$0xf] %vm636_vm4, %v1067_v19  ;;  %v489_v25 = vadd.f32 %v1510_v23, %v488_v21  ;;  %v1144_v26 = vpop.f32.mrb[13].mxu1 }
 0x10c   : > { %v435_v27 = vpop.f32.mrb[14].mxu0  ;;  %v491_v28 = vpop.f32.mrb[14].mxu1 }
 0x10d   : > { %v516_v29 = vmax.f32 %v433_v22, 0.0  ;;  %v436_v30 = vadd.f32 %v1510_v23, %v435_v27  ;;  %v1117_v31 = vpop.f32.mrb[15].mxu0  ;;  %v530_v32 = vmax.f32 %v489_v25, 0.0  ;;  %v492_v33 = vadd.f32 %v1510_v23, %v491_v28  ;;  %v1145_v34 = vpop.f32.mrb[15].mxu1 }
 0x10f   : > { %v1054_v35 = vpack.c.bf16 %v516_v29, %v516_v29  ;;  %v517_v36 = vmax.f32 %v436_v30, 0.0  ;;  %v1068_v37 = vpack.c.bf16 %v530_v32, %v530_v32  ;;  %v531_v38 = vmax.f32 %v492_v33, 0.0 }
 0x111   : > { %643 = vst.msk [vmem:[%s1516_s12 + $0x18] sm:$0xf] %vm636_vm4, %v1054_v35  ;;  %v1055_v39 = vpack.c.bf16 %v517_v36, %v517_v36  ;;  %657 = vst.msk [vmem:[%s1516_s12 + $0x50] sm:$0xf] %vm636_vm4, %v1068_v37  ;;  %v1069_v40 = vpack.c.bf16 %v531_v38, %v531_v38 }
 0x112   : > { %v440_v41 = vpop.f32.mrb[16].mxu0  ;;  %v496_v42 = vpop.f32.mrb[16].mxu1 }
 0x113   : > { %644 = vst.msk [vmem:[%s1516_s12 + $0x1c] sm:$0xf] %vm636_vm4, %v1055_v39  ;;  %v441_v43 = vadd.f32 %v1510_v23, %v440_v41  ;;  %v1120_v44 = vpop.f32.mrb[17].mxu0  ;;  %658 = vst.msk [vmem:[%s1516_s12 + $0x54] sm:$0xf] %vm636_vm4, %v1069_v40  ;;  %v497_v45 = vadd.f32 %v1510_v23, %v496_v42  ;;  %v1148_v46 = vpop.f32.mrb[17].mxu1 }
 0x114   : > { %v443_v47 = vpop.f32.mrb[18].mxu0  ;;  %v499_v48 = vpop.f32.mrb[18].mxu1 }
 0x115   : > { %v518_v49 = vmax.f32 %v441_v43, 0.0  ;;  %v444_v50 = vadd.f32 %v1510_v23, %v443_v47  ;;  %v1121_v51 = vpop.f32.mrb[19].mxu0  ;;  %v532_v52 = vmax.f32 %v497_v45, 0.0  ;;  %v500_v53 = vadd.f32 %v1510_v23, %v499_v48  ;;  %v1149_v54 = vpop.f32.mrb[19].mxu1 }
 0x117   : > { %v1056_v55 = vpack.c.bf16 %v518_v49, %v518_v49  ;;  %v519_v56 = vmax.f32 %v444_v50, 0.0  ;;  %v1070_v57 = vpack.c.bf16 %v532_v52, %v532_v52  ;;  %v533_v58 = vmax.f32 %v500_v53, 0.0 }
 0x119   : > { %645 = vst.msk [vmem:[%s1516_s12 + $0x20] sm:$0xf] %vm636_vm4, %v1056_v55  ;;  %v1057_v59 = vpack.c.bf16 %v519_v56, %v519_v56  ;;  %659 = vst.msk [vmem:[%s1516_s12 + $0x58] sm:$0xf] %vm636_vm4, %v1070_v57  ;;  %v1071_v60 = vpack.c.bf16 %v533_v58, %v533_v58 }
 0x11a   : > { %v448_v61 = vpop.f32.mrb[20].mxu0  ;;  %v504_v62 = vpop.f32.mrb[20].mxu1 }
 0x11b   : > { %646 = vst.msk [vmem:[%s1516_s12 + $0x24] sm:$0xf] %vm636_vm4, %v1057_v59  ;;  %v449_v63 = vadd.f32 %v1510_v23, %v448_v61  ;;  %v1124_v0 = vpop.f32.mrb[21].mxu0  ;;  %660 = vst.msk [vmem:[%s1516_s12 + $0x5c] sm:$0xf] %vm636_vm4, %v1071_v60  ;;  %v505_v1 = vadd.f32 %v1510_v23, %v504_v62  ;;  %v1152_v2 = vpop.f32.mrb[21].mxu1 }
 0x11c   : > { %v451_v3 = vpop.f32.mrb[22].mxu0  ;;  %v507_v4 = vpop.f32.mrb[22].mxu1 }
 0x11d   : > { %v520_v5 = vmax.f32 %v449_v63, 0.0  ;;  %v452_v6 = vadd.f32 %v1510_v23, %v451_v3  ;;  %v1125_v7 = vpop.f32.mrb[23].mxu0  ;;  %v534_v8 = vmax.f32 %v505_v1, 0.0  ;;  %v1153_v9 = vpop.f32.mrb[23].mxu1 }
 0x11f   : > { %v1058_v10 = vpack.c.bf16 %v520_v5, %v520_v5  ;;  %v521_v11 = vmax.f32 %v452_v6, 0.0  ;;  %v1072_v12 = vpack.c.bf16 %v534_v8, %v534_v8 }
 0x121   : > { %647 = vst.msk [vmem:[%s1516_s12 + $0x28] sm:$0xf] %vm636_vm4, %v1058_v10  ;;  %v1059_v13 = vpack.c.bf16 %v521_v11, %v521_v11  ;;  %661 = vst.msk [vmem:[%s1516_s12 + $0x60] sm:$0xf] %vm636_vm4, %v1072_v12 }
 0x122   : > { %v456_v14 = vpop.f32.mrb[24].mxu0 }
 0x123   : > { %648 = vst.msk [vmem:[%s1516_s12 + $0x2c] sm:$0xf] %vm636_vm4, %v1059_v13  ;;  %v457_v15 = vadd.f32 %v1510_v23, %v456_v14  ;;  %v1128_v16 = vpop.f32.mrb[25].mxu0 }
 0x124   : > { %v459_v17 = vpop.f32.mrb[26].mxu0 }
 0x125   : > { %v522_v18 = vmax.f32 %v457_v15, 0.0  ;;  %v460_v19 = vadd.f32 %v1510_v23, %v459_v17  ;;  %v1129_v20 = vpop.f32.mrb[27].mxu0  ;;  %668 = sbr.rel (!%p1415_p4) target bundleno = 378 (0x17a), region = 36 }
 0x127   : > { %v1060_v21 = vpack.c.bf16 %v522_v18, %v522_v18  ;;  %v523_v22 = vmax.f32 %v460_v19, 0.0 }
 0x129   : > { %649 = vst.msk [vmem:[%s1516_s12 + $0x30] sm:$0xf] %vm636_vm4, %v1060_v21  ;;  %v1061_v24 = vpack.c.bf16 %v523_v22, %v523_v22 }
 0x12b   : > { %650 = vst.msk [vmem:[%s1516_s12 + $0x34] sm:$0xf] %vm636_vm4, %v1061_v24 }
 0x12c   : > { %s1717_s18 = smov (!%p671_p8, %s670_s18), 25 }
 0x12d   : > { %s1036_s26 = sshll.u32 %s1717_s18, 6 }
 0x12e   : > { %p1039_p9 = scmp.eq.s32.totalorder %s1036_s26, 0 }
 0x12f   : > { %1275 = sdivrem.u32 (!%p1039_p9), %s1717_s18, 25 }
 0x130   : > { %679 = sbr.rel (%p1039_p9) target bundleno = 378 (0x17a), region = 40 }
 0x138   : > { %s1602_s20 = spop.drf %1275 }
 0x139   : > { %p1040_p10 = scmp.le.s32.totalorder %s1602_s20, 0 }
 0x13a   : > { %s1710_s15 = smov (!%p1040_p10), %s1596_s24  ;;  %s1711_s25 = smov (!%p1040_p10), %s1516_s12 }
 0x13b   : > { %930 = sbr.rel (%p1040_p10) target bundleno = 349 (0x15d), region = 112  ;;  %s1611_s27 = smov (!%p1040_p10), 0  }
 0x13c   : > { %s1613_s28 = smov (!%p1040_p10), 0  }
 0x142 LB: >> { %v696_v23 = vld [vmem:[%s1341_s25] sm:$0xf]  ;;  %v698_v25 = vld [vmem:[%s1341_s25 + $0x4] sm:$0xf]  ;;  %v700_v26 = vld [vmem:[%s1341_s25 + $0x8] sm:$0xf]  ;;  %s1349_s28 = sphi %s1613_s28, %s690_s28   ;;  %s1345_s27 = sphi %s1611_s27, %s1712_s27   ;;  %s1341_s25 = sphi %s1711_s25, %s751_s25   ;;  %s1337_s15 = sphi %s1710_s15, %s752_s15  }
 0x143   : >> { %697 = vst [vmem:[%s1337_s15] sm:$0xf] %v696_v23  ;;  %699 = vst [vmem:[%s1337_s15 + $0x4] sm:$0xf] %v698_v25  ;;  %v702_v27 = vld [vmem:[%s1341_s25 + $0xc] sm:$0xf]  ;;  %s746_s29 = sadd.s32 1, %s1345_s27 }
 0x144   : >> { %701 = vst [vmem:[%s1337_s15 + $0x8] sm:$0xf] %v700_v26  ;;  %v704_v28 = vld [vmem:[%s1341_s25 + $0x10] sm:$0xf]  ;;  %v706_v29 = vld [vmem:[%s1341_s25 + $0x14] sm:$0xf]  ;;  %p747_p11 = scmp.ge.s32.totalorder %s746_s29, %s1602_s20 }
 0x145   : >> { %703 = vst [vmem:[%s1337_s15 + $0xc] sm:$0xf] %v702_v27  ;;  %705 = vst [vmem:[%s1337_s15 + $0x10] sm:$0xf] %v704_v28  ;;  %v708_v30 = vld [vmem:[%s1341_s25 + $0x18] sm:$0xf] }
 0x146   : >> { %707 = vst [vmem:[%s1337_s15 + $0x14] sm:$0xf] %v706_v29  ;;  %v710_v31 = vld [vmem:[%s1341_s25 + $0x1c] sm:$0xf]  ;;  %v712_v32 = vld [vmem:[%s1341_s25 + $0x20] sm:$0xf] }
 0x147   : >> { %709 = vst [vmem:[%s1337_s15 + $0x18] sm:$0xf] %v708_v30  ;;  %711 = vst [vmem:[%s1337_s15 + $0x1c] sm:$0xf] %v710_v31  ;;  %v714_v33 = vld [vmem:[%s1341_s25 + $0x24] sm:$0xf] }
 0x148   : >> { %713 = vst [vmem:[%s1337_s15 + $0x20] sm:$0xf] %v712_v32  ;;  %v716_v34 = vld [vmem:[%s1341_s25 + $0x28] sm:$0xf]  ;;  %v718_v35 = vld [vmem:[%s1341_s25 + $0x2c] sm:$0xf] }
 0x149   : >> { %715 = vst [vmem:[%s1337_s15 + $0x24] sm:$0xf] %v714_v33  ;;  %717 = vst [vmem:[%s1337_s15 + $0x28] sm:$0xf] %v716_v34  ;;  %v720_v36 = vld [vmem:[%s1341_s25 + $0x30] sm:$0xf] }
 0x14a   : >> { %719 = vst [vmem:[%s1337_s15 + $0x2c] sm:$0xf] %v718_v35  ;;  %v722_v37 = vld [vmem:[%s1341_s25 + $0x34] sm:$0xf]  ;;  %v724_v38 = vld [vmem:[%s1341_s25 + $0x38] sm:$0xf] }
 0x14b   : >> { %721 = vst [vmem:[%s1337_s15 + $0x30] sm:$0xf] %v720_v36  ;;  %723 = vst [vmem:[%s1337_s15 + $0x34] sm:$0xf] %v722_v37  ;;  %v726_v39 = vld [vmem:[%s1341_s25 + $0x3c] sm:$0xf] }
 0x14c   : >> { %725 = vst [vmem:[%s1337_s15 + $0x38] sm:$0xf] %v724_v38  ;;  %v728_v40 = vld [vmem:[%s1341_s25 + $0x40] sm:$0xf]  ;;  %v730_v41 = vld [vmem:[%s1341_s25 + $0x44] sm:$0xf] }
 0x14d   : >> { %727 = vst [vmem:[%s1337_s15 + $0x3c] sm:$0xf] %v726_v39  ;;  %729 = vst [vmem:[%s1337_s15 + $0x40] sm:$0xf] %v728_v40  ;;  %v732_v42 = vld [vmem:[%s1341_s25 + $0x48] sm:$0xf] }
 0x14e   : >> { %731 = vst [vmem:[%s1337_s15 + $0x44] sm:$0xf] %v730_v41  ;;  %v734_v43 = vld [vmem:[%s1341_s25 + $0x4c] sm:$0xf]  ;;  %v736_v44 = vld [vmem:[%s1341_s25 + $0x50] sm:$0xf] }
 0x14f   : >> { %733 = vst [vmem:[%s1337_s15 + $0x48] sm:$0xf] %v732_v42  ;;  %735 = vst [vmem:[%s1337_s15 + $0x4c] sm:$0xf] %v734_v43  ;;  %v738_v45 = vld [vmem:[%s1341_s25 + $0x54] sm:$0xf] }
 0x150   : >> { %737 = vst [vmem:[%s1337_s15 + $0x50] sm:$0xf] %v736_v44  ;;  %v740_v46 = vld [vmem:[%s1341_s25 + $0x58] sm:$0xf]  ;;  %v742_v47 = vld [vmem:[%s1341_s25 + $0x5c] sm:$0xf] }
 0x151   : >> { %739 = vst [vmem:[%s1337_s15 + $0x54] sm:$0xf] %v738_v45  ;;  %741 = vst [vmem:[%s1337_s15 + $0x58] sm:$0xf] %v740_v46  ;;  %v744_v48 = vld [vmem:[%s1341_s25 + $0x60] sm:$0xf] }
 0x152   : >> { %743 = vst [vmem:[%s1337_s15 + $0x5c] sm:$0xf] %v742_v47  ;;  %745 = vst [vmem:[%s1337_s15 + $0x60] sm:$0xf] %v744_v48  ;;  %s1719_s29 = smov (%p747_p11, %s746_s29), 0  ;;  %s690_s28 = sadd.s32 1, %s1349_s28  }
 0x153   : >> { %s749_s30 = smul.u32 100, %s1719_s29  ;;  %p689_p12 = scmp.ge.s32.totalorder %s690_s28, %s1602_s20 }
 0x154   : >> { %s1712_s27 = smov %s1719_s29 }
 0x155   : >> { %s751_s25 = scalar_lea.vmem %s1516_s12, %s749_s30 [#allocation2]   ;;  %s752_s15 = scalar_lea.vmem %s1596_s24, %s749_s30  }
 0x156   : > { %692 = sbr.rel (!%p689_p12) target bundleno = 322 (0x142), region = 118 }
 0x15d PF: > { %1277 = sdivrem.u32 %s1717_s18, 25 }
 0x15e   : > { %s1041_s4 = smul.u32 100, %s1602_s20 }
 0x160   : > { %s757_s5 = scalar_lea.vmem %s1516_s12, %s1041_s4 [#allocation2]   ;;  %s759_s6 = scalar_lea.vmem %s1596_s24, %s1041_s4  }
 0x166   : > { %s1278_s7 = spop.drf %1277 }
 0x167   : > { %p1043_p13 = scmp.le.s32.totalorder %s1278_s7, 0 }
 0x168   : > { %s1351_s8 = smov (!%p1043_p13), %s759_s6   ;;  %s1355_s9 = smov (!%p1043_p13), %s757_s5  }
 0x169   : > { %944 = sbr.rel (%p1043_p13) target bundleno = 378 (0x17a), region = 123  ;;  %s1359_s10 = smov (!%p1043_p13), 0  }
 0x16a   : > { %s1363_s11 = smov (!%p1043_p13), 0  }
 0x170 LB: >> { %v769_v49 = vld [vmem:[%s1357_s9] sm:$0xf]  ;;  %s771_s14 = sadd.s32 1, %s1361_s10  ;;  %s763_s11 = sadd.s32 1, %s1365_s11   ;;  %s1365_s11 = sphi %s1363_s11, %s763_s11   ;;  %s1361_s10 = sphi %s1359_s10, %s1360_s10   ;;  %s1357_s9 = sphi %s1355_s9, %s776_s9   ;;  %s1353_s8 = sphi %s1351_s8, %s777_s8  }
 0x171   : >> { %770 = vst [vmem:[%s1353_s8] sm:$0xf] %v769_v49  ;;  %p772_p0 = scmp.ge.s32.totalorder %s771_s14, %s1278_s7  ;;  %p762_p1 = scmp.ge.s32.totalorder %s763_s11, %s1278_s7 }
 0x173   : >> { %s1721_s14 = smov (%p772_p0, %s771_s14), 0  ;;  %765 = sbr.rel (!%p762_p1) target bundleno = 368 (0x170), region = 129 }
 0x174   : >> { %s1044_s17 = sshll.u32 %s1721_s14, 2  ;;  %s1360_s10 = smov %s1721_s14  }
 0x175   : >> { %s776_s9 = scalar_lea.vmem %s757_s5, %s1044_s17 [#allocation2]   ;;  %s777_s8 = scalar_lea.vmem %s759_s6, %s1044_s17  }
 0x17a PF: > { %p10_p2 = scmp.ge.s32.totalorder %s1405_s16, 4   ;;  %s1713_s12 = smov %s1329_s13 }
 0x17b   : > { %s1714_s13 = smov %s1413_s19  ;;  %s1715_s14 = smov %s1405_s16 }
 0x17c   :  { %12 = sbr.rel (!%p10_p2) target bundleno = 2 (0x2), region = 140 }

// kernel: _lambda_.3
= control target key start
LH: loop header
LB: loop body
LE: loop exit
PB: predicated region body
PF: predicated region fallthrough
CT: control target
= control target key end

     0   :  { %v6046_v1 = vmov 0   ;;  %v98_v21 = vlaneseq  ;;  %v6047_v26 = vmov 1966171168   ;;  %vm264_vm0 = vcmask 130048   ;;  %s8004_s0 = inlined_call_operand.vmem [shape: bf16[25,2,400], index: 0, kind: input, shape index: {}]   ;;  %s8005_s1 = inlined_call_operand.vmem [shape: bf16[400,32], index: 1, kind: input, shape index: {}]   ;;  %s8006_s2 = inlined_call_operand.vmem [shape: f32[1,32], index: 2, kind: input, shape index: {}]   ;;  %s8007_s3 = inlined_call_operand.vmem [shape: bf16[25,32,32], index: 3, kind: input, shape index: {}]   ;;  %s8008_s4 = inlined_call_operand.vmem [shape: f32[1,32], index: 4, kind: input, shape index: {}]   ;;  %s8009_s5 = inlined_call_operand.vmem [shape: f32[32,4], index: 5, kind: input, shape index: {}]   ;;  %s8010_s6 = inlined_call_operand.vmem [shape: f32[1,4], index: 6, kind: input, shape index: {}]   ;;  %s8011_s7 = inlined_call_operand.hbm [shape: f32[2,4], index: 7, kind: output, shape index: {}]  }
   0x1   :  { %v6095_v0 = vld [vmem:[%s8005_s1 + $0x40] sm:$0xff]   ;;  %308 = vmatprep.subr.bf16.mxu1 %v6046_v1  ;;  %v6113_v4 = vld [vmem:[%s8005_s1 + $0x48] sm:$0xff]   ;;  %v6131_v7 = vld [vmem:[%s8005_s1 + $0x50] sm:$0xff]   ;;  %v96_v27 = vunpack.c.l.s4 %v6047_v26 }
   0x2   :  { %v6101_v2 = vld [vmem:[%s8005_s1 + $0x80] sm:$0xff]   ;;  %5016 = vmatprep.subr.bf16.mxu0 %v6095_v0  ;;  %v6120_v5 = vld [vmem:[%s8005_s1 + $0x88] sm:$0xff]   ;;  %v6137_v8 = vld [vmem:[%s8005_s1 + $0x90] sm:$0xff]   ;;  %v99_v28 = vshrl.u32 %v98_v21, 7 }
   0x3   :  { %v6107_v3 = vld [vmem:[%s8005_s1] sm:$0xff]   ;;  %309 = vmatpush1.bf16.msra.mxu1 %v6101_v2  ;;  %v6126_v6 = vld [vmem:[%s8005_s1 + $0x8] sm:$0xff]   ;;  %v6144_v9 = vld [vmem:[%s8005_s1 + $0x10] sm:$0xff]   ;;  %v97_v32 = vunpack.c.0.s8 %v96_v27 }
   0x4   :  { %5017 = vmatpush3.bf16.msra.mxu0 %v6107_v3  ;;  %310 = vmatprep.subr.bf16.mxu1 %v6046_v1  ;;  %v6150_v10 = vld [vmem:[%s8005_s1 + $0x58] sm:$0xff]   ;;  %v6169_v13 = vld [vmem:[%s8005_s1 + $0x60] sm:$0xff]   ;;  %v6188_v16 = vld [vmem:[%s8005_s1 + $0x68] sm:$0xff]  }
   0x5   :  { %5018 = vmatprep.subr.bf16.mxu0 %v6113_v4  ;;  %v6156_v11 = vld [vmem:[%s8005_s1 + $0x98] sm:$0xff]   ;;  %v6175_v14 = vld [vmem:[%s8005_s1 + $0xa0] sm:$0xff]   ;;  %v6193_v17 = vld [vmem:[%s8005_s1 + $0xa8] sm:$0xff]   ;;  %v6248_v33 = vsub.s32 %v97_v32, %v99_v28 }
   0x6   :  { %v6163_v12 = vld [vmem:[%s8005_s1 + $0x18] sm:$0xff]   ;;  %v6182_v15 = vld [vmem:[%s8005_s1 + $0x20] sm:$0xff]   ;;  %v6199_v18 = vld [vmem:[%s8005_s1 + $0x28] sm:$0xff]  }
   0x7   :  { %311 = vmatpush1.bf16.msra.mxu1 %v6120_v5  ;;  %v6206_v19 = vld [vmem:[%s8005_s1 + $0x70] sm:$0xff]   ;;  %v6223_v23 = vld [vmem:[%s8005_s1 + $0x78] sm:$0xff]   ;;  %v4743_v24 = vld.sshfl [vmem:[%s8004_s0] sm:$0x33 pattern:$0x75316420] }
   0x8   :  { %5019 = vmatpush3.bf16.msra.mxu0 %v6126_v6  ;;  %312 = vmatprep.subr.bf16.mxu1 %v6046_v1  ;;  %v6212_v20 = vld [vmem:[%s8005_s1 + $0xb0] sm:$0xff]   ;;  %v6234_v25 = vld [vmem:[%s8005_s1 + $0xb8] sm:$0xff]   ;;  %v4771_v30 = vld.sshfl [vmem:[%s8004_s0 + $0x4] sm:$0x33 pattern:$0x75316420]  ;;  %v94_v31 = vcombine.high %v4743_v24, %v4743_v24  ;;  %v101_v37 = vrot.slane %v4743_v24, %v6248_v33 }
   0x9   :  { %5020 = vmatprep.subr.bf16.mxu0 %v6131_v7  ;;  %v6217_v22 = vld [vmem:[%s8005_s1 + $0x30] sm:$0xff]   ;;  %v6239_v29 = vld [vmem:[%s8005_s1 + $0x38] sm:$0xff]   ;;  %v6253_v34 = vld [vmem:[%s8005_s1 + $0xc0] sm:$0xff]   ;;  %v364_v35 = vcombine.high %v4771_v30, %v4771_v30 }
   0xa   :  { %v108_v36 = vrot.slane %v94_v31, %v6248_v33  ;;  %v109_v40 = vcombine.high %v101_v37, %v101_v37 }
   0xb   :  { %313 = vmatpush1.bf16.msra.mxu1 %v6137_v8  ;;  %v378_v39 = vrot.slane %v364_v35, %v6248_v33 }
   0xc   :  { %5021 = vmatpush3.bf16.msra.mxu0 %v6144_v9  ;;  %314 = vmatprep.subr.bf16.mxu1 %v6046_v1  ;;  %v110_v38 = vcombine.high %v108_v36, %v108_v36 }
   0xd   :  { %5022 = vmatprep.subr.bf16.mxu0 %v6150_v10  ;;  %300 = vmatprep.mubr.bf16.mxu0 %v108_v36  ;;  %v380_v41 = vcombine.high %v378_v39, %v378_v39 }
   0xe   :  { %4769 = vmatprep.mubr.msk.bf16.mxu1 %vm264_vm0, %v110_v38 }
   0xf   :  { %315 = vmatpush1.bf16.msra.mxu1 %v6156_v11 }
  0x10   :  { %5023 = vmatpush3.bf16.msra.mxu0 %v6163_v12  ;;  %316 = vmatprep.subr.bf16.mxu1 %v6046_v1 }
  0x11   :  { %5024 = vmatprep.subr.bf16.mxu0 %v6169_v13 }
  0x13   :  { %317 = vmatpush1.bf16.msra.mxu1 %v6175_v14 }
  0x14   :  { %5025 = vmatpush3.bf16.msra.mxu0 %v6182_v15  ;;  %318 = vmatprep.subr.bf16.mxu1 %v6046_v1 }
  0x15   :  { %5026 = vmatprep.subr.bf16.mxu0 %v6188_v16 }
  0x17   :  { %319 = vmatpush1.bf16.msra.mxu1 %v6193_v17 }
  0x18   :  { %5027 = vmatpush3.bf16.msra.mxu0 %v6199_v18  ;;  %320 = vmatprep.subr.bf16.mxu1 %v6046_v1 }
  0x19   :  { %5028 = vmatprep.subr.bf16.mxu0 %v6206_v19 }
  0x1b   :  { %321 = vmatpush1.bf16.msra.mxu1 %v6212_v20 }
  0x1c   :  { %5029 = vmatpush3.bf16.msra.mxu0 %v6217_v22  ;;  %322 = vmatprep.subr.bf16.mxu1 %v6046_v1 }
  0x1d   :  { %5030 = vmatprep.subr.bf16.mxu0 %v6223_v23 }
  0x1f   :  { %323 = vmatpush1.bf16.msra.mxu1 %v6234_v25 }
  0x20   :  { %5031 = vmatpush3.bf16.msra.mxu0 %v6239_v29  ;;  %324 = vmatprep.subr.bf16.mxu1 %v6046_v1 }
  0x21   :  { %5038 = vmatprep.subr.bf16.mxu0 %v6095_v0 }
  0x23   :  { %301 = vmatmul.mubr.bf16.vlgmr.msra.gmra.mrb[0].mxu0 %v101_v37  ;;  %325 = vmatpush1.bf16.msra.mxu1 %v6253_v34 }
  0x24   :  { %5039 = vmatpush3.bf16.msra.mxu0 %v6107_v3  ;;  %427 = vmatprep.subr.bf16.mxu1 %v6046_v1 }
  0x25   :  { %5040 = vmatprep.subr.bf16.mxu0 %v6113_v4  ;;  %419 = vmatprep.mubr.bf16.mxu0 %v378_v39 }
  0x26   :  { %341 = vmatmul.mubr.bf16.vlgmr.msra.gmra.mrb[0].mxu1 %v109_v40 }
  0x27   :  { %428 = vmatpush1.bf16.msra.mxu1 %v6101_v2  ;;  %4772 = vmatprep.mubr.msk.bf16.mxu1 %vm264_vm0, %v380_v41 }
  0x28   :  { %5041 = vmatpush3.bf16.msra.mxu0 %v6126_v6  ;;  %429 = vmatprep.subr.bf16.mxu1 %v6046_v1 }
  0x29   :  { %5042 = vmatprep.subr.bf16.mxu0 %v6131_v7 }
  0x2b   :  { %430 = vmatpush1.bf16.msra.mxu1 %v6120_v5 }
  0x2c   :  { %5043 = vmatpush3.bf16.msra.mxu0 %v6144_v9  ;;  %431 = vmatprep.subr.bf16.mxu1 %v6046_v1 }
  0x2d   :  { %5044 = vmatprep.subr.bf16.mxu0 %v6150_v10 }
  0x2f   :  { %432 = vmatpush1.bf16.msra.mxu1 %v6137_v8 }
  0x30   :  { %5045 = vmatpush3.bf16.msra.mxu0 %v6163_v12  ;;  %433 = vmatprep.subr.bf16.mxu1 %v6046_v1 }
  0x31   :  { %5046 = vmatprep.subr.bf16.mxu0 %v6169_v13 }
  0x33   :  { %434 = vmatpush1.bf16.msra.mxu1 %v6156_v11 }
  0x34   :  { %5047 = vmatpush3.bf16.msra.mxu0 %v6182_v15  ;;  %435 = vmatprep.subr.bf16.mxu1 %v6046_v1 }
  0x35   :  { %5048 = vmatprep.subr.bf16.mxu0 %v6188_v16 }
  0x37   :  { %436 = vmatpush1.bf16.msra.mxu1 %v6175_v14 }
  0x38   :  { %5049 = vmatpush3.bf16.msra.mxu0 %v6199_v18  ;;  %437 = vmatprep.subr.bf16.mxu1 %v6046_v1 }
  0x39   :  { %5050 = vmatprep.subr.bf16.mxu0 %v6206_v19 }
  0x3b   :  { %438 = vmatpush1.bf16.msra.mxu1 %v6193_v17 }
  0x3c   :  { %5051 = vmatpush3.bf16.msra.mxu0 %v6217_v22  ;;  %439 = vmatprep.subr.bf16.mxu1 %v6046_v1 }
  0x3d   :  { %12 = vsyncpa [#allocation3], 0  ;;  %5052 = vmatprep.subr.bf16.mxu0 %v6223_v23  ;;  %v371_v42 = vrot.slane %v4771_v30, %v6248_v33  ;;  %v5894_v44 = vld [vmem:[%s8007_s3 + $0x10] sm:$0xff]   ;;  %v6048_v45 = vmov 0.0   ;;  %v5895_v46 = vld [vmem:[%s8007_s3 + $0x18] sm:$0xff]   ;;  %vm6049_vm1 = vmmov 0  }
  0x3e   :  { %v4784_v47 = vld.sshfl [vmem:[%s8004_s0 + $0x8] sm:$0x33 pattern:$0x75316420]  ;;  %v6337_v53 = vld [vmem:[%s8006_s2] ss:$0 sm:$0xff] }
  0x3f   :  { %440 = vmatpush1.bf16.msra.mxu1 %v6212_v20  ;;  %v379_v43 = vcombine.high %v371_v42, %v371_v42  ;;  %v595_v48 = vcombine.high %v4784_v47, %v4784_v47  ;;  %v602_v50 = vrot.slane %v4784_v47, %v6248_v33  ;;  %vm486_vm2 = vcmask 261120   ;;  %v5896_v38 = vld [vmem:[%s8007_s3] sm:$0xff]   ;;  %v5897_v40 = vld [vmem:[%s8007_s3 + $0x8] sm:$0xff]  }
  0x40   :  { %5053 = vmatpush3.bf16.msra.mxu0 %v6239_v29  ;;  %441 = vmatprep.subr.bf16.mxu1 %v6046_v1  ;;  %vm4726_vm3 = vcmask 25600  }
  0x41   :  { %5646 = vmatprep.subr.bf16.mxu0 %v6048_v45  ;;  %v609_v49 = vrot.slane %v595_v48, %v6248_v33 }
  0x43   :  { %420 = vmatmul.mubr.bf16.vlgmr.msra.gmra.mrb[4].mxu0 %v371_v42  ;;  %442 = vmatpush1.bf16.msra.mxu1 %v6234_v25  ;;  %v611_v42 = vcombine.high %v609_v49, %v609_v49 }
  0x44   :  { %443 = vmatprep.subr.bf16.mxu1 %v6046_v1  ;;  %5647 = vmatpush3.bf16.msra.mxu0 %v5894_v44  ;;  %v610_v44 = vcombine.high %v602_v50, %v602_v50 }
  0x45   :  { %5648 = vmatprep.subr.bf16.mxu0 %v6048_v45  ;;  %5650 = vmatprep.mubr.msk.bf16.mxu0 %vm6049_vm1, %v6048_v45 }
  0x47   :  { %444 = vmatpush1.bf16.msra.mxu1 %v6253_v34 }
  0x48   :  { %5066 = vmatprep.subr.bf16.mxu1 %v6095_v0  ;;  %5649 = vmatpush3.bf16.msra.mxu0 %v5895_v46  ;;  %v5898_v46 = vld [vmem:[%s8007_s3 + $0x20] sm:$0xff]  }
  0x49   :  { %5654 = vmatprep.subr.bf16.mxu0 %v6048_v45 }
  0x4a   :  { %460 = vmatmul.mubr.bf16.vlgmr.msra.gmra.mrb[4].mxu1 %v379_v43 }
  0x4b   :  { %5067 = vmatpush3.bf16.msra.mxu1 %v6107_v3  ;;  %650 = vmatprep.mubr.bf16.mxu1 %v609_v49 }
  0x4c   :  { %5068 = vmatprep.subr.bf16.mxu1 %v6113_v4 }
  0x4f   :  { %5069 = vmatpush3.bf16.msra.mxu1 %v6126_v6 }
  0x50   :  { %5070 = vmatprep.subr.bf16.mxu1 %v6131_v7 }
  0x53   :  { %5071 = vmatpush3.bf16.msra.mxu1 %v6144_v9 }
  0x54   :  { %5072 = vmatprep.subr.bf16.mxu1 %v6150_v10 }
  0x57   :  { %5073 = vmatpush3.bf16.msra.mxu1 %v6163_v12 }
  0x58   :  { %5074 = vmatprep.subr.bf16.mxu1 %v6169_v13 }
  0x5b   :  { %5075 = vmatpush3.bf16.msra.mxu1 %v6182_v15 }
  0x5c   :  { %5076 = vmatprep.subr.bf16.mxu1 %v6188_v16 }
  0x5f   :  { %5077 = vmatpush3.bf16.msra.mxu1 %v6199_v18 }
  0x60   :  { %5078 = vmatprep.subr.bf16.mxu1 %v6206_v19 }
  0x63   :  { %5079 = vmatpush3.bf16.msra.mxu1 %v6217_v22 }
  0x64   :  { %5080 = vmatprep.subr.bf16.mxu1 %v6223_v23 }
  0x67   :  { %5081 = vmatpush3.bf16.msra.mxu1 %v6239_v29 }
  0x68   :  { %5662 = vmatprep.subr.bf16.mxu1 %v6048_v45 }
  0x6a   :  { %651 = vmatmul.mubr.bf16.vlgmr.msra.gmra.mrb[8].mxu1 %v602_v50 }
  0x6b   :  { %5666 = vmatprep.mubr.msk.bf16.mxu1 %vm6049_vm1, %v6048_v45  ;;  %5663 = vmatpush3.bf16.msra.mxu1 %v5898_v46  ;;  %v5901_v46 = vld [vmem:[%s8007_s3 + $0x38] sm:$0xff]  }
  0x6c   :  { %5664 = vmatprep.subr.bf16.mxu1 %v6048_v45 }
  0xf6   :  { %v5032_v51 = vpop.f32.mrb[0].mxu0 }
  0xf7   :  { %v5033_v52 = vpop.f32.mrb[1].mxu0 }
  0xf8   :  { %v5034_v54 = vadd.f32 %v5033_v52, %v5032_v51  ;;  %v5035_v55 = vpop.f32.mrb[2].mxu0  ;;  %v5899_v52 = vld [vmem:[%s8007_s3 + $0x28] sm:$0xff]  }
  0xf9   :  { %v5036_v56 = vpop.f32.mrb[3].mxu0  ;;  %v342_v57 = vpop.f32.mrb[0].mxu1  ;;  %5665 = vmatpush3.bf16.msra.mxu1 %v5899_v52 }
  0xfa   :  { %v303_v58 = vadd.f32 %v5034_v54, %v6337_v53  ;;  %v344_v59 = vpop.f32.mrb[1].mxu1  ;;  %5091 = vmatprep.subr.bf16.mxu1 %v6095_v0  ;;  %v4794_v54 = vld.sshfl [vmem:[%s8004_s0 + $0xc] sm:$0x33 pattern:$0x75316420] }
  0xfb   :  { %v345_v60 = vpop.f32.mrb[2].mxu1  ;;  %v771_v55 = vcombine.high %v4794_v54, %v4794_v54 }
  0xfc   :  { %v343_v61 = vadd.f32 %v342_v57, %v303_v58  ;;  %v346_v62 = vpop.f32.mrb[3].mxu1  ;;  %v778_v57 = vrot.slane %v4794_v54, %v6248_v33 }
  0xfd   :  { %v785_v56 = vrot.slane %v771_v55, %v6248_v33 }
  0xfe   :  { %v348_v41 = vmax.f32 %v343_v61, 0.0  ;;  %v786_v59 = vcombine.high %v778_v57, %v778_v57 }
  0xff   :  { %v787_v58 = vcombine.high %v785_v56, %v785_v56 }
 0x100   :  { %v349_v43 = vpack.c.bf16 %v348_v41, %v348_v41  ;;  %v5900_v41 = vld [vmem:[%s8007_s3 + $0x30] sm:$0xff]  }
 0x116   :  { %v5054_v63 = vpop.f32.mrb[4].mxu0 }
 0x117   :  { %v5055_v21 = vpop.f32.mrb[5].mxu0 }
 0x118   :  { %v5056_v24 = vadd.f32 %v5055_v21, %v5054_v63  ;;  %v5057_v26 = vpop.f32.mrb[6].mxu0 }
 0x119   :  { %v5058_v27 = vpop.f32.mrb[7].mxu0 }
 0x11a   :  { %v422_v28 = vadd.f32 %v5056_v24, %v6337_v53 }
 0x11d   :  { %v461_v30 = vpop.f32.mrb[4].mxu1 }
 0x11e   :  { %v462_v31 = vadd.f32 %v461_v30, %v422_v28  ;;  %v463_v32 = vpop.f32.mrb[5].mxu1 }
 0x11f   :  { %v464_v35 = vpop.f32.mrb[6].mxu1 }
 0x120   :  { %v467_v36 = vmax.f32 %v462_v31, 0.0  ;;  %v465_v37 = vpop.f32.mrb[7].mxu1 }
 0x122   :  { %v468_v39 = vpack.c.bf16 %v467_v36, %v467_v36 }
 0x124   :  { %5651 = vmatmul.mubr.msk.bf16.vlgmr.msra.gmra.mrb[8].mxu0 %vm486_vm2, %v468_v39 }
 0x125   :  { %5655 = vmatpush3.bf16.msra.mxu0 %v5896_v38  ;;  %5658 = vmatprep.mubr.msk.bf16.mxu0 %vm6049_vm1, %v6048_v45 }
 0x126   :  { %5656 = vmatprep.subr.bf16.mxu0 %v6048_v45 }
 0x129   :  { %5657 = vmatpush3.bf16.msra.mxu0 %v5897_v40 }
 0x12a   :  { %658 = vmatprep.subr.bf16.mxu0 %v6046_v1 }
 0x12c   :  { %5659 = vmatmul.mubr.msk.bf16.vlgmr.msra.gmra.mrb[12].mxu0 %vm486_vm2, %v349_v43 }
 0x12d   :  { %659 = vmatpush1.bf16.msra.mxu0 %v6101_v2  ;;  %4785 = vmatprep.mubr.msk.bf16.mxu0 %vm264_vm0, %v611_v42 }
 0x12e   :  { %660 = vmatprep.subr.bf16.mxu0 %v6046_v1 }
 0x131   :  { %661 = vmatpush1.bf16.msra.mxu0 %v6120_v5 }
 0x132   :  { %662 = vmatprep.subr.bf16.mxu0 %v6046_v1 }
 0x135   :  { %663 = vmatpush1.bf16.msra.mxu0 %v6137_v8 }
 0x136   :  { %664 = vmatprep.subr.bf16.mxu0 %v6046_v1 }
 0x139   :  { %665 = vmatpush1.bf16.msra.mxu0 %v6156_v11 }
 0x13a   :  { %666 = vmatprep.subr.bf16.mxu0 %v6046_v1 }
 0x13d   :  { %667 = vmatpush1.bf16.msra.mxu0 %v6175_v14  ;;  %v5082_v47 = vpop.f32.mrb[8].mxu1 }
 0x13e   :  { %668 = vmatprep.subr.bf16.mxu0 %v6046_v1  ;;  %v5083_v48 = vpop.f32.mrb[9].mxu1 }
 0x13f   :  { %v5084_v49 = vadd.f32 %v5083_v48, %v5082_v47  ;;  %v5085_v50 = vpop.f32.mrb[10].mxu1  ;;  %v4804_v47 = vld.sshfl [vmem:[%s8004_s0 + $0x10] sm:$0x33 pattern:$0x75316420] }
 0x140   :  { %v5086_v51 = vpop.f32.mrb[11].mxu1  ;;  %v947_v48 = vcombine.high %v4804_v47, %v4804_v47  ;;  %v954_v50 = vrot.slane %v4804_v47, %v6248_v33  ;;  %v6591_v47 = vld [vmem:[%s8005_s1 + $0x58] sm:$0xff]  }
 0x141   :  { %669 = vmatpush1.bf16.msra.mxu0 %v6193_v17  ;;  %v653_v30 = vadd.f32 %v5084_v49, %v6337_v53 }
 0x142   :  { %670 = vmatprep.subr.bf16.mxu0 %v6046_v1  ;;  %v961_v49 = vrot.slane %v947_v48, %v6248_v33  ;;  %v6597_v48 = vld [vmem:[%s8005_s1 + $0x18] sm:$0xff]  }
 0x145   :  { %671 = vmatpush1.bf16.msra.mxu0 %v6212_v20 }
 0x146   :  { %672 = vmatprep.subr.bf16.mxu0 %v6046_v1 }
 0x149   :  { %673 = vmatpush1.bf16.msra.mxu0 %v6234_v25 }
 0x14a   :  { %674 = vmatprep.subr.bf16.mxu0 %v6046_v1 }
 0x14d   :  { %675 = vmatpush1.bf16.msra.mxu0 %v6253_v34 }
 0x14e   :  { %834 = vmatprep.subr.bf16.mxu0 %v6046_v1 }
 0x150   :  { %691 = vmatmul.mubr.bf16.vlgmr.msra.gmra.mrb[16].mxu0 %v610_v44 }
 0x151   :  { %835 = vmatpush1.bf16.msra.mxu0 %v6101_v2  ;;  %4795 = vmatprep.mubr.msk.bf16.mxu0 %vm264_vm0, %v787_v58 }
 0x152   :  { %836 = vmatprep.subr.bf16.mxu0 %v6046_v1 }
 0x155   :  { %837 = vmatpush1.bf16.msra.mxu0 %v6120_v5 }
 0x156   :  { %838 = vmatprep.subr.bf16.mxu0 %v6046_v1 }
 0x159   :  { %839 = vmatpush1.bf16.msra.mxu0 %v6137_v8 }
 0x15a   :  { %840 = vmatprep.subr.bf16.mxu0 %v6046_v1 }
 0x15d   :  { %841 = vmatpush1.bf16.msra.mxu0 %v6156_v11 }
 0x15e   :  { %842 = vmatprep.subr.bf16.mxu0 %v6046_v1 }
 0x161   :  { %843 = vmatpush1.bf16.msra.mxu0 %v6175_v14 }
 0x162   :  { %844 = vmatprep.subr.bf16.mxu0 %v6046_v1 }
 0x165   :  { %845 = vmatpush1.bf16.msra.mxu0 %v6193_v17 }
 0x166   :  { %846 = vmatprep.subr.bf16.mxu0 %v6046_v1 }
 0x169   :  { %847 = vmatpush1.bf16.msra.mxu0 %v6212_v20 }
 0x16a   :  { %848 = vmatprep.subr.bf16.mxu0 %v6046_v1 }
 0x16d   :  { %849 = vmatpush1.bf16.msra.mxu0 %v6234_v25 }
 0x16e   :  { %850 = vmatprep.subr.bf16.mxu0 %v6046_v1 }
 0x171   :  { %851 = vmatpush1.bf16.msra.mxu0 %v6253_v34 }
 0x172   :  { %5116 = vmatprep.subr.bf16.mxu0 %v6095_v0 }
 0x174   :  { %867 = vmatmul.mubr.bf16.vlgmr.msra.gmra.mrb[20].mxu0 %v786_v59 }
 0x175   :  { %5117 = vmatpush3.bf16.msra.mxu0 %v6107_v3  ;;  %1002 = vmatprep.mubr.bf16.mxu0 %v961_v49 }
 0x176   :  { %5118 = vmatprep.subr.bf16.mxu0 %v6113_v4 }
 0x179   :  { %5119 = vmatpush3.bf16.msra.mxu0 %v6126_v6 }
 0x17a   :  { %5120 = vmatprep.subr.bf16.mxu0 %v6131_v7 }
 0x17d   :  { %5121 = vmatpush3.bf16.msra.mxu0 %v6144_v9 }
 0x17e   :  { %5122 = vmatprep.subr.bf16.mxu0 %v6150_v10 }
 0x181   :  { %5123 = vmatpush3.bf16.msra.mxu0 %v6163_v12 }
 0x182   :  { %5124 = vmatprep.subr.bf16.mxu0 %v6169_v13 }
 0x185   :  { %5125 = vmatpush3.bf16.msra.mxu0 %v6182_v15 }
 0x186   :  { %5126 = vmatprep.subr.bf16.mxu0 %v6188_v16 }
 0x189   :  { %5127 = vmatpush3.bf16.msra.mxu0 %v6199_v18 }
 0x18a   :  { %5128 = vmatprep.subr.bf16.mxu0 %v6206_v19 }
 0x18d   :  { %5129 = vmatpush3.bf16.msra.mxu0 %v6217_v22 }
 0x18e   :  { %5130 = vmatprep.subr.bf16.mxu0 %v6223_v23 }
 0x191   :  { %5131 = vmatpush3.bf16.msra.mxu0 %v6239_v29 }
 0x192   :  { %5678 = vmatprep.subr.bf16.mxu0 %v6048_v45 }
 0x194   :  { %1003 = vmatmul.mubr.bf16.vlgmr.msra.gmra.mrb[24].mxu0 %v954_v50 }
 0x195   :  { %5682 = vmatprep.mubr.msk.bf16.mxu0 %vm6049_vm1, %v6048_v45 }
 0x1f7   :  { %v524_v60 = vpop.f32.mrb[8].mxu0 }
 0x1f8   :  { %v5652_v61 = vpop.f32.mrb[9].mxu0 }
 0x1f9   :  { %v527_v62 = vpop.f32.mrb[10].mxu0 }
 0x1fa   :  { %v5653_v63 = vpop.f32.mrb[11].mxu0 }
 0x1ff   :  { %v579_v21 = vpop.f32.mrb[12].mxu0 }
 0x200   :  { %v580_v24 = vadd.f32 %v579_v21, %v524_v60  ;;  %v5660_v26 = vpop.f32.mrb[13].mxu0 }
 0x201   :  { %v582_v27 = vpop.f32.mrb[14].mxu0  ;;  %v963_v26 = vcombine.high %v961_v49, %v961_v49  ;;  %v6603_v49 = vld [vmem:[%s8005_s1 + $0x60] sm:$0xff]  }
 0x202   :  { %v5661_v28 = vpop.f32.mrb[15].mxu0 }
 0x223   :  { %v692_v31 = vpop.f32.mrb[16].mxu0 }
 0x224   :  { %v693_v32 = vadd.f32 %v692_v31, %v653_v30  ;;  %v694_v35 = vpop.f32.mrb[17].mxu0 }
 0x225   :  { %v695_v36 = vpop.f32.mrb[18].mxu0 }
 0x226   :  { %v698_v37 = vmax.f32 %v693_v32, 0.0  ;;  %v696_v38 = vpop.f32.mrb[19].mxu0 }
 0x228   :  { %v699_v39 = vpack.c.bf16 %v698_v37, %v698_v37 }
 0x22a   :  { %5667 = vmatmul.mubr.msk.bf16.vlgmr.msra.gmra.mrb[12].mxu1 %vm486_vm2, %v699_v39 }
 0x22b   :  { %5092 = vmatpush3.bf16.msra.mxu1 %v6107_v3  ;;  %826 = vmatprep.mubr.bf16.mxu1 %v785_v56 }
 0x22c   :  { %5093 = vmatprep.subr.bf16.mxu1 %v6113_v4 }
 0x22f   :  { %5094 = vmatpush3.bf16.msra.mxu1 %v6126_v6 }
 0x230   :  { %5095 = vmatprep.subr.bf16.mxu1 %v6131_v7 }
 0x233   :  { %5096 = vmatpush3.bf16.msra.mxu1 %v6144_v9 }
 0x234   :  { %5097 = vmatprep.subr.bf16.mxu1 %v6150_v10 }
 0x237   :  { %5098 = vmatpush3.bf16.msra.mxu1 %v6163_v12 }
 0x238   :  { %5099 = vmatprep.subr.bf16.mxu1 %v6169_v13 }
 0x23b   :  { %5100 = vmatpush3.bf16.msra.mxu1 %v6182_v15 }
 0x23c   :  { %5101 = vmatprep.subr.bf16.mxu1 %v6188_v16 }
 0x23f   :  { %5102 = vmatpush3.bf16.msra.mxu1 %v6199_v18 }
 0x240   :  { %5103 = vmatprep.subr.bf16.mxu1 %v6206_v19 }
 0x243   :  { %5104 = vmatpush3.bf16.msra.mxu1 %v6217_v22 }
 0x244   :  { %5105 = vmatprep.subr.bf16.mxu1 %v6223_v23 }
 0x247   :  { %5106 = vmatpush3.bf16.msra.mxu1 %v6239_v29  ;;  %v868_v40 = vpop.f32.mrb[20].mxu0 }
 0x248   :  { %5670 = vmatprep.subr.bf16.mxu1 %v6048_v45  ;;  %v870_v42 = vpop.f32.mrb[21].mxu0 }
 0x249   :  { %v871_v43 = vpop.f32.mrb[22].mxu0  ;;  %v6532_v42 = vld [vmem:[%s8005_s1 + $0x90] sm:$0xff]  }
 0x24a   :  { %827 = vmatmul.mubr.bf16.vlgmr.msra.gmra.mrb[16].mxu1 %v778_v57  ;;  %v872_v44 = vpop.f32.mrb[23].mxu0  ;;  %v6539_v43 = vld [vmem:[%s8005_s1 + $0x98] sm:$0xff]  }
 0x24b   :  { %5674 = vmatprep.mubr.msk.bf16.mxu1 %vm6049_vm1, %v6048_v45  ;;  %5671 = vmatpush3.bf16.msra.mxu1 %v5900_v41  ;;  %v6525_v41 = vld [vmem:[%s8005_s1 + $0x88] sm:$0xff]  }
 0x24c   :  { %5672 = vmatprep.subr.bf16.mxu1 %v6048_v45 }
 0x24f   :  { %5673 = vmatpush3.bf16.msra.mxu1 %v5901_v46  ;;  %v6585_v46 = vld [vmem:[%s8005_s1 + $0x10] sm:$0xff]  }
 0x250   :  { %1010 = vmatprep.subr.bf16.mxu1 %v6046_v1 }
 0x2fd   :  { %v754_v51 = vpop.f32.mrb[12].mxu1 }
 0x2fe   :  { %v6455_v52 = vadd.f32 %v754_v51, %v580_v24  ;;  %v5668_v54 = vpop.f32.mrb[13].mxu1  ;;  %v6615_v51 = vld [vmem:[%s8005_s1 + $0x68] sm:$0xff]  }
 0x2ff   :  { %v757_v55 = vpop.f32.mrb[14].mxu1  ;;  %v5904_v54 = vld [vmem:[%s8007_s3 + $0x50] sm:$0xff]  }
 0x300   :  { %v5669_v56 = vpop.f32.mrb[15].mxu1 }
 0x31d   :  { %v5107_v57 = vpop.f32.mrb[16].mxu1 }
 0x31e   :  { %v5108_v58 = vpop.f32.mrb[17].mxu1 }
 0x31f   :  { %v5109_v59 = vadd.f32 %v5108_v58, %v5107_v57  ;;  %v5110_v60 = vpop.f32.mrb[18].mxu1 }
 0x320   :  { %v5111_v61 = vpop.f32.mrb[19].mxu1 }
 0x321   :  { %v829_v62 = vadd.f32 %v5109_v59, %v6337_v53 }
 0x323   :  { %v869_v63 = vadd.f32 %v868_v40, %v829_v62  ;;  %v6517_v40 = vld [vmem:[%s8005_s1 + $0x80] sm:$0xff]  }
 0x325   :  { %v874_v21 = vmax.f32 %v869_v63, 0.0 }
 0x327   :  { %v875_v27 = vpack.c.bf16 %v874_v21, %v874_v21 }
 0x329   :  { %5675 = vmatmul.mubr.msk.bf16.vlgmr.msra.gmra.mrb[20].mxu1 %vm486_vm2, %v875_v27 }
 0x32a   :  { %1011 = vmatpush1.bf16.msra.mxu1 %v6101_v2  ;;  %4805 = vmatprep.mubr.msk.bf16.mxu1 %vm264_vm0, %v963_v26  ;;  %v962_v2 = vcombine.high %v954_v50, %v954_v50  ;;  %v6609_v50 = vld [vmem:[%s8005_s1 + $0x20] sm:$0xff]  }
 0x32b   :  { %1012 = vmatprep.subr.bf16.mxu1 %v6046_v1 }
 0x32e   :  { %1013 = vmatpush1.bf16.msra.mxu1 %v6120_v5 }
 0x32f   :  { %1014 = vmatprep.subr.bf16.mxu1 %v6046_v1 }
 0x332   :  { %1015 = vmatpush1.bf16.msra.mxu1 %v6137_v8  ;;  %v5903_v8 = vld [vmem:[%s8007_s3 + $0x48] sm:$0xff]  }
 0x333   :  { %1016 = vmatprep.subr.bf16.mxu1 %v6046_v1 }
 0x336   :  { %1017 = vmatpush1.bf16.msra.mxu1 %v6156_v11 }
 0x337   :  { %1018 = vmatprep.subr.bf16.mxu1 %v6046_v1 }
 0x33a   :  { %1019 = vmatpush1.bf16.msra.mxu1 %v6175_v14 }
 0x33b   :  { %1020 = vmatprep.subr.bf16.mxu1 %v6046_v1 }
 0x33e   :  { %1021 = vmatpush1.bf16.msra.mxu1 %v6193_v17 }
 0x33f   :  { %1022 = vmatprep.subr.bf16.mxu1 %v6046_v1 }
 0x342   :  { %1023 = vmatpush1.bf16.msra.mxu1 %v6212_v20 }
 0x343   :  { %1024 = vmatprep.subr.bf16.mxu1 %v6046_v1 }
 0x346   :  { %1025 = vmatpush1.bf16.msra.mxu1 %v6234_v25 }
 0x347   :  { %1026 = vmatprep.subr.bf16.mxu1 %v6046_v1 }
 0x34a   :  { %1027 = vmatpush1.bf16.msra.mxu1 %v6253_v34 }
 0x34b   :  { %5141 = vmatprep.subr.bf16.mxu1 %v6095_v0  ;;  %v5902_v0 = vld [vmem:[%s8007_s3 + $0x40] sm:$0xff]  }
 0x34c   :  { %5679 = vmatpush3.bf16.msra.mxu0 %v5902_v0 }
 0x34d   :  { %1043 = vmatmul.mubr.bf16.vlgmr.msra.gmra.mrb[24].mxu1 %v962_v2  ;;  %5680 = vmatprep.subr.bf16.mxu0 %v6048_v45 }
 0x34e   :  { %5142 = vmatpush3.bf16.msra.mxu1 %v6107_v3  ;;  %v5132_v3 = vpop.f32.mrb[24].mxu0 }
 0x34f   :  { %5143 = vmatprep.subr.bf16.mxu1 %v6113_v4  ;;  %v5133_v4 = vpop.f32.mrb[25].mxu0 }
 0x350   :  { %v5134_v5 = vadd.f32 %v5133_v4, %v5132_v3  ;;  %5681 = vmatpush3.bf16.msra.mxu0 %v5903_v8 }
 0x351   :  { %1186 = vmatprep.subr.bf16.mxu0 %v6046_v1 }
 0x352   :  { %5144 = vmatpush3.bf16.msra.mxu1 %v6126_v6  ;;  %v5135_v6 = vpop.f32.mrb[26].mxu0  ;;  %v1005_v28 = vadd.f32 %v5134_v5, %v6337_v53 }
 0x353   :  { %5145 = vmatprep.subr.bf16.mxu1 %v6131_v7  ;;  %v5136_v7 = vpop.f32.mrb[27].mxu0 }
 0x356   :  { %5146 = vmatpush3.bf16.msra.mxu1 %v6144_v9  ;;  %v4814_v9 = vld.sshfl [vmem:[%s8004_s0 + $0x14] sm:$0x33 pattern:$0x75316420] }
 0x357   :  { %5147 = vmatprep.subr.bf16.mxu1 %v6150_v10  ;;  %v1123_v10 = vcombine.high %v4814_v9, %v4814_v9 }
 0x359   :  { %v1137_v11 = vrot.slane %v1123_v10, %v6248_v33  ;;  %v6668_v10 = vld [vmem:[%s8005_s1 + $0xa8] sm:$0xff]  }
 0x35a   :  { %5148 = vmatpush3.bf16.msra.mxu1 %v6163_v12  ;;  %v1130_v12 = vrot.slane %v4814_v9, %v6248_v33  ;;  %v6661_v9 = vld [vmem:[%s8005_s1 + $0xa0] sm:$0xff]  }
 0x35b   :  { %5149 = vmatprep.subr.bf16.mxu1 %v6169_v13  ;;  %1178 = vmatprep.mubr.bf16.mxu1 %v1137_v11  ;;  %v1139_v38 = vcombine.high %v1137_v11, %v1137_v11  ;;  %v6675_v11 = vld [vmem:[%s8005_s1 + $0xb0] sm:$0xff]  }
 0x35c   :  { %v1138_v44 = vcombine.high %v1130_v12, %v1130_v12 }
 0x35e   :  { %5150 = vmatpush3.bf16.msra.mxu1 %v6182_v15 }
 0x35f   :  { %5151 = vmatprep.subr.bf16.mxu1 %v6188_v16 }
 0x362   :  { %5152 = vmatpush3.bf16.msra.mxu1 %v6199_v18 }
 0x363   :  { %5153 = vmatprep.subr.bf16.mxu1 %v6206_v19 }
 0x366   :  { %5154 = vmatpush3.bf16.msra.mxu1 %v6217_v22 }
 0x367   :  { %5155 = vmatprep.subr.bf16.mxu1 %v6223_v23 }
 0x36a   :  { %5156 = vmatpush3.bf16.msra.mxu1 %v6239_v29 }
 0x36b   :  { %5686 = vmatprep.subr.bf16.mxu1 %v6048_v45 }
 0x36d   :  { %1179 = vmatmul.mubr.bf16.vlgmr.msra.gmra.mrb[28].mxu1 %v1130_v12  ;;  %v6682_v12 = vld [vmem:[%s8005_s1 + $0xb8] sm:$0xff]  }
 0x36e   :  { %5690 = vmatprep.mubr.msk.bf16.mxu1 %vm6049_vm1, %v6048_v45  ;;  %5687 = vmatpush3.bf16.msra.mxu1 %v5904_v54 }
 0x36f   :  { %5688 = vmatprep.subr.bf16.mxu1 %v6048_v45 }
 0x3fc   :  { %v930_v13 = vpop.f32.mrb[20].mxu1 }
 0x3fd   :  { %v6510_v15 = vadd.f32 %v930_v13, %v6455_v52  ;;  %v5676_v16 = vpop.f32.mrb[21].mxu1  ;;  %v6621_v52 = vld [vmem:[%s8005_s1 + $0x28] sm:$0xff]  }
 0x3fe   :  { %v933_v18 = vpop.f32.mrb[22].mxu1  ;;  %v6707_v16 = vld [vmem:[%s8005_s1 + $0x70] sm:$0xff]  }
 0x3ff   :  { %v5677_v24 = vpop.f32.mrb[23].mxu1  ;;  %v6713_v18 = vld [vmem:[%s8005_s1 + $0x30] sm:$0xff]  }
 0x400   :  { %v6719_v24 = vld [vmem:[%s8005_s1 + $0x78] sm:$0xff]  }
 0x420   :  { %v1044_v30 = vpop.f32.mrb[24].mxu1 }
 0x421   :  { %v1045_v31 = vadd.f32 %v1044_v30, %v1005_v28  ;;  %v1046_v32 = vpop.f32.mrb[25].mxu1  ;;  %v6725_v28 = vld [vmem:[%s8005_s1 + $0x38] sm:$0xff]   ;;  %v5906_v30 = vld [vmem:[%s8007_s3 + $0x60] sm:$0xff]  }
 0x422   :  { %v1047_v35 = vpop.f32.mrb[26].mxu1 }
 0x423   :  { %v1050_v36 = vmax.f32 %v1045_v31, 0.0  ;;  %v1048_v37 = vpop.f32.mrb[27].mxu1 }
 0x425   :  { %v1051_v39 = vpack.c.bf16 %v1050_v36, %v1050_v36 }
 0x427   :  { %5683 = vmatmul.mubr.msk.bf16.vlgmr.msra.gmra.mrb[28].mxu0 %vm486_vm2, %v1051_v39  ;;  %v4834_v39 = vld.sshfl [vmem:[%s8004_s0 + $0x1c] sm:$0x33 pattern:$0x75316420] }
 0x428   :  { %1187 = vmatpush1.bf16.msra.mxu0 %v6517_v40  ;;  %4815 = vmatprep.mubr.msk.bf16.mxu0 %vm264_vm0, %v1139_v38  ;;  %v5907_v38 = vld [vmem:[%s8007_s3 + $0x68] sm:$0xff]  }
 0x429   :  { %1188 = vmatprep.subr.bf16.mxu0 %v6046_v1 }
 0x42c   :  { %1189 = vmatpush1.bf16.msra.mxu0 %v6525_v41 }
 0x42d   :  { %1190 = vmatprep.subr.bf16.mxu0 %v6046_v1 }
 0x430   :  { %1191 = vmatpush1.bf16.msra.mxu0 %v6532_v42 }
 0x431   :  { %1192 = vmatprep.subr.bf16.mxu0 %v6046_v1 }
 0x434   :  { %1193 = vmatpush1.bf16.msra.mxu0 %v6539_v43 }
 0x435   :  { %1194 = vmatprep.subr.bf16.mxu0 %v6046_v1 }
 0x438   :  { %1195 = vmatpush1.bf16.msra.mxu0 %v6175_v14  ;;  %v6555_v14 = vld [vmem:[%s8005_s1 + $0x40] sm:$0xff]  }
 0x439   :  { %1196 = vmatprep.subr.bf16.mxu0 %v6046_v1 }
 0x43c   :  { %1197 = vmatpush1.bf16.msra.mxu0 %v6193_v17  ;;  %v6561_v17 = vld [vmem:[%s8005_s1] sm:$0xff]  }
 0x43d   :  { %1198 = vmatprep.subr.bf16.mxu0 %v6046_v1 }
 0x440   :  { %1199 = vmatpush1.bf16.msra.mxu0 %v6212_v20  ;;  %v6567_v20 = vld [vmem:[%s8005_s1 + $0x48] sm:$0xff]   ;;  %v5157_v55 = vpop.f32.mrb[28].mxu1 }
 0x441   :  { %1200 = vmatprep.subr.bf16.mxu0 %v6046_v1  ;;  %v5158_v56 = vpop.f32.mrb[29].mxu1 }
 0x442   :  { %v5159_v57 = vadd.f32 %v5158_v56, %v5157_v55  ;;  %v5160_v58 = vpop.f32.mrb[30].mxu1  ;;  %v1482_v55 = vrot.slane %v4834_v39, %v6248_v33 }
 0x444   :  { %1201 = vmatpush1.bf16.msra.mxu0 %v6234_v25  ;;  %v6573_v25 = vld [vmem:[%s8005_s1 + $0x8] sm:$0xff]   ;;  %v1181_v27 = vadd.f32 %v5159_v57, %v6337_v53 }
 0x445   :  { %1202 = vmatprep.subr.bf16.mxu0 %v6046_v1 }
 0x448   :  { %1203 = vmatpush1.bf16.msra.mxu0 %v6253_v34  ;;  %v6579_v34 = vld [vmem:[%s8005_s1 + $0x50] sm:$0xff]  }
 0x449   :  { %5166 = vmatprep.subr.bf16.mxu0 %v6555_v14 }
 0x44b   :  { %1219 = vmatmul.mubr.bf16.vlgmr.msra.gmra.mrb[32].mxu0 %v1138_v44  ;;  %v1475_v44 = vcombine.high %v4834_v39, %v4834_v39 }
 0x44c   :  { %5167 = vmatpush3.bf16.msra.mxu0 %v6561_v17 }
 0x44d   :  { %5168 = vmatprep.subr.bf16.mxu0 %v6567_v20  ;;  %v1489_v54 = vrot.slane %v1475_v44, %v6248_v33 }
 0x450   :  { %5169 = vmatpush3.bf16.msra.mxu0 %v6573_v25 }
 0x451   :  { %5170 = vmatprep.subr.bf16.mxu0 %v6579_v34 }
 0x454   :  { %5171 = vmatpush3.bf16.msra.mxu0 %v6585_v46 }
 0x455   :  { %5172 = vmatprep.subr.bf16.mxu0 %v6591_v47 }
 0x458   :  { %5173 = vmatpush3.bf16.msra.mxu0 %v6597_v48 }
 0x459   :  { %5174 = vmatprep.subr.bf16.mxu0 %v6603_v49 }
 0x45c   :  { %5175 = vmatpush3.bf16.msra.mxu0 %v6609_v50 }
 0x45d   :  { %5176 = vmatprep.subr.bf16.mxu0 %v6615_v51 }
 0x460   :  { %5177 = vmatpush3.bf16.msra.mxu0 %v6621_v52 }
 0x461   :  { %5178 = vmatprep.subr.bf16.mxu0 %v6206_v19  ;;  %v5161_v19 = vpop.f32.mrb[31].mxu1 }
 0x464   :  { %5179 = vmatpush3.bf16.msra.mxu0 %v6217_v22  ;;  %v5905_v22 = vld [vmem:[%s8007_s3 + $0x58] sm:$0xff]  }
 0x465   :  { %5180 = vmatprep.subr.bf16.mxu0 %v6223_v23  ;;  %5689 = vmatpush3.bf16.msra.mxu1 %v5905_v22  ;;  %v4824_v23 = vld.sshfl [vmem:[%s8004_s0 + $0x18] sm:$0x33 pattern:$0x75316420] }
 0x466   :  { %1362 = vmatprep.subr.bf16.mxu1 %v6046_v1  ;;  %v1306_v60 = vrot.slane %v4824_v23, %v6248_v33 }
 0x468   :  { %5181 = vmatpush3.bf16.msra.mxu0 %v6239_v29  ;;  %v1299_v29 = vcombine.high %v4824_v23, %v4824_v23  ;;  %v1314_v13 = vcombine.high %v1306_v60, %v1306_v60 }
 0x469   :  { %5694 = vmatprep.subr.bf16.mxu0 %v6048_v45 }
 0x46a   :  { %v1313_v59 = vrot.slane %v1299_v29, %v6248_v33 }
 0x46c   :  { %1354 = vmatprep.mubr.bf16.mxu0 %v1313_v59  ;;  %v1315_v7 = vcombine.high %v1313_v59, %v1313_v59 }
 0x46d   :  { %1355 = vmatmul.mubr.bf16.vlgmr.msra.gmra.mrb[36].mxu0 %v1306_v60 }
 0x46e   :  { %5698 = vmatprep.mubr.msk.bf16.mxu0 %vm6049_vm1, %v6048_v45  ;;  %5695 = vmatpush3.bf16.msra.mxu0 %v5906_v30 }
 0x46f   :  { %5696 = vmatprep.subr.bf16.mxu0 %v6048_v45 }
 0x472   :  { %5697 = vmatpush3.bf16.msra.mxu0 %v5907_v38 }
 0x473   :  { %1538 = vmatprep.subr.bf16.mxu0 %v6046_v1 }
 0x4fa   :  { %v1106_v61 = vpop.f32.mrb[28].mxu0 }
 0x4fb   :  { %v6645_v62 = vadd.f32 %v1106_v61, %v6510_v15  ;;  %v5684_v63 = vpop.f32.mrb[29].mxu0  ;;  %v6689_v15 = vld [vmem:[%s8005_s1 + $0xc0] sm:$0xff]  }
 0x4fc   :  { %v1109_v21 = vpop.f32.mrb[30].mxu0 }
 0x4fd   :  { %v5685_v26 = vpop.f32.mrb[31].mxu0 }
 0x4fe   :  { %v1491_v26 = vcombine.high %v1489_v54, %v1489_v54 }
 0x51e   :  { %v1220_v2 = vpop.f32.mrb[32].mxu0 }
 0x51f   :  { %v1221_v0 = vadd.f32 %v1220_v2, %v1181_v27  ;;  %v1222_v3 = vpop.f32.mrb[33].mxu0  ;;  %v5908_v2 = vld [vmem:[%s8007_s3 + $0x70] sm:$0xff]  }
 0x520   :  { %v1223_v4 = vpop.f32.mrb[34].mxu0 }
 0x521   :  { %v1226_v5 = vmax.f32 %v1221_v0, 0.0  ;;  %v1224_v6 = vpop.f32.mrb[35].mxu0 }
 0x523   :  { %v1227_v8 = vpack.c.bf16 %v1226_v5, %v1226_v5 }
 0x525   :  { %5691 = vmatmul.mubr.msk.bf16.vlgmr.msra.gmra.mrb[32].mxu1 %vm486_vm2, %v1227_v8  ;;  %v4844_v8 = vld.sshfl [vmem:[%s8004_s0 + $0x20] sm:$0x33 pattern:$0x75316420] }
 0x526   :  { %1363 = vmatpush1.bf16.msra.mxu1 %v6517_v40  ;;  %4825 = vmatprep.mubr.msk.bf16.mxu1 %vm264_vm0, %v1315_v7  ;;  %v5909_v7 = vld [vmem:[%s8007_s3 + $0x78] sm:$0xff]  }
 0x527   :  { %1364 = vmatprep.subr.bf16.mxu1 %v6046_v1 }
 0x52a   :  { %1365 = vmatpush1.bf16.msra.mxu1 %v6525_v41 }
 0x52b   :  { %1366 = vmatprep.subr.bf16.mxu1 %v6046_v1 }
 0x52e   :  { %1367 = vmatpush1.bf16.msra.mxu1 %v6532_v42 }
 0x52f   :  { %1368 = vmatprep.subr.bf16.mxu1 %v6046_v1 }
 0x532   :  { %1369 = vmatpush1.bf16.msra.mxu1 %v6539_v43 }
 0x533   :  { %1370 = vmatprep.subr.bf16.mxu1 %v6046_v1 }
 0x536   :  { %1371 = vmatpush1.bf16.msra.mxu1 %v6661_v9 }
 0x537   :  { %1372 = vmatprep.subr.bf16.mxu1 %v6046_v1 }
 0x53a   :  { %1373 = vmatpush1.bf16.msra.mxu1 %v6668_v10 }
 0x53b   :  { %1374 = vmatprep.subr.bf16.mxu1 %v6046_v1 }
 0x53e   :  { %1375 = vmatpush1.bf16.msra.mxu1 %v6675_v11 }
 0x53f   :  { %1376 = vmatprep.subr.bf16.mxu1 %v6046_v1 }
 0x540   :  { %v5182_v31 = vpop.f32.mrb[36].mxu0 }
 0x541   :  { %v5183_v32 = vpop.f32.mrb[37].mxu0 }
 0x542   :  { %1377 = vmatpush1.bf16.msra.mxu1 %v6682_v12  ;;  %v5184_v35 = vadd.f32 %v5183_v32, %v5182_v31  ;;  %v5185_v36 = vpop.f32.mrb[38].mxu0  ;;  %v1658_v31 = vrot.slane %v4844_v8, %v6248_v33 }
 0x543   :  { %1378 = vmatprep.subr.bf16.mxu1 %v6046_v1  ;;  %v5186_v37 = vpop.f32.mrb[39].mxu0 }
 0x544   :  { %v1357_v23 = vadd.f32 %v5184_v35, %v6337_v53 }
 0x546   :  { %1379 = vmatpush1.bf16.msra.mxu1 %v6689_v15 }
 0x547   :  { %5191 = vmatprep.subr.bf16.mxu1 %v6555_v14 }
 0x549   :  { %1395 = vmatmul.mubr.bf16.vlgmr.msra.gmra.mrb[36].mxu1 %v1314_v13  ;;  %v1651_v13 = vcombine.high %v4844_v8, %v4844_v8 }
 0x54a   :  { %5192 = vmatpush3.bf16.msra.mxu1 %v6561_v17  ;;  %1530 = vmatprep.mubr.bf16.mxu1 %v1489_v54 }
 0x54b   :  { %5193 = vmatprep.subr.bf16.mxu1 %v6567_v20  ;;  %v1665_v30 = vrot.slane %v1651_v13, %v6248_v33 }
 0x54e   :  { %5194 = vmatpush3.bf16.msra.mxu1 %v6573_v25 }
 0x54f   :  { %5195 = vmatprep.subr.bf16.mxu1 %v6579_v34 }
 0x552   :  { %5196 = vmatpush3.bf16.msra.mxu1 %v6585_v46 }
 0x553   :  { %5197 = vmatprep.subr.bf16.mxu1 %v6591_v47 }
 0x556   :  { %5198 = vmatpush3.bf16.msra.mxu1 %v6597_v48 }
 0x557   :  { %5199 = vmatprep.subr.bf16.mxu1 %v6603_v49 }
 0x55a   :  { %5200 = vmatpush3.bf16.msra.mxu1 %v6609_v50 }
 0x55b   :  { %5201 = vmatprep.subr.bf16.mxu1 %v6615_v51 }
 0x55e   :  { %5202 = vmatpush3.bf16.msra.mxu1 %v6621_v52 }
 0x55f   :  { %5203 = vmatprep.subr.bf16.mxu1 %v6707_v16 }
 0x562   :  { %5204 = vmatpush3.bf16.msra.mxu1 %v6713_v18 }
 0x563   :  { %5205 = vmatprep.subr.bf16.mxu1 %v6719_v24 }
 0x566   :  { %5206 = vmatpush3.bf16.msra.mxu1 %v6725_v28 }
 0x567   :  { %5702 = vmatprep.subr.bf16.mxu1 %v6048_v45 }
 0x569   :  { %1531 = vmatmul.mubr.bf16.vlgmr.msra.gmra.mrb[40].mxu1 %v1482_v55 }
 0x56a   :  { %5706 = vmatprep.mubr.msk.bf16.mxu1 %vm6049_vm1, %v6048_v45  ;;  %5703 = vmatpush3.bf16.msra.mxu1 %v5908_v2 }
 0x56b   :  { %5704 = vmatprep.subr.bf16.mxu1 %v6048_v45 }
 0x56e   :  { %5705 = vmatpush3.bf16.msra.mxu1 %v5909_v7  ;;  %v6860_v7 = vld [vmem:[%s8006_s2] ss:$0 sm:$0xff] }
 0x56f   :  { %1714 = vmatprep.subr.bf16.mxu1 %v6046_v1 }
 0x5f8   :  { %v1282_v56 = vpop.f32.mrb[32].mxu1 }
 0x5f9   :  { %v6745_v57 = vadd.f32 %v1282_v56, %v6645_v62  ;;  %v5692_v58 = vpop.f32.mrb[33].mxu1  ;;  %v1490_v62 = vcombine.high %v1482_v55, %v1482_v55 }
 0x5fa   :  { %v1285_v19 = vpop.f32.mrb[34].mxu1 }
 0x5fb   :  { %v5693_v22 = vpop.f32.mrb[35].mxu1 }
 0x5fc   :  { %v1667_v22 = vcombine.high %v1665_v30, %v1665_v30 }
 0x61c   :  { %v1396_v29 = vpop.f32.mrb[36].mxu1 }
 0x61d   :  { %v1397_v59 = vadd.f32 %v1396_v29, %v1357_v23  ;;  %v1398_v60 = vpop.f32.mrb[37].mxu1 }
 0x61e   :  { %v1399_v61 = vpop.f32.mrb[38].mxu1 }
 0x61f   :  { %v1402_v63 = vmax.f32 %v1397_v59, 0.0  ;;  %v1400_v21 = vpop.f32.mrb[39].mxu1 }
 0x620   :  { %v5911_v21 = vld [vmem:[%s8007_s3 + $0x88] sm:$0xff]  }
 0x621   :  { %v1403_v27 = vpack.c.bf16 %v1402_v63, %v1402_v63 }
 0x623   :  { %5699 = vmatmul.mubr.msk.bf16.vlgmr.msra.gmra.mrb[40].mxu0 %vm486_vm2, %v1403_v27 }
 0x624   :  { %1539 = vmatpush1.bf16.msra.mxu0 %v6517_v40  ;;  %4835 = vmatprep.mubr.msk.bf16.mxu0 %vm264_vm0, %v1491_v26  ;;  %v4854_v26 = vld.sshfl [vmem:[%s8004_s0 + $0x24] sm:$0x33 pattern:$0x75316420] }
 0x625   :  { %1540 = vmatprep.subr.bf16.mxu0 %v6046_v1  ;;  %v1827_v27 = vcombine.high %v4854_v26, %v4854_v26  ;;  %v1834_v2 = vrot.slane %v4854_v26, %v6248_v33 }
 0x628   :  { %1541 = vmatpush1.bf16.msra.mxu0 %v6525_v41 }
 0x629   :  { %1542 = vmatprep.subr.bf16.mxu0 %v6046_v1 }
 0x62c   :  { %1543 = vmatpush1.bf16.msra.mxu0 %v6532_v42 }
 0x62d   :  { %1544 = vmatprep.subr.bf16.mxu0 %v6046_v1 }
 0x630   :  { %1545 = vmatpush1.bf16.msra.mxu0 %v6539_v43 }
 0x631   :  { %1546 = vmatprep.subr.bf16.mxu0 %v6046_v1 }
 0x634   :  { %1547 = vmatpush1.bf16.msra.mxu0 %v6661_v9 }
 0x635   :  { %1548 = vmatprep.subr.bf16.mxu0 %v6046_v1 }
 0x638   :  { %1549 = vmatpush1.bf16.msra.mxu0 %v6668_v10 }
 0x639   :  { %1550 = vmatprep.subr.bf16.mxu0 %v6046_v1 }
 0x63c   :  { %1551 = vmatpush1.bf16.msra.mxu0 %v6675_v11  ;;  %v5207_v0 = vpop.f32.mrb[40].mxu1 }
 0x63d   :  { %1552 = vmatprep.subr.bf16.mxu0 %v6046_v1  ;;  %v5208_v3 = vpop.f32.mrb[41].mxu1 }
 0x63e   :  { %v5209_v4 = vadd.f32 %v5208_v3, %v5207_v0  ;;  %v5210_v5 = vpop.f32.mrb[42].mxu1 }
 0x63f   :  { %v5211_v6 = vpop.f32.mrb[43].mxu1 }
 0x640   :  { %1553 = vmatpush1.bf16.msra.mxu0 %v6682_v12  ;;  %v1533_v39 = vadd.f32 %v5209_v4, %v6337_v53  ;;  %v1666_v53 = vcombine.high %v1658_v31, %v1658_v31 }
 0x641   :  { %1554 = vmatprep.subr.bf16.mxu0 %v6046_v1 }
 0x644   :  { %1555 = vmatpush1.bf16.msra.mxu0 %v6689_v15 }
 0x645   :  { %5216 = vmatprep.subr.bf16.mxu0 %v6555_v14 }
 0x647   :  { %1571 = vmatmul.mubr.bf16.vlgmr.msra.gmra.mrb[44].mxu0 %v1490_v62  ;;  %v1841_v62 = vrot.slane %v1827_v27, %v6248_v33 }
 0x648   :  { %5217 = vmatpush3.bf16.msra.mxu0 %v6561_v17  ;;  %1706 = vmatprep.mubr.bf16.mxu0 %v1665_v30 }
 0x649   :  { %5218 = vmatprep.subr.bf16.mxu0 %v6567_v20 }
 0x64c   :  { %5219 = vmatpush3.bf16.msra.mxu0 %v6573_v25 }
 0x64d   :  { %5220 = vmatprep.subr.bf16.mxu0 %v6579_v34 }
 0x650   :  { %5221 = vmatpush3.bf16.msra.mxu0 %v6585_v46 }
 0x651   :  { %5222 = vmatprep.subr.bf16.mxu0 %v6591_v47 }
 0x654   :  { %5223 = vmatpush3.bf16.msra.mxu0 %v6597_v48 }
 0x655   :  { %5224 = vmatprep.subr.bf16.mxu0 %v6603_v49 }
 0x658   :  { %5225 = vmatpush3.bf16.msra.mxu0 %v6609_v50 }
 0x659   :  { %5226 = vmatprep.subr.bf16.mxu0 %v6615_v51 }
 0x65c   :  { %5227 = vmatpush3.bf16.msra.mxu0 %v6621_v52 }
 0x65d   :  { %5228 = vmatprep.subr.bf16.mxu0 %v6707_v16 }
 0x660   :  { %5229 = vmatpush3.bf16.msra.mxu0 %v6713_v18 }
 0x661   :  { %5230 = vmatprep.subr.bf16.mxu0 %v6719_v24 }
 0x664   :  { %5231 = vmatpush3.bf16.msra.mxu0 %v6725_v28 }
 0x665   :  { %5710 = vmatprep.subr.bf16.mxu0 %v6048_v45 }
 0x667   :  { %1707 = vmatmul.mubr.bf16.vlgmr.msra.gmra.mrb[48].mxu0 %v1658_v31 }
 0x668   :  { %5714 = vmatprep.mubr.msk.bf16.mxu0 %vm6049_vm1, %v6048_v45 }
 0x6f6   :  { %v1458_v32 = vpop.f32.mrb[40].mxu0 }
 0x6f7   :  { %v6800_v35 = vadd.f32 %v1458_v32, %v6745_v57  ;;  %v5700_v36 = vpop.f32.mrb[41].mxu0  ;;  %v5910_v57 = vld [vmem:[%s8007_s3 + $0x80] sm:$0xff]  }
 0x6f8   :  { %v1461_v37 = vpop.f32.mrb[42].mxu0  ;;  %5711 = vmatpush3.bf16.msra.mxu0 %v5910_v57 }
 0x6f9   :  { %v5701_v38 = vpop.f32.mrb[43].mxu0  ;;  %5712 = vmatprep.subr.bf16.mxu0 %v6048_v45 }
 0x6fa   :  { %v1843_v38 = vcombine.high %v1841_v62, %v1841_v62 }
 0x6fc   :  { %5713 = vmatpush3.bf16.msra.mxu0 %v5911_v21 }
 0x6fd   :  { %1890 = vmatprep.subr.bf16.mxu0 %v6046_v1 }
 0x71a   :  { %v1572_v44 = vpop.f32.mrb[44].mxu0 }
 0x71b   :  { %v1573_v54 = vadd.f32 %v1572_v44, %v1533_v39  ;;  %v1574_v55 = vpop.f32.mrb[45].mxu0  ;;  %v5912_v44 = vld [vmem:[%s8007_s3 + $0x90] sm:$0xff]  }
 0x71c   :  { %v1575_v56 = vpop.f32.mrb[46].mxu0 }
 0x71d   :  { %v1578_v58 = vmax.f32 %v1573_v54, 0.0  ;;  %v1576_v19 = vpop.f32.mrb[47].mxu0 }
 0x71f   :  { %v1579_v23 = vpack.c.bf16 %v1578_v58, %v1578_v58 }
 0x721   :  { %5707 = vmatmul.mubr.msk.bf16.vlgmr.msra.gmra.mrb[44].mxu1 %vm486_vm2, %v1579_v23  ;;  %v4864_v23 = vld.sshfl [vmem:[%s8004_s0 + $0x28] sm:$0x33 pattern:$0x75316420] }
 0x722   :  { %1715 = vmatpush1.bf16.msra.mxu1 %v6517_v40  ;;  %4845 = vmatprep.mubr.msk.bf16.mxu1 %vm264_vm0, %v1667_v22  ;;  %v5913_v22 = vld [vmem:[%s8007_s3 + $0x98] sm:$0xff]  }
 0x723   :  { %1716 = vmatprep.subr.bf16.mxu1 %v6046_v1 }
 0x726   :  { %1717 = vmatpush1.bf16.msra.mxu1 %v6525_v41 }
 0x727   :  { %1718 = vmatprep.subr.bf16.mxu1 %v6046_v1 }
 0x72a   :  { %1719 = vmatpush1.bf16.msra.mxu1 %v6532_v42 }
 0x72b   :  { %1720 = vmatprep.subr.bf16.mxu1 %v6046_v1 }
 0x72e   :  { %1721 = vmatpush1.bf16.msra.mxu1 %v6539_v43 }
 0x72f   :  { %1722 = vmatprep.subr.bf16.mxu1 %v6046_v1 }
 0x732   :  { %1723 = vmatpush1.bf16.msra.mxu1 %v6661_v9 }
 0x733   :  { %1724 = vmatprep.subr.bf16.mxu1 %v6046_v1 }
 0x736   :  { %1725 = vmatpush1.bf16.msra.mxu1 %v6668_v10 }
 0x737   :  { %1726 = vmatprep.subr.bf16.mxu1 %v6046_v1 }
 0x73a   :  { %1727 = vmatpush1.bf16.msra.mxu1 %v6675_v11  ;;  %v5232_v29 = vpop.f32.mrb[48].mxu0 }
 0x73b   :  { %1728 = vmatprep.subr.bf16.mxu1 %v6046_v1  ;;  %v5233_v59 = vpop.f32.mrb[49].mxu0 }
 0x73c   :  { %v5234_v60 = vadd.f32 %v5233_v59, %v5232_v29  ;;  %v5235_v61 = vpop.f32.mrb[50].mxu0  ;;  %v2010_v29 = vrot.slane %v4864_v23, %v6248_v33 }
 0x73d   :  { %v5236_v63 = vpop.f32.mrb[51].mxu0 }
 0x73e   :  { %1729 = vmatpush1.bf16.msra.mxu1 %v6682_v12  ;;  %v1709_v8 = vadd.f32 %v6860_v7, %v5234_v60 }
 0x73f   :  { %1730 = vmatprep.subr.bf16.mxu1 %v6046_v1 }
 0x742   :  { %1731 = vmatpush1.bf16.msra.mxu1 %v6689_v15 }
 0x743   :  { %5241 = vmatprep.subr.bf16.mxu1 %v6555_v14 }
 0x745   :  { %1747 = vmatmul.mubr.bf16.vlgmr.msra.gmra.mrb[48].mxu1 %v1666_v53  ;;  %v2003_v53 = vcombine.high %v4864_v23, %v4864_v23 }
 0x746   :  { %5242 = vmatpush3.bf16.msra.mxu1 %v6561_v17  ;;  %1882 = vmatprep.mubr.bf16.mxu1 %v1841_v62 }
 0x747   :  { %5243 = vmatprep.subr.bf16.mxu1 %v6567_v20  ;;  %v2017_v57 = vrot.slane %v2003_v53, %v6248_v33 }
 0x74a   :  { %5244 = vmatpush3.bf16.msra.mxu1 %v6573_v25 }
 0x74b   :  { %5245 = vmatprep.subr.bf16.mxu1 %v6579_v34 }
 0x74e   :  { %5246 = vmatpush3.bf16.msra.mxu1 %v6585_v46 }
 0x74f   :  { %5247 = vmatprep.subr.bf16.mxu1 %v6591_v47 }
 0x752   :  { %5248 = vmatpush3.bf16.msra.mxu1 %v6597_v48 }
 0x753   :  { %5249 = vmatprep.subr.bf16.mxu1 %v6603_v49 }
 0x756   :  { %5250 = vmatpush3.bf16.msra.mxu1 %v6609_v50 }
 0x757   :  { %5251 = vmatprep.subr.bf16.mxu1 %v6615_v51 }
 0x75a   :  { %5252 = vmatpush3.bf16.msra.mxu1 %v6621_v52 }
 0x75b   :  { %5253 = vmatprep.subr.bf16.mxu1 %v6707_v16 }
 0x75e   :  { %5254 = vmatpush3.bf16.msra.mxu1 %v6713_v18 }
 0x75f   :  { %5255 = vmatprep.subr.bf16.mxu1 %v6719_v24 }
 0x762   :  { %5256 = vmatpush3.bf16.msra.mxu1 %v6725_v28 }
 0x763   :  { %5718 = vmatprep.subr.bf16.mxu1 %v6048_v45 }
 0x765   :  { %1883 = vmatmul.mubr.bf16.vlgmr.msra.gmra.mrb[52].mxu1 %v1834_v2 }
 0x766   :  { %5722 = vmatprep.mubr.msk.bf16.mxu1 %vm6049_vm1, %v6048_v45  ;;  %5719 = vmatpush3.bf16.msra.mxu1 %v5912_v44 }
 0x767   :  { %5720 = vmatprep.subr.bf16.mxu1 %v6048_v45 }
 0x76a   :  { %5721 = vmatpush3.bf16.msra.mxu1 %v5913_v22 }
 0x76b   :  { %2066 = vmatprep.subr.bf16.mxu1 %v6046_v1 }
 0x7f4   :  { %v1634_v0 = vpop.f32.mrb[44].mxu1 }
 0x7f5   :  { %v6855_v3 = vadd.f32 %v1634_v0, %v6800_v35  ;;  %v5708_v4 = vpop.f32.mrb[45].mxu1  ;;  %v1842_v35 = vcombine.high %v1834_v2, %v1834_v2 }
 0x7f6   :  { %v1637_v5 = vpop.f32.mrb[46].mxu1 }
 0x7f7   :  { %v5709_v6 = vpop.f32.mrb[47].mxu1 }
 0x7f8   :  { %v2019_v6 = vcombine.high %v2017_v57, %v2017_v57 }
 0x818   :  { %v1748_v13 = vpop.f32.mrb[48].mxu1 }
 0x819   :  { %v1749_v30 = vadd.f32 %v1748_v13, %v1709_v8  ;;  %v1750_v31 = vpop.f32.mrb[49].mxu1  ;;  %v5914_v13 = vld [vmem:[%s8007_s3 + $0xa0] sm:$0xff]  }
 0x81a   :  { %v1751_v32 = vpop.f32.mrb[50].mxu1 }
 0x81b   :  { %v1754_v36 = vmax.f32 %v1749_v30, 0.0  ;;  %v1752_v37 = vpop.f32.mrb[51].mxu1 }
 0x81d   :  { %v1755_v39 = vpack.c.bf16 %v1754_v36, %v1754_v36 }
 0x81f   :  { %5715 = vmatmul.mubr.msk.bf16.vlgmr.msra.gmra.mrb[52].mxu0 %vm486_vm2, %v1755_v39  ;;  %v4874_v39 = vld.sshfl [vmem:[%s8004_s0 + $0x2c] sm:$0x33 pattern:$0x75316420] }
 0x820   :  { %1891 = vmatpush1.bf16.msra.mxu0 %v6517_v40  ;;  %4855 = vmatprep.mubr.msk.bf16.mxu0 %vm264_vm0, %v1843_v38  ;;  %v5915_v38 = vld [vmem:[%s8007_s3 + $0xa8] sm:$0xff]  }
 0x821   :  { %1892 = vmatprep.subr.bf16.mxu0 %v6046_v1 }
 0x824   :  { %1893 = vmatpush1.bf16.msra.mxu0 %v6525_v41 }
 0x825   :  { %1894 = vmatprep.subr.bf16.mxu0 %v6046_v1 }
 0x828   :  { %1895 = vmatpush1.bf16.msra.mxu0 %v6532_v42 }
 0x829   :  { %1896 = vmatprep.subr.bf16.mxu0 %v6046_v1 }
 0x82c   :  { %1897 = vmatpush1.bf16.msra.mxu0 %v6539_v43 }
 0x82d   :  { %1898 = vmatprep.subr.bf16.mxu0 %v6046_v1 }
 0x830   :  { %1899 = vmatpush1.bf16.msra.mxu0 %v6661_v9 }
 0x831   :  { %1900 = vmatprep.subr.bf16.mxu0 %v6046_v1 }
 0x834   :  { %1901 = vmatpush1.bf16.msra.mxu0 %v6668_v10 }
 0x835   :  { %1902 = vmatprep.subr.bf16.mxu0 %v6046_v1 }
 0x838   :  { %1903 = vmatpush1.bf16.msra.mxu0 %v6675_v11  ;;  %v5257_v54 = vpop.f32.mrb[52].mxu1 }
 0x839   :  { %1904 = vmatprep.subr.bf16.mxu0 %v6046_v1  ;;  %v5258_v55 = vpop.f32.mrb[53].mxu1 }
 0x83a   :  { %v5259_v56 = vadd.f32 %v5258_v55, %v5257_v54  ;;  %v5260_v58 = vpop.f32.mrb[54].mxu1  ;;  %v2186_v54 = vrot.slane %v4874_v39, %v6248_v33 }
 0x83b   :  { %v5261_v19 = vpop.f32.mrb[55].mxu1 }
 0x83c   :  { %1905 = vmatpush1.bf16.msra.mxu0 %v6682_v12  ;;  %v1885_v26 = vadd.f32 %v6860_v7, %v5259_v56 }
 0x83d   :  { %1906 = vmatprep.subr.bf16.mxu0 %v6046_v1 }
 0x840   :  { %1907 = vmatpush1.bf16.msra.mxu0 %v6689_v15 }
 0x841   :  { %5266 = vmatprep.subr.bf16.mxu0 %v6555_v14 }
 0x843   :  { %1923 = vmatmul.mubr.bf16.vlgmr.msra.gmra.mrb[56].mxu0 %v1842_v35  ;;  %v2179_v35 = vcombine.high %v4874_v39, %v4874_v39 }
 0x844   :  { %5267 = vmatpush3.bf16.msra.mxu0 %v6561_v17  ;;  %2058 = vmatprep.mubr.bf16.mxu0 %v2017_v57 }
 0x845   :  { %5268 = vmatprep.subr.bf16.mxu0 %v6567_v20  ;;  %v2193_v44 = vrot.slane %v2179_v35, %v6248_v33 }
 0x848   :  { %5269 = vmatpush3.bf16.msra.mxu0 %v6573_v25 }
 0x849   :  { %5270 = vmatprep.subr.bf16.mxu0 %v6579_v34 }
 0x84c   :  { %5271 = vmatpush3.bf16.msra.mxu0 %v6585_v46 }
 0x84d   :  { %5272 = vmatprep.subr.bf16.mxu0 %v6591_v47 }
 0x850   :  { %5273 = vmatpush3.bf16.msra.mxu0 %v6597_v48 }
 0x851   :  { %5274 = vmatprep.subr.bf16.mxu0 %v6603_v49 }
 0x854   :  { %5275 = vmatpush3.bf16.msra.mxu0 %v6609_v50 }
 0x855   :  { %5276 = vmatprep.subr.bf16.mxu0 %v6615_v51 }
 0x858   :  { %5277 = vmatpush3.bf16.msra.mxu0 %v6621_v52 }
 0x859   :  { %5278 = vmatprep.subr.bf16.mxu0 %v6707_v16 }
 0x85c   :  { %5279 = vmatpush3.bf16.msra.mxu0 %v6713_v18 }
 0x85d   :  { %5280 = vmatprep.subr.bf16.mxu0 %v6719_v24 }
 0x860   :  { %5281 = vmatpush3.bf16.msra.mxu0 %v6725_v28 }
 0x861   :  { %5726 = vmatprep.subr.bf16.mxu0 %v6048_v45 }
 0x863   :  { %2059 = vmatmul.mubr.bf16.vlgmr.msra.gmra.mrb[60].mxu0 %v2010_v29 }
 0x864   :  { %5730 = vmatprep.mubr.msk.bf16.mxu0 %vm6049_vm1, %v6048_v45  ;;  %5727 = vmatpush3.bf16.msra.mxu0 %v5914_v13 }
 0x865   :  { %5728 = vmatprep.subr.bf16.mxu0 %v6048_v45 }
 0x868   :  { %5729 = vmatpush3.bf16.msra.mxu0 %v5915_v38 }
 0x869   :  { %2242 = vmatprep.subr.bf16.mxu0 %v6046_v1 }
 0x8f2   :  { %v1810_v59 = vpop.f32.mrb[52].mxu0 }
 0x8f3   :  { %v6915_v60 = vadd.f32 %v1810_v59, %v6855_v3  ;;  %v5716_v61 = vpop.f32.mrb[53].mxu0  ;;  %v2018_v3 = vcombine.high %v2010_v29, %v2010_v29 }
 0x8f4   :  { %v1813_v63 = vpop.f32.mrb[54].mxu0 }
 0x8f5   :  { %v5717_v21 = vpop.f32.mrb[55].mxu0 }
 0x8f6   :  { %v2195_v21 = vcombine.high %v2193_v44, %v2193_v44 }
 0x916   :  { %v1924_v27 = vpop.f32.mrb[56].mxu0 }
 0x917   :  { %v1925_v62 = vadd.f32 %v1924_v27, %v1885_v26  ;;  %v1926_v2 = vpop.f32.mrb[57].mxu0  ;;  %v5916_v27 = vld [vmem:[%s8007_s3 + $0xb0] sm:$0xff]  }
 0x918   :  { %v1927_v0 = vpop.f32.mrb[58].mxu0 }
 0x919   :  { %v1930_v4 = vmax.f32 %v1925_v62, 0.0  ;;  %v1928_v5 = vpop.f32.mrb[59].mxu0 }
 0x91b   :  { %v1931_v8 = vpack.c.bf16 %v1930_v4, %v1930_v4 }
 0x91d   :  { %5723 = vmatmul.mubr.msk.bf16.vlgmr.msra.gmra.mrb[56].mxu1 %vm486_vm2, %v1931_v8  ;;  %v4884_v8 = vld.sshfl [vmem:[%s8004_s0 + $0x30] sm:$0x33 pattern:$0x75316420] }
 0x91e   :  { %2067 = vmatpush1.bf16.msra.mxu1 %v6517_v40  ;;  %4865 = vmatprep.mubr.msk.bf16.mxu1 %vm264_vm0, %v2019_v6  ;;  %v5917_v6 = vld [vmem:[%s8007_s3 + $0xb8] sm:$0xff]  }
 0x91f   :  { %2068 = vmatprep.subr.bf16.mxu1 %v6046_v1 }
 0x922   :  { %2069 = vmatpush1.bf16.msra.mxu1 %v6525_v41 }
 0x923   :  { %2070 = vmatprep.subr.bf16.mxu1 %v6046_v1 }
 0x926   :  { %2071 = vmatpush1.bf16.msra.mxu1 %v6532_v42 }
 0x927   :  { %2072 = vmatprep.subr.bf16.mxu1 %v6046_v1 }
 0x92a   :  { %2073 = vmatpush1.bf16.msra.mxu1 %v6539_v43 }
 0x92b   :  { %2074 = vmatprep.subr.bf16.mxu1 %v6046_v1 }
 0x92e   :  { %2075 = vmatpush1.bf16.msra.mxu1 %v6661_v9 }
 0x92f   :  { %2076 = vmatprep.subr.bf16.mxu1 %v6046_v1 }
 0x932   :  { %2077 = vmatpush1.bf16.msra.mxu1 %v6668_v10 }
 0x933   :  { %2078 = vmatprep.subr.bf16.mxu1 %v6046_v1 }
 0x936   :  { %2079 = vmatpush1.bf16.msra.mxu1 %v6675_v11  ;;  %v5282_v30 = vpop.f32.mrb[60].mxu0 }
 0x937   :  { %2080 = vmatprep.subr.bf16.mxu1 %v6046_v1  ;;  %v5283_v31 = vpop.f32.mrb[61].mxu0 }
 0x938   :  { %v5284_v32 = vadd.f32 %v5283_v31, %v5282_v30  ;;  %v5285_v36 = vpop.f32.mrb[62].mxu0  ;;  %v2362_v30 = vrot.slane %v4884_v8, %v6248_v33 }
 0x939   :  { %v5286_v37 = vpop.f32.mrb[63].mxu0 }
 0x93a   :  { %2081 = vmatpush1.bf16.msra.mxu1 %v6682_v12  ;;  %v2061_v23 = vadd.f32 %v6860_v7, %v5284_v32 }
 0x93b   :  { %2082 = vmatprep.subr.bf16.mxu1 %v6046_v1 }
 0x93e   :  { %2083 = vmatpush1.bf16.msra.mxu1 %v6689_v15 }
 0x93f   :  { %5291 = vmatprep.subr.bf16.mxu1 %v6555_v14 }
 0x941   :  { %2099 = vmatmul.mubr.bf16.vlgmr.msra.gmra.mrb[60].mxu1 %v2018_v3  ;;  %v2355_v3 = vcombine.high %v4884_v8, %v4884_v8  ;;  %v7167_v8 = vld [vmem:[%s8005_s1 + $0x18] sm:$0xff]  }
 0x942   :  { %5292 = vmatpush3.bf16.msra.mxu1 %v6561_v17  ;;  %2234 = vmatprep.mubr.bf16.mxu1 %v2193_v44 }
 0x943   :  { %5293 = vmatprep.subr.bf16.mxu1 %v6567_v20  ;;  %v2369_v13 = vrot.slane %v2355_v3, %v6248_v33  ;;  %v7173_v3 = vld [vmem:[%s8005_s1 + $0x60] sm:$0xff]  }
 0x946   :  { %5294 = vmatpush3.bf16.msra.mxu1 %v6573_v25 }
 0x947   :  { %5295 = vmatprep.subr.bf16.mxu1 %v6579_v34 }
 0x94a   :  { %5296 = vmatpush3.bf16.msra.mxu1 %v6585_v46 }
 0x94b   :  { %5297 = vmatprep.subr.bf16.mxu1 %v6591_v47 }
 0x94e   :  { %5298 = vmatpush3.bf16.msra.mxu1 %v6597_v48 }
 0x94f   :  { %5299 = vmatprep.subr.bf16.mxu1 %v6603_v49 }
 0x952   :  { %5300 = vmatpush3.bf16.msra.mxu1 %v6609_v50 }
 0x953   :  { %5301 = vmatprep.subr.bf16.mxu1 %v6615_v51 }
 0x956   :  { %5302 = vmatpush3.bf16.msra.mxu1 %v6621_v52 }
 0x957   :  { %5303 = vmatprep.subr.bf16.mxu1 %v6707_v16 }
 0x95a   :  { %5304 = vmatpush3.bf16.msra.mxu1 %v6713_v18 }
 0x95b   :  { %5305 = vmatprep.subr.bf16.mxu1 %v6719_v24 }
 0x95e   :  { %5306 = vmatpush3.bf16.msra.mxu1 %v6725_v28 }
 0x95f   :  { %5734 = vmatprep.subr.bf16.mxu1 %v6048_v45 }
 0x961   :  { %2235 = vmatmul.mubr.bf16.vlgmr.msra.gmra.mrb[64].mxu1 %v2186_v54 }
 0x962   :  { %5738 = vmatprep.mubr.msk.bf16.mxu1 %vm6049_vm1, %v6048_v45  ;;  %5735 = vmatpush3.bf16.msra.mxu1 %v5916_v27  ;;  %v7087_v27 = vld [vmem:[%s8005_s1 + $0x80] sm:$0xff]  }
 0x963   :  { %5736 = vmatprep.subr.bf16.mxu1 %v6048_v45 }
 0x966   :  { %5737 = vmatpush3.bf16.msra.mxu1 %v5917_v6  ;;  %v7161_v6 = vld [vmem:[%s8005_s1 + $0x58] sm:$0xff]  }
 0x967   :  { %2418 = vmatprep.subr.bf16.mxu1 %v6046_v1 }
 0x9f0   :  { %v1986_v55 = vpop.f32.mrb[56].mxu1 }
 0x9f1   :  { %v6970_v56 = vadd.f32 %v1986_v55, %v6915_v60  ;;  %v5724_v58 = vpop.f32.mrb[57].mxu1  ;;  %v2194_v60 = vcombine.high %v2186_v54, %v2186_v54 }
 0x9f2   :  { %v1989_v19 = vpop.f32.mrb[58].mxu1 }
 0x9f3   :  { %v5725_v22 = vpop.f32.mrb[59].mxu1 }
 0x9f4   :  { %v2371_v22 = vcombine.high %v2369_v13, %v2369_v13 }
 0xa14   :  { %v2100_v53 = vpop.f32.mrb[60].mxu1 }
 0xa15   :  { %v2101_v57 = vadd.f32 %v2100_v53, %v2061_v23  ;;  %v2102_v29 = vpop.f32.mrb[61].mxu1 }
 0xa16   :  { %v2103_v59 = vpop.f32.mrb[62].mxu1 }
 0xa17   :  { %v2106_v61 = vmax.f32 %v2101_v57, 0.0  ;;  %v2104_v63 = vpop.f32.mrb[63].mxu1 }
 0xa19   :  { %v2107_v26 = vpack.c.bf16 %v2106_v61, %v2106_v61 }
 0xa1b   :  { %5731 = vmatmul.mubr.msk.bf16.vlgmr.msra.gmra.mrb[64].mxu0 %vm486_vm2, %v2107_v26 }
 0xa1c   :  { %2243 = vmatpush1.bf16.msra.mxu0 %v6517_v40  ;;  %4875 = vmatprep.mubr.msk.bf16.mxu0 %vm264_vm0, %v2195_v21 }
 0xa1d   :  { %2244 = vmatprep.subr.bf16.mxu0 %v6046_v1 }
 0xa20   :  { %2245 = vmatpush1.bf16.msra.mxu0 %v6525_v41 }
 0xa21   :  { %2246 = vmatprep.subr.bf16.mxu0 %v6046_v1 }
 0xa24   :  { %2247 = vmatpush1.bf16.msra.mxu0 %v6532_v42 }
 0xa25   :  { %2248 = vmatprep.subr.bf16.mxu0 %v6046_v1 }
 0xa28   :  { %2249 = vmatpush1.bf16.msra.mxu0 %v6539_v43 }
 0xa29   :  { %2250 = vmatprep.subr.bf16.mxu0 %v6046_v1 }
 0xa2c   :  { %2251 = vmatpush1.bf16.msra.mxu0 %v6661_v9 }
 0xa2d   :  { %2252 = vmatprep.subr.bf16.mxu0 %v6046_v1 }
 0xa30   :  { %2253 = vmatpush1.bf16.msra.mxu0 %v6668_v10 }
 0xa31   :  { %2254 = vmatprep.subr.bf16.mxu0 %v6046_v1 }
 0xa34   :  { %2255 = vmatpush1.bf16.msra.mxu0 %v6675_v11  ;;  %v5307_v62 = vpop.f32.mrb[64].mxu1 }
 0xa35   :  { %2256 = vmatprep.subr.bf16.mxu0 %v6046_v1  ;;  %v5308_v2 = vpop.f32.mrb[65].mxu1 }
 0xa36   :  { %v5309_v0 = vadd.f32 %v5308_v2, %v5307_v62  ;;  %v5310_v4 = vpop.f32.mrb[66].mxu1  ;;  %v7095_v62 = vld [vmem:[%s8005_s1 + $0x88] sm:$0xff]   ;;  %v7102_v2 = vld [vmem:[%s8005_s1 + $0x90] sm:$0xff]  }
 0xa37   :  { %v5311_v5 = vpop.f32.mrb[67].mxu1 }
 0xa38   :  { %2257 = vmatpush1.bf16.msra.mxu0 %v6682_v12  ;;  %v2237_v39 = vadd.f32 %v6860_v7, %v5309_v0  ;;  %v7109_v0 = vld [vmem:[%s8005_s1 + $0x98] sm:$0xff]   ;;  %v7155_v5 = vld [vmem:[%s8005_s1 + $0x10] sm:$0xff]  }
 0xa39   :  { %2258 = vmatprep.subr.bf16.mxu0 %v6046_v1 }
 0xa3c   :  { %2259 = vmatpush1.bf16.msra.mxu0 %v6689_v15 }
 0xa3d   :  { %5316 = vmatprep.subr.bf16.mxu0 %v6555_v14 }
 0xa3f   :  { %2275 = vmatmul.mubr.bf16.vlgmr.msra.gmra.mrb[68].mxu0 %v2194_v60 }
 0xa40   :  { %5317 = vmatpush3.bf16.msra.mxu0 %v6561_v17  ;;  %2410 = vmatprep.mubr.bf16.mxu0 %v2369_v13  ;;  %v7179_v13 = vld [vmem:[%s8005_s1 + $0x20] sm:$0xff]  }
 0xa41   :  { %5318 = vmatprep.subr.bf16.mxu0 %v6567_v20 }
 0xa44   :  { %5319 = vmatpush3.bf16.msra.mxu0 %v6573_v25 }
 0xa45   :  { %5320 = vmatprep.subr.bf16.mxu0 %v6579_v34 }
 0xa48   :  { %5321 = vmatpush3.bf16.msra.mxu0 %v6585_v46 }
 0xa49   :  { %5322 = vmatprep.subr.bf16.mxu0 %v6591_v47 }
 0xa4c   :  { %5323 = vmatpush3.bf16.msra.mxu0 %v6597_v48 }
 0xa4d   :  { %5324 = vmatprep.subr.bf16.mxu0 %v6603_v49 }
 0xa50   :  { %5325 = vmatpush3.bf16.msra.mxu0 %v6609_v50 }
 0xa51   :  { %5326 = vmatprep.subr.bf16.mxu0 %v6615_v51 }
 0xa54   :  { %5327 = vmatpush3.bf16.msra.mxu0 %v6621_v52 }
 0xa55   :  { %5328 = vmatprep.subr.bf16.mxu0 %v6707_v16 }
 0xa58   :  { %5329 = vmatpush3.bf16.msra.mxu0 %v6713_v18 }
 0xa59   :  { %5330 = vmatprep.subr.bf16.mxu0 %v6719_v24 }
 0xa5c   :  { %5331 = vmatpush3.bf16.msra.mxu0 %v6725_v28 }
 0xa5d   :  { %5742 = vmatprep.subr.bf16.mxu0 %v6048_v45 }
 0xa5f   :  { %2411 = vmatmul.mubr.bf16.vlgmr.msra.gmra.mrb[72].mxu0 %v2362_v30 }
 0xa60   :  { %5746 = vmatprep.mubr.msk.bf16.mxu0 %vm6049_vm1, %v6048_v45 }
 0xaee   :  { %v2162_v31 = vpop.f32.mrb[64].mxu0 }
 0xaef   :  { %v7025_v32 = vadd.f32 %v2162_v31, %v6970_v56  ;;  %v5732_v36 = vpop.f32.mrb[65].mxu0  ;;  %v7191_v31 = vld [vmem:[%s8005_s1 + $0x28] sm:$0xff]  }
 0xaf0   :  { %v2165_v37 = vpop.f32.mrb[66].mxu0 }
 0xaf1   :  { %v5733_v38 = vpop.f32.mrb[67].mxu0 }
 0xb12   :  { %v2276_v35 = vpop.f32.mrb[68].mxu0 }
 0xb13   :  { %v2277_v44 = vadd.f32 %v2276_v35, %v2237_v39  ;;  %v2278_v54 = vpop.f32.mrb[69].mxu0 }
 0xb14   :  { %v2279_v55 = vpop.f32.mrb[70].mxu0 }
 0xb15   :  { %v2282_v58 = vmax.f32 %v2277_v44, 0.0  ;;  %v2280_v19 = vpop.f32.mrb[71].mxu0 }
 0xb17   :  { %v2283_v23 = vpack.c.bf16 %v2282_v58, %v2282_v58 }
 0xb19   :  { %5739 = vmatmul.mubr.msk.bf16.vlgmr.msra.gmra.mrb[68].mxu1 %vm486_vm2, %v2283_v23 }
 0xb1a   :  { %2419 = vmatpush1.bf16.msra.mxu1 %v6517_v40  ;;  %4885 = vmatprep.mubr.msk.bf16.mxu1 %vm264_vm0, %v2371_v22  ;;  %v2370_v40 = vcombine.high %v2362_v30, %v2362_v30  ;;  %v7185_v30 = vld [vmem:[%s8005_s1 + $0x68] sm:$0xff]  }
 0xb1b   :  { %2420 = vmatprep.subr.bf16.mxu1 %v6046_v1 }
 0xb1e   :  { %2421 = vmatpush1.bf16.msra.mxu1 %v6525_v41  ;;  %v5918_v41 = vld [vmem:[%s8007_s3 + $0xc0] sm:$0xff]  }
 0xb1f   :  { %2422 = vmatprep.subr.bf16.mxu1 %v6046_v1  ;;  %5743 = vmatpush3.bf16.msra.mxu0 %v5918_v41 }
 0xb20   :  { %5744 = vmatprep.subr.bf16.mxu0 %v6048_v45 }
 0xb22   :  { %2423 = vmatpush1.bf16.msra.mxu1 %v6532_v42 }
 0xb23   :  { %2424 = vmatprep.subr.bf16.mxu1 %v6046_v1 }
 0xb26   :  { %2425 = vmatpush1.bf16.msra.mxu1 %v6539_v43 }
 0xb27   :  { %2426 = vmatprep.subr.bf16.mxu1 %v6046_v1 }
 0xb2a   :  { %2427 = vmatpush1.bf16.msra.mxu1 %v6661_v9 }
 0xb2b   :  { %2428 = vmatprep.subr.bf16.mxu1 %v6046_v1 }
 0xb2e   :  { %2429 = vmatpush1.bf16.msra.mxu1 %v6668_v10 }
 0xb2f   :  { %2430 = vmatprep.subr.bf16.mxu1 %v6046_v1 }
 0xb32   :  { %2431 = vmatpush1.bf16.msra.mxu1 %v6675_v11  ;;  %v5332_v42 = vpop.f32.mrb[72].mxu0 }
 0xb33   :  { %2432 = vmatprep.subr.bf16.mxu1 %v6046_v1  ;;  %v5333_v43 = vpop.f32.mrb[73].mxu0 }
 0xb36   :  { %2433 = vmatpush1.bf16.msra.mxu1 %v6682_v12 }
 0xb37   :  { %2434 = vmatprep.subr.bf16.mxu1 %v6046_v1 }
 0xb3a   :  { %2435 = vmatpush1.bf16.msra.mxu1 %v6689_v15 }
 0xb3b   :  { %5341 = vmatprep.subr.bf16.mxu1 %v6555_v14  ;;  %v5334_v14 = vadd.f32 %v5333_v43, %v5332_v42 }
 0xb3d   :  { %2451 = vmatmul.mubr.bf16.vlgmr.msra.gmra.mrb[72].mxu1 %v2370_v40  ;;  %v2413_v53 = vadd.f32 %v6860_v7, %v5334_v14 }
 0xb3e   :  { %5342 = vmatpush3.bf16.msra.mxu1 %v6561_v17  ;;  %v5335_v17 = vpop.f32.mrb[74].mxu0 }
 0xb3f   :  { %5343 = vmatprep.subr.bf16.mxu1 %v6567_v20  ;;  %v5336_v20 = vpop.f32.mrb[75].mxu0 }
 0xb42   :  { %5344 = vmatpush3.bf16.msra.mxu1 %v6573_v25  ;;  %v5919_v25 = vld [vmem:[%s8007_s3 + $0xc8] sm:$0xff]  }
 0xb43   :  { %5345 = vmatprep.subr.bf16.mxu1 %v6579_v34  ;;  %5745 = vmatpush3.bf16.msra.mxu0 %v5919_v25  ;;  %v4894_v34 = vld.sshfl [vmem:[%s8004_s0 + $0x34] sm:$0x33 pattern:$0x75316420] }
 0xb44   :  { %2594 = vmatprep.subr.bf16.mxu0 %v6046_v1 }
 0xb46   :  { %5346 = vmatpush3.bf16.msra.mxu1 %v6585_v46  ;;  %v2531_v46 = vcombine.high %v4894_v34, %v4894_v34 }
 0xb47   :  { %5347 = vmatprep.subr.bf16.mxu1 %v6591_v47 }
 0xb48   :  { %v2545_v47 = vrot.slane %v2531_v46, %v6248_v33  ;;  %v7238_v46 = vld [vmem:[%s8005_s1 + $0xa8] sm:$0xff]  }
 0xb4a   :  { %5348 = vmatpush3.bf16.msra.mxu1 %v6597_v48  ;;  %v2538_v48 = vrot.slane %v4894_v34, %v6248_v33  ;;  %2586 = vmatprep.mubr.bf16.mxu1 %v2545_v47  ;;  %v2547_v26 = vcombine.high %v2545_v47, %v2545_v47  ;;  %v7231_v34 = vld [vmem:[%s8005_s1 + $0xa0] sm:$0xff]   ;;  %v7245_v47 = vld [vmem:[%s8005_s1 + $0xb0] sm:$0xff]  }
 0xb4b   :  { %5349 = vmatprep.subr.bf16.mxu1 %v6603_v49 }
 0xb4c   :  { %v2546_v4 = vcombine.high %v2538_v48, %v2538_v48 }
 0xb4e   :  { %5350 = vmatpush3.bf16.msra.mxu1 %v6609_v50 }
 0xb4f   :  { %5351 = vmatprep.subr.bf16.mxu1 %v6615_v51 }
 0xb52   :  { %5352 = vmatpush3.bf16.msra.mxu1 %v6621_v52 }
 0xb53   :  { %5353 = vmatprep.subr.bf16.mxu1 %v6707_v16 }
 0xb56   :  { %5354 = vmatpush3.bf16.msra.mxu1 %v6713_v18 }
 0xb57   :  { %5355 = vmatprep.subr.bf16.mxu1 %v6719_v24 }
 0xb5a   :  { %5356 = vmatpush3.bf16.msra.mxu1 %v6725_v28 }
 0xb5b   :  { %5750 = vmatprep.subr.bf16.mxu1 %v6048_v45 }
 0xb5d   :  { %2587 = vmatmul.mubr.bf16.vlgmr.msra.gmra.mrb[76].mxu1 %v2538_v48  ;;  %v7252_v48 = vld [vmem:[%s8005_s1 + $0xb8] sm:$0xff]  }
 0xb5e   :  { %5754 = vmatprep.mubr.msk.bf16.mxu1 %vm6049_vm1, %v6048_v45 }
 0xbec   :  { %v2338_v49 = vpop.f32.mrb[68].mxu1 }
 0xbed   :  { %v7080_v50 = vadd.f32 %v2338_v49, %v7025_v32  ;;  %v5740_v51 = vpop.f32.mrb[69].mxu1  ;;  %v5920_v32 = vld [vmem:[%s8007_s3 + $0xd0] sm:$0xff]  }
 0xbee   :  { %v2341_v52 = vpop.f32.mrb[70].mxu1  ;;  %5751 = vmatpush3.bf16.msra.mxu1 %v5920_v32  ;;  %v7277_v51 = vld [vmem:[%s8005_s1 + $0x70] sm:$0xff]  }
 0xbef   :  { %v5741_v56 = vpop.f32.mrb[71].mxu1  ;;  %5752 = vmatprep.subr.bf16.mxu1 %v6048_v45  ;;  %v7283_v52 = vld [vmem:[%s8005_s1 + $0x30] sm:$0xff]  }
 0xbf0   :  { %v7289_v56 = vld [vmem:[%s8005_s1 + $0x78] sm:$0xff]  }
 0xc10   :  { %v2452_v57 = vpop.f32.mrb[72].mxu1 }
 0xc11   :  { %v2453_v29 = vadd.f32 %v2452_v57, %v2413_v53  ;;  %v2454_v59 = vpop.f32.mrb[73].mxu1  ;;  %v7295_v53 = vld [vmem:[%s8005_s1 + $0x38] sm:$0xff]   ;;  %v5922_v57 = vld [vmem:[%s8007_s3 + $0xe0] sm:$0xff]  }
 0xc12   :  { %v2455_v61 = vpop.f32.mrb[74].mxu1 }
 0xc13   :  { %v2458_v63 = vmax.f32 %v2453_v29, 0.0  ;;  %v2456_v21 = vpop.f32.mrb[75].mxu1 }
 0xc15   :  { %v2459_v60 = vpack.c.bf16 %v2458_v63, %v2458_v63 }
 0xc17   :  { %5747 = vmatmul.mubr.msk.bf16.vlgmr.msra.gmra.mrb[76].mxu0 %vm486_vm2, %v2459_v60  ;;  %v4914_v60 = vld.sshfl [vmem:[%s8004_s0 + $0x3c] sm:$0x33 pattern:$0x75316420] }
 0xc18   :  { %2595 = vmatpush1.bf16.msra.mxu0 %v7087_v27  ;;  %4895 = vmatprep.mubr.msk.bf16.mxu0 %vm264_vm0, %v2547_v26  ;;  %v5923_v26 = vld [vmem:[%s8007_s3 + $0xe8] sm:$0xff]  }
 0xc19   :  { %2596 = vmatprep.subr.bf16.mxu0 %v6046_v1 }
 0xc1c   :  { %2597 = vmatpush1.bf16.msra.mxu0 %v7095_v62 }
 0xc1d   :  { %2598 = vmatprep.subr.bf16.mxu0 %v6046_v1 }
 0xc20   :  { %2599 = vmatpush1.bf16.msra.mxu0 %v7102_v2 }
 0xc21   :  { %2600 = vmatprep.subr.bf16.mxu0 %v6046_v1 }
 0xc24   :  { %2601 = vmatpush1.bf16.msra.mxu0 %v7109_v0 }
 0xc25   :  { %2602 = vmatprep.subr.bf16.mxu0 %v6046_v1 }
 0xc28   :  { %2603 = vmatpush1.bf16.msra.mxu0 %v6661_v9  ;;  %v7125_v9 = vld [vmem:[%s8005_s1 + $0x40] sm:$0xff]  }
 0xc29   :  { %2604 = vmatprep.subr.bf16.mxu0 %v6046_v1 }
 0xc2c   :  { %2605 = vmatpush1.bf16.msra.mxu0 %v6668_v10  ;;  %v7131_v10 = vld [vmem:[%s8005_s1] sm:$0xff]  }
 0xc2d   :  { %2606 = vmatprep.subr.bf16.mxu0 %v6046_v1 }
 0xc30   :  { %2607 = vmatpush1.bf16.msra.mxu0 %v6675_v11  ;;  %v7137_v11 = vld [vmem:[%s8005_s1 + $0x48] sm:$0xff]   ;;  %v5357_v36 = vpop.f32.mrb[76].mxu1 }
 0xc31   :  { %2608 = vmatprep.subr.bf16.mxu0 %v6046_v1  ;;  %v5358_v37 = vpop.f32.mrb[77].mxu1 }
 0xc32   :  { %v5359_v38 = vadd.f32 %v5358_v37, %v5357_v36  ;;  %v5360_v39 = vpop.f32.mrb[78].mxu1  ;;  %v2890_v36 = vrot.slane %v4914_v60, %v6248_v33 }
 0xc34   :  { %2609 = vmatpush1.bf16.msra.mxu0 %v6682_v12  ;;  %v7143_v12 = vld [vmem:[%s8005_s1 + $0x8] sm:$0xff]   ;;  %v2589_v23 = vadd.f32 %v6860_v7, %v5359_v38 }
 0xc35   :  { %2610 = vmatprep.subr.bf16.mxu0 %v6046_v1 }
 0xc38   :  { %2611 = vmatpush1.bf16.msra.mxu0 %v6689_v15  ;;  %v7149_v15 = vld [vmem:[%s8005_s1 + $0x50] sm:$0xff]  }
 0xc39   :  { %5366 = vmatprep.subr.bf16.mxu0 %v7125_v9 }
 0xc3b   :  { %2627 = vmatmul.mubr.bf16.vlgmr.msra.gmra.mrb[80].mxu0 %v2546_v4  ;;  %v2883_v4 = vcombine.high %v4914_v60, %v4914_v60 }
 0xc3c   :  { %5367 = vmatpush3.bf16.msra.mxu0 %v7131_v10 }
 0xc3d   :  { %5368 = vmatprep.subr.bf16.mxu0 %v7137_v11  ;;  %v2897_v32 = vrot.slane %v2883_v4, %v6248_v33 }
 0xc40   :  { %5369 = vmatpush3.bf16.msra.mxu0 %v7143_v12 }
 0xc41   :  { %5370 = vmatprep.subr.bf16.mxu0 %v7149_v15 }
 0xc44   :  { %5371 = vmatpush3.bf16.msra.mxu0 %v7155_v5 }
 0xc45   :  { %5372 = vmatprep.subr.bf16.mxu0 %v7161_v6 }
 0xc48   :  { %5373 = vmatpush3.bf16.msra.mxu0 %v7167_v8 }
 0xc49   :  { %5374 = vmatprep.subr.bf16.mxu0 %v7173_v3 }
 0xc4c   :  { %5375 = vmatpush3.bf16.msra.mxu0 %v7179_v13 }
 0xc4d   :  { %5376 = vmatprep.subr.bf16.mxu0 %v7185_v30 }
 0xc50   :  { %5377 = vmatpush3.bf16.msra.mxu0 %v7191_v31 }
 0xc51   :  { %5378 = vmatprep.subr.bf16.mxu0 %v6707_v16  ;;  %v5361_v16 = vpop.f32.mrb[79].mxu1 }
 0xc54   :  { %5379 = vmatpush3.bf16.msra.mxu0 %v6713_v18  ;;  %v5921_v18 = vld [vmem:[%s8007_s3 + $0xd8] sm:$0xff]  }
 0xc55   :  { %5380 = vmatprep.subr.bf16.mxu0 %v6719_v24  ;;  %5753 = vmatpush3.bf16.msra.mxu1 %v5921_v18  ;;  %v4904_v24 = vld.sshfl [vmem:[%s8004_s0 + $0x38] sm:$0x33 pattern:$0x75316420] }
 0xc56   :  { %2770 = vmatprep.subr.bf16.mxu1 %v6046_v1  ;;  %v2714_v44 = vrot.slane %v4904_v24, %v6248_v33 }
 0xc58   :  { %5381 = vmatpush3.bf16.msra.mxu0 %v6725_v28  ;;  %v2707_v28 = vcombine.high %v4904_v24, %v4904_v24  ;;  %v2722_v49 = vcombine.high %v2714_v44, %v2714_v44 }
 0xc59   :  { %5758 = vmatprep.subr.bf16.mxu0 %v6048_v45 }
 0xc5a   :  { %v2721_v35 = vrot.slane %v2707_v28, %v6248_v33 }
 0xc5c   :  { %2762 = vmatprep.mubr.bf16.mxu0 %v2721_v35  ;;  %v2723_v20 = vcombine.high %v2721_v35, %v2721_v35 }
 0xc5d   :  { %2763 = vmatmul.mubr.bf16.vlgmr.msra.gmra.mrb[84].mxu0 %v2714_v44 }
 0xc5e   :  { %5762 = vmatprep.mubr.msk.bf16.mxu0 %vm6049_vm1, %v6048_v45  ;;  %5759 = vmatpush3.bf16.msra.mxu0 %v5922_v57 }
 0xc5f   :  { %5760 = vmatprep.subr.bf16.mxu0 %v6048_v45 }
 0xc62   :  { %5761 = vmatpush3.bf16.msra.mxu0 %v5923_v26 }
 0xc63   :  { %2946 = vmatprep.subr.bf16.mxu0 %v6046_v1 }
 0xcea   :  { %v2514_v54 = vpop.f32.mrb[76].mxu0 }
 0xceb   :  { %v7215_v55 = vadd.f32 %v2514_v54, %v7080_v50  ;;  %v5748_v58 = vpop.f32.mrb[77].mxu0  ;;  %v7259_v50 = vld [vmem:[%s8005_s1 + $0xc0] sm:$0xff]  }
 0xcec   :  { %v2517_v19 = vpop.f32.mrb[78].mxu0 }
 0xced   :  { %v5749_v22 = vpop.f32.mrb[79].mxu0 }
 0xcee   :  { %v2899_v22 = vcombine.high %v2897_v32, %v2897_v32 }
 0xd0e   :  { %v2628_v40 = vpop.f32.mrb[80].mxu0 }
 0xd0f   :  { %v2629_v41 = vadd.f32 %v2628_v40, %v2589_v23  ;;  %v2630_v42 = vpop.f32.mrb[81].mxu0  ;;  %v5924_v40 = vld [vmem:[%s8007_s3 + $0xf0] sm:$0xff]  }
 0xd10   :  { %v2631_v43 = vpop.f32.mrb[82].mxu0 }
 0xd11   :  { %v2634_v14 = vmax.f32 %v2629_v41, 0.0  ;;  %v2632_v17 = vpop.f32.mrb[83].mxu0 }
 0xd13   :  { %v2635_v25 = vpack.c.bf16 %v2634_v14, %v2634_v14 }
 0xd15   :  { %5755 = vmatmul.mubr.msk.bf16.vlgmr.msra.gmra.mrb[80].mxu1 %vm486_vm2, %v2635_v25  ;;  %v4924_v25 = vld.sshfl [vmem:[%s8004_s0 + $0x40] sm:$0x33 pattern:$0x75316420] }
 0xd16   :  { %2771 = vmatpush1.bf16.msra.mxu1 %v7087_v27  ;;  %4905 = vmatprep.mubr.msk.bf16.mxu1 %vm264_vm0, %v2723_v20  ;;  %v5925_v20 = vld [vmem:[%s8007_s3 + $0xf8] sm:$0xff]  }
 0xd17   :  { %2772 = vmatprep.subr.bf16.mxu1 %v6046_v1 }
 0xd1a   :  { %2773 = vmatpush1.bf16.msra.mxu1 %v7095_v62 }
 0xd1b   :  { %2774 = vmatprep.subr.bf16.mxu1 %v6046_v1 }
 0xd1e   :  { %2775 = vmatpush1.bf16.msra.mxu1 %v7102_v2 }
 0xd1f   :  { %2776 = vmatprep.subr.bf16.mxu1 %v6046_v1 }
 0xd22   :  { %2777 = vmatpush1.bf16.msra.mxu1 %v7109_v0 }
 0xd23   :  { %2778 = vmatprep.subr.bf16.mxu1 %v6046_v1 }
 0xd26   :  { %2779 = vmatpush1.bf16.msra.mxu1 %v7231_v34 }
 0xd27   :  { %2780 = vmatprep.subr.bf16.mxu1 %v6046_v1 }
 0xd2a   :  { %2781 = vmatpush1.bf16.msra.mxu1 %v7238_v46 }
 0xd2b   :  { %2782 = vmatprep.subr.bf16.mxu1 %v6046_v1 }
 0xd2e   :  { %2783 = vmatpush1.bf16.msra.mxu1 %v7245_v47 }
 0xd2f   :  { %2784 = vmatprep.subr.bf16.mxu1 %v6046_v1 }
 0xd30   :  { %v5382_v29 = vpop.f32.mrb[84].mxu0 }
 0xd31   :  { %v5383_v59 = vpop.f32.mrb[85].mxu0 }
 0xd32   :  { %2785 = vmatpush1.bf16.msra.mxu1 %v7252_v48  ;;  %v5384_v61 = vadd.f32 %v5383_v59, %v5382_v29  ;;  %v5385_v63 = vpop.f32.mrb[86].mxu0  ;;  %v3066_v29 = vrot.slane %v4924_v25, %v6248_v33 }
 0xd33   :  { %2786 = vmatprep.subr.bf16.mxu1 %v6046_v1  ;;  %v5386_v21 = vpop.f32.mrb[87].mxu0 }
 0xd34   :  { %v2765_v24 = vadd.f32 %v6860_v7, %v5384_v61 }
 0xd36   :  { %2787 = vmatpush1.bf16.msra.mxu1 %v7259_v50 }
 0xd37   :  { %5391 = vmatprep.subr.bf16.mxu1 %v7125_v9 }
 0xd39   :  { %2803 = vmatmul.mubr.bf16.vlgmr.msra.gmra.mrb[84].mxu1 %v2722_v49  ;;  %v3059_v49 = vcombine.high %v4924_v25, %v4924_v25 }
 0xd3a   :  { %5392 = vmatpush3.bf16.msra.mxu1 %v7131_v10  ;;  %2938 = vmatprep.mubr.bf16.mxu1 %v2897_v32 }
 0xd3b   :  { %5393 = vmatprep.subr.bf16.mxu1 %v7137_v11  ;;  %v3073_v57 = vrot.slane %v3059_v49, %v6248_v33 }
 0xd3e   :  { %5394 = vmatpush3.bf16.msra.mxu1 %v7143_v12 }
 0xd3f   :  { %5395 = vmatprep.subr.bf16.mxu1 %v7149_v15 }
 0xd42   :  { %5396 = vmatpush3.bf16.msra.mxu1 %v7155_v5 }
 0xd43   :  { %5397 = vmatprep.subr.bf16.mxu1 %v7161_v6 }
 0xd46   :  { %5398 = vmatpush3.bf16.msra.mxu1 %v7167_v8 }
 0xd47   :  { %5399 = vmatprep.subr.bf16.mxu1 %v7173_v3 }
 0xd4a   :  { %5400 = vmatpush3.bf16.msra.mxu1 %v7179_v13 }
 0xd4b   :  { %5401 = vmatprep.subr.bf16.mxu1 %v7185_v30 }
 0xd4e   :  { %5402 = vmatpush3.bf16.msra.mxu1 %v7191_v31 }
 0xd4f   :  { %5403 = vmatprep.subr.bf16.mxu1 %v7277_v51 }
 0xd52   :  { %5404 = vmatpush3.bf16.msra.mxu1 %v7283_v52 }
 0xd53   :  { %5405 = vmatprep.subr.bf16.mxu1 %v7289_v56 }
 0xd56   :  { %5406 = vmatpush3.bf16.msra.mxu1 %v7295_v53 }
 0xd57   :  { %5766 = vmatprep.subr.bf16.mxu1 %v6048_v45 }
 0xd59   :  { %2939 = vmatmul.mubr.bf16.vlgmr.msra.gmra.mrb[88].mxu1 %v2890_v36 }
 0xd5a   :  { %5770 = vmatprep.mubr.msk.bf16.mxu1 %vm6049_vm1, %v6048_v45  ;;  %5767 = vmatpush3.bf16.msra.mxu1 %v5924_v40 }
 0xd5b   :  { %5768 = vmatprep.subr.bf16.mxu1 %v6048_v45 }
 0xd5e   :  { %5769 = vmatpush3.bf16.msra.mxu1 %v5925_v20  ;;  %v7430_v20 = vld [vmem:[%s8006_s2] ss:$0 sm:$0xff] }
 0xd5f   :  { %3122 = vmatprep.subr.bf16.mxu1 %v6046_v1 }
 0xde8   :  { %v2690_v37 = vpop.f32.mrb[80].mxu1 }
 0xde9   :  { %v7315_v38 = vadd.f32 %v2690_v37, %v7215_v55  ;;  %v5756_v39 = vpop.f32.mrb[81].mxu1  ;;  %v2898_v55 = vcombine.high %v2890_v36, %v2890_v36 }
 0xdea   :  { %v2693_v16 = vpop.f32.mrb[82].mxu1 }
 0xdeb   :  { %v5757_v18 = vpop.f32.mrb[83].mxu1 }
 0xdec   :  { %v3075_v18 = vcombine.high %v3073_v57, %v3073_v57 }
 0xe0c   :  { %v2804_v28 = vpop.f32.mrb[84].mxu1 }
 0xe0d   :  { %v2805_v35 = vadd.f32 %v2804_v28, %v2765_v24  ;;  %v2806_v44 = vpop.f32.mrb[85].mxu1 }
 0xe0e   :  { %v2807_v54 = vpop.f32.mrb[86].mxu1 }
 0xe0f   :  { %v2810_v58 = vmax.f32 %v2805_v35, 0.0  ;;  %v2808_v19 = vpop.f32.mrb[87].mxu1 }
 0xe10   :  { %v5927_v19 = vld [vmem:[%s8007_s3 + $0x108] sm:$0xff]  }
 0xe11   :  { %v2811_v23 = vpack.c.bf16 %v2810_v58, %v2810_v58 }
 0xe13   :  { %5763 = vmatmul.mubr.msk.bf16.vlgmr.msra.gmra.mrb[88].mxu0 %vm486_vm2, %v2811_v23 }
 0xe14   :  { %2947 = vmatpush1.bf16.msra.mxu0 %v7087_v27  ;;  %4915 = vmatprep.mubr.msk.bf16.mxu0 %vm264_vm0, %v2899_v22  ;;  %v4934_v22 = vld.sshfl [vmem:[%s8004_s0 + $0x44] sm:$0x33 pattern:$0x75316420] }
 0xe15   :  { %2948 = vmatprep.subr.bf16.mxu0 %v6046_v1  ;;  %v3235_v23 = vcombine.high %v4934_v22, %v4934_v22  ;;  %v3242_v40 = vrot.slane %v4934_v22, %v6248_v33 }
 0xe18   :  { %2949 = vmatpush1.bf16.msra.mxu0 %v7095_v62 }
 0xe19   :  { %2950 = vmatprep.subr.bf16.mxu0 %v6046_v1 }
 0xe1c   :  { %2951 = vmatpush1.bf16.msra.mxu0 %v7102_v2 }
 0xe1d   :  { %2952 = vmatprep.subr.bf16.mxu0 %v6046_v1 }
 0xe20   :  { %2953 = vmatpush1.bf16.msra.mxu0 %v7109_v0 }
 0xe21   :  { %2954 = vmatprep.subr.bf16.mxu0 %v6046_v1 }
 0xe24   :  { %2955 = vmatpush1.bf16.msra.mxu0 %v7231_v34 }
 0xe25   :  { %2956 = vmatprep.subr.bf16.mxu0 %v6046_v1 }
 0xe28   :  { %2957 = vmatpush1.bf16.msra.mxu0 %v7238_v46 }
 0xe29   :  { %2958 = vmatprep.subr.bf16.mxu0 %v6046_v1 }
 0xe2c   :  { %2959 = vmatpush1.bf16.msra.mxu0 %v7245_v47  ;;  %v5407_v41 = vpop.f32.mrb[88].mxu1 }
 0xe2d   :  { %2960 = vmatprep.subr.bf16.mxu0 %v6046_v1  ;;  %v5408_v42 = vpop.f32.mrb[89].mxu1 }
 0xe2e   :  { %v5409_v43 = vadd.f32 %v5408_v42, %v5407_v41  ;;  %v5410_v14 = vpop.f32.mrb[90].mxu1 }
 0xe2f   :  { %v5411_v17 = vpop.f32.mrb[91].mxu1 }
 0xe30   :  { %2961 = vmatpush1.bf16.msra.mxu0 %v7252_v48  ;;  %v2941_v60 = vadd.f32 %v6860_v7, %v5409_v43  ;;  %v3074_v7 = vcombine.high %v3066_v29, %v3066_v29 }
 0xe31   :  { %2962 = vmatprep.subr.bf16.mxu0 %v6046_v1 }
 0xe34   :  { %2963 = vmatpush1.bf16.msra.mxu0 %v7259_v50 }
 0xe35   :  { %5416 = vmatprep.subr.bf16.mxu0 %v7125_v9 }
 0xe37   :  { %2979 = vmatmul.mubr.bf16.vlgmr.msra.gmra.mrb[92].mxu0 %v2898_v55  ;;  %v3249_v55 = vrot.slane %v3235_v23, %v6248_v33 }
 0xe38   :  { %5417 = vmatpush3.bf16.msra.mxu0 %v7131_v10  ;;  %3114 = vmatprep.mubr.bf16.mxu0 %v3073_v57 }
 0xe39   :  { %5418 = vmatprep.subr.bf16.mxu0 %v7137_v11 }
 0xe3c   :  { %5419 = vmatpush3.bf16.msra.mxu0 %v7143_v12 }
 0xe3d   :  { %5420 = vmatprep.subr.bf16.mxu0 %v7149_v15 }
 0xe40   :  { %5421 = vmatpush3.bf16.msra.mxu0 %v7155_v5 }
 0xe41   :  { %5422 = vmatprep.subr.bf16.mxu0 %v7161_v6 }
 0xe44   :  { %5423 = vmatpush3.bf16.msra.mxu0 %v7167_v8 }
 0xe45   :  { %5424 = vmatprep.subr.bf16.mxu0 %v7173_v3 }
 0xe48   :  { %5425 = vmatpush3.bf16.msra.mxu0 %v7179_v13 }
 0xe49   :  { %5426 = vmatprep.subr.bf16.mxu0 %v7185_v30 }
 0xe4c   :  { %5427 = vmatpush3.bf16.msra.mxu0 %v7191_v31 }
 0xe4d   :  { %5428 = vmatprep.subr.bf16.mxu0 %v7277_v51 }
 0xe50   :  { %5429 = vmatpush3.bf16.msra.mxu0 %v7283_v52 }
 0xe51   :  { %5430 = vmatprep.subr.bf16.mxu0 %v7289_v56 }
 0xe54   :  { %5431 = vmatpush3.bf16.msra.mxu0 %v7295_v53 }
 0xe55   :  { %5774 = vmatprep.subr.bf16.mxu0 %v6048_v45 }
 0xe57   :  { %3115 = vmatmul.mubr.bf16.vlgmr.msra.gmra.mrb[96].mxu0 %v3066_v29 }
 0xe58   :  { %5778 = vmatprep.mubr.msk.bf16.mxu0 %vm6049_vm1, %v6048_v45 }
 0xee6   :  { %v2866_v59 = vpop.f32.mrb[88].mxu0 }
 0xee7   :  { %v7370_v61 = vadd.f32 %v2866_v59, %v7315_v38  ;;  %v5764_v63 = vpop.f32.mrb[89].mxu0  ;;  %v5926_v38 = vld [vmem:[%s8007_s3 + $0x100] sm:$0xff]  }
 0xee8   :  { %v2869_v21 = vpop.f32.mrb[90].mxu0  ;;  %5775 = vmatpush3.bf16.msra.mxu0 %v5926_v38 }
 0xee9   :  { %v5765_v26 = vpop.f32.mrb[91].mxu0  ;;  %5776 = vmatprep.subr.bf16.mxu0 %v6048_v45 }
 0xeea   :  { %v3251_v26 = vcombine.high %v3249_v55, %v3249_v55 }
 0xeec   :  { %5777 = vmatpush3.bf16.msra.mxu0 %v5927_v19 }
 0xeed   :  { %3298 = vmatprep.subr.bf16.mxu0 %v6046_v1 }
 0xf0a   :  { %v2980_v4 = vpop.f32.mrb[92].mxu0 }
 0xf0b   :  { %v2981_v32 = vadd.f32 %v2980_v4, %v2941_v60  ;;  %v2982_v36 = vpop.f32.mrb[93].mxu0  ;;  %v5928_v4 = vld [vmem:[%s8007_s3 + $0x110] sm:$0xff]  }
 0xf0c   :  { %v2983_v37 = vpop.f32.mrb[94].mxu0 }
 0xf0d   :  { %v2986_v39 = vmax.f32 %v2981_v32, 0.0  ;;  %v2984_v16 = vpop.f32.mrb[95].mxu0 }
 0xf0f   :  { %v2987_v24 = vpack.c.bf16 %v2986_v39, %v2986_v39 }
 0xf11   :  { %5771 = vmatmul.mubr.msk.bf16.vlgmr.msra.gmra.mrb[92].mxu1 %vm486_vm2, %v2987_v24  ;;  %v4944_v24 = vld.sshfl [vmem:[%s8004_s0 + $0x48] sm:$0x33 pattern:$0x75316420] }
 0xf12   :  { %3123 = vmatpush1.bf16.msra.mxu1 %v7087_v27  ;;  %4925 = vmatprep.mubr.msk.bf16.mxu1 %vm264_vm0, %v3075_v18  ;;  %v5929_v18 = vld [vmem:[%s8007_s3 + $0x118] sm:$0xff]  }
 0xf13   :  { %3124 = vmatprep.subr.bf16.mxu1 %v6046_v1 }
 0xf16   :  { %3125 = vmatpush1.bf16.msra.mxu1 %v7095_v62 }
 0xf17   :  { %3126 = vmatprep.subr.bf16.mxu1 %v6046_v1 }
 0xf1a   :  { %3127 = vmatpush1.bf16.msra.mxu1 %v7102_v2 }
 0xf1b   :  { %3128 = vmatprep.subr.bf16.mxu1 %v6046_v1 }
 0xf1e   :  { %3129 = vmatpush1.bf16.msra.mxu1 %v7109_v0 }
 0xf1f   :  { %3130 = vmatprep.subr.bf16.mxu1 %v6046_v1 }
 0xf22   :  { %3131 = vmatpush1.bf16.msra.mxu1 %v7231_v34 }
 0xf23   :  { %3132 = vmatprep.subr.bf16.mxu1 %v6046_v1 }
 0xf26   :  { %3133 = vmatpush1.bf16.msra.mxu1 %v7238_v46 }
 0xf27   :  { %3134 = vmatprep.subr.bf16.mxu1 %v6046_v1 }
 0xf2a   :  { %3135 = vmatpush1.bf16.msra.mxu1 %v7245_v47  ;;  %v5432_v28 = vpop.f32.mrb[96].mxu0 }
 0xf2b   :  { %3136 = vmatprep.subr.bf16.mxu1 %v6046_v1  ;;  %v5433_v35 = vpop.f32.mrb[97].mxu0 }
 0xf2c   :  { %v5434_v44 = vadd.f32 %v5433_v35, %v5432_v28  ;;  %v5435_v54 = vpop.f32.mrb[98].mxu0  ;;  %v3418_v28 = vrot.slane %v4944_v24, %v6248_v33 }
 0xf2d   :  { %v5436_v58 = vpop.f32.mrb[99].mxu0 }
 0xf2e   :  { %3137 = vmatpush1.bf16.msra.mxu1 %v7252_v48  ;;  %v3117_v25 = vadd.f32 %v7430_v20, %v5434_v44 }
 0xf2f   :  { %3138 = vmatprep.subr.bf16.mxu1 %v6046_v1 }
 0xf32   :  { %3139 = vmatpush1.bf16.msra.mxu1 %v7259_v50 }
 0xf33   :  { %5441 = vmatprep.subr.bf16.mxu1 %v7125_v9 }
 0xf35   :  { %3155 = vmatmul.mubr.bf16.vlgmr.msra.gmra.mrb[96].mxu1 %v3074_v7  ;;  %v3411_v7 = vcombine.high %v4944_v24, %v4944_v24 }
 0xf36   :  { %5442 = vmatpush3.bf16.msra.mxu1 %v7131_v10  ;;  %3290 = vmatprep.mubr.bf16.mxu1 %v3249_v55 }
 0xf37   :  { %5443 = vmatprep.subr.bf16.mxu1 %v7137_v11  ;;  %v3425_v38 = vrot.slane %v3411_v7, %v6248_v33 }
 0xf3a   :  { %5444 = vmatpush3.bf16.msra.mxu1 %v7143_v12 }
 0xf3b   :  { %5445 = vmatprep.subr.bf16.mxu1 %v7149_v15 }
 0xf3e   :  { %5446 = vmatpush3.bf16.msra.mxu1 %v7155_v5 }
 0xf3f   :  { %5447 = vmatprep.subr.bf16.mxu1 %v7161_v6 }
 0xf42   :  { %5448 = vmatpush3.bf16.msra.mxu1 %v7167_v8 }
 0xf43   :  { %5449 = vmatprep.subr.bf16.mxu1 %v7173_v3 }
 0xf46   :  { %5450 = vmatpush3.bf16.msra.mxu1 %v7179_v13 }
 0xf47   :  { %5451 = vmatprep.subr.bf16.mxu1 %v7185_v30 }
 0xf4a   :  { %5452 = vmatpush3.bf16.msra.mxu1 %v7191_v31 }
 0xf4b   :  { %5453 = vmatprep.subr.bf16.mxu1 %v7277_v51 }
 0xf4e   :  { %5454 = vmatpush3.bf16.msra.mxu1 %v7283_v52 }
 0xf4f   :  { %5455 = vmatprep.subr.bf16.mxu1 %v7289_v56 }
 0xf52   :  { %5456 = vmatpush3.bf16.msra.mxu1 %v7295_v53 }
 0xf53   :  { %5782 = vmatprep.subr.bf16.mxu1 %v6048_v45 }
 0xf55   :  { %3291 = vmatmul.mubr.bf16.vlgmr.msra.gmra.mrb[100].mxu1 %v3242_v40 }
 0xf56   :  { %5786 = vmatprep.mubr.msk.bf16.mxu1 %vm6049_vm1, %v6048_v45  ;;  %5783 = vmatpush3.bf16.msra.mxu1 %v5928_v4 }
 0xf57   :  { %5784 = vmatprep.subr.bf16.mxu1 %v6048_v45 }
 0xf5a   :  { %5785 = vmatpush3.bf16.msra.mxu1 %v5929_v18 }
 0xf5b   :  { %3474 = vmatprep.subr.bf16.mxu1 %v6046_v1 }
 0xfe4   :  { %v3042_v41 = vpop.f32.mrb[92].mxu1 }
 0xfe5   :  { %v7425_v42 = vadd.f32 %v3042_v41, %v7370_v61  ;;  %v5772_v43 = vpop.f32.mrb[93].mxu1  ;;  %v3250_v61 = vcombine.high %v3242_v40, %v3242_v40 }
 0xfe6   :  { %v3045_v14 = vpop.f32.mrb[94].mxu1 }
 0xfe7   :  { %v5773_v17 = vpop.f32.mrb[95].mxu1 }
 0xfe8   :  { %v3427_v17 = vcombine.high %v3425_v38, %v3425_v38 }
0x1008   :  { %v3156_v49 = vpop.f32.mrb[96].mxu1 }
0x1009   :  { %v3157_v57 = vadd.f32 %v3156_v49, %v3117_v25  ;;  %v3158_v29 = vpop.f32.mrb[97].mxu1  ;;  %v5930_v49 = vld [vmem:[%s8007_s3 + $0x120] sm:$0xff]  }
0x100a   :  { %v3159_v59 = vpop.f32.mrb[98].mxu1 }
0x100b   :  { %v3162_v63 = vmax.f32 %v3157_v57, 0.0  ;;  %v3160_v21 = vpop.f32.mrb[99].mxu1 }
0x100d   :  { %v3163_v60 = vpack.c.bf16 %v3162_v63, %v3162_v63 }
0x100f   :  { %5779 = vmatmul.mubr.msk.bf16.vlgmr.msra.gmra.mrb[100].mxu0 %vm486_vm2, %v3163_v60  ;;  %v4954_v60 = vld.sshfl [vmem:[%s8004_s0 + $0x4c] sm:$0x33 pattern:$0x75316420] }
0x1010   :  { %3299 = vmatpush1.bf16.msra.mxu0 %v7087_v27  ;;  %4935 = vmatprep.mubr.msk.bf16.mxu0 %vm264_vm0, %v3251_v26  ;;  %v5931_v26 = vld [vmem:[%s8007_s3 + $0x128] sm:$0xff]  }
0x1011   :  { %3300 = vmatprep.subr.bf16.mxu0 %v6046_v1 }
0x1014   :  { %3301 = vmatpush1.bf16.msra.mxu0 %v7095_v62 }
0x1015   :  { %3302 = vmatprep.subr.bf16.mxu0 %v6046_v1 }
0x1018   :  { %3303 = vmatpush1.bf16.msra.mxu0 %v7102_v2 }
0x1019   :  { %3304 = vmatprep.subr.bf16.mxu0 %v6046_v1 }
0x101c   :  { %3305 = vmatpush1.bf16.msra.mxu0 %v7109_v0 }
0x101d   :  { %3306 = vmatprep.subr.bf16.mxu0 %v6046_v1 }
0x1020   :  { %3307 = vmatpush1.bf16.msra.mxu0 %v7231_v34 }
0x1021   :  { %3308 = vmatprep.subr.bf16.mxu0 %v6046_v1 }
0x1024   :  { %3309 = vmatpush1.bf16.msra.mxu0 %v7238_v46 }
0x1025   :  { %3310 = vmatprep.subr.bf16.mxu0 %v6046_v1 }
0x1028   :  { %3311 = vmatpush1.bf16.msra.mxu0 %v7245_v47  ;;  %v5457_v32 = vpop.f32.mrb[100].mxu1 }
0x1029   :  { %3312 = vmatprep.subr.bf16.mxu0 %v6046_v1  ;;  %v5458_v36 = vpop.f32.mrb[101].mxu1 }
0x102a   :  { %v5459_v37 = vadd.f32 %v5458_v36, %v5457_v32  ;;  %v5460_v39 = vpop.f32.mrb[102].mxu1  ;;  %v3594_v32 = vrot.slane %v4954_v60, %v6248_v33 }
0x102b   :  { %v5461_v16 = vpop.f32.mrb[103].mxu1 }
0x102c   :  { %3313 = vmatpush1.bf16.msra.mxu0 %v7252_v48  ;;  %v3293_v22 = vadd.f32 %v7430_v20, %v5459_v37 }
0x102d   :  { %3314 = vmatprep.subr.bf16.mxu0 %v6046_v1 }
0x1030   :  { %3315 = vmatpush1.bf16.msra.mxu0 %v7259_v50 }
0x1031   :  { %5466 = vmatprep.subr.bf16.mxu0 %v7125_v9 }
0x1033   :  { %3331 = vmatmul.mubr.bf16.vlgmr.msra.gmra.mrb[104].mxu0 %v3250_v61  ;;  %v3587_v61 = vcombine.high %v4954_v60, %v4954_v60 }
0x1034   :  { %5467 = vmatpush3.bf16.msra.mxu0 %v7131_v10  ;;  %3466 = vmatprep.mubr.bf16.mxu0 %v3425_v38 }
0x1035   :  { %5468 = vmatprep.subr.bf16.mxu0 %v7137_v11  ;;  %v3601_v4 = vrot.slane %v3587_v61, %v6248_v33 }
0x1038   :  { %5469 = vmatpush3.bf16.msra.mxu0 %v7143_v12 }
0x1039   :  { %5470 = vmatprep.subr.bf16.mxu0 %v7149_v15 }
0x103c   :  { %5471 = vmatpush3.bf16.msra.mxu0 %v7155_v5 }
0x103d   :  { %5472 = vmatprep.subr.bf16.mxu0 %v7161_v6 }
0x1040   :  { %5473 = vmatpush3.bf16.msra.mxu0 %v7167_v8 }
0x1041   :  { %5474 = vmatprep.subr.bf16.mxu0 %v7173_v3 }
0x1044   :  { %5475 = vmatpush3.bf16.msra.mxu0 %v7179_v13 }
0x1045   :  { %5476 = vmatprep.subr.bf16.mxu0 %v7185_v30 }
0x1048   :  { %5477 = vmatpush3.bf16.msra.mxu0 %v7191_v31 }
0x1049   :  { %5478 = vmatprep.subr.bf16.mxu0 %v7277_v51 }
0x104c   :  { %5479 = vmatpush3.bf16.msra.mxu0 %v7283_v52 }
0x104d   :  { %5480 = vmatprep.subr.bf16.mxu0 %v7289_v56 }
0x1050   :  { %5481 = vmatpush3.bf16.msra.mxu0 %v7295_v53 }
0x1051   :  { %5790 = vmatprep.subr.bf16.mxu0 %v6048_v45 }
0x1053   :  { %3467 = vmatmul.mubr.bf16.vlgmr.msra.gmra.mrb[108].mxu0 %v3418_v28 }
0x1054   :  { %5794 = vmatprep.mubr.msk.bf16.mxu0 %vm6049_vm1, %v6048_v45  ;;  %5791 = vmatpush3.bf16.msra.mxu0 %v5930_v49 }
0x1055   :  { %5792 = vmatprep.subr.bf16.mxu0 %v6048_v45 }
0x1058   :  { %5793 = vmatpush3.bf16.msra.mxu0 %v5931_v26 }
0x1059   :  { %3650 = vmatprep.subr.bf16.mxu0 %v6046_v1 }
0x10e2   :  { %v3218_v35 = vpop.f32.mrb[100].mxu0 }
0x10e3   :  { %v7485_v44 = vadd.f32 %v3218_v35, %v7425_v42  ;;  %v5780_v54 = vpop.f32.mrb[101].mxu0  ;;  %v3426_v42 = vcombine.high %v3418_v28, %v3418_v28 }
0x10e4   :  { %v3221_v58 = vpop.f32.mrb[102].mxu0 }
0x10e5   :  { %v5781_v19 = vpop.f32.mrb[103].mxu0 }
0x10e6   :  { %v3603_v19 = vcombine.high %v3601_v4, %v3601_v4 }
0x1106   :  { %v3332_v23 = vpop.f32.mrb[104].mxu0 }
0x1107   :  { %v3333_v55 = vadd.f32 %v3332_v23, %v3293_v22  ;;  %v3334_v40 = vpop.f32.mrb[105].mxu0  ;;  %v5932_v23 = vld [vmem:[%s8007_s3 + $0x130] sm:$0xff]  }
0x1108   :  { %v3335_v41 = vpop.f32.mrb[106].mxu0 }
0x1109   :  { %v3338_v43 = vmax.f32 %v3333_v55, 0.0  ;;  %v3336_v14 = vpop.f32.mrb[107].mxu0 }
0x110b   :  { %v3339_v25 = vpack.c.bf16 %v3338_v43, %v3338_v43 }
0x110d   :  { %5787 = vmatmul.mubr.msk.bf16.vlgmr.msra.gmra.mrb[104].mxu1 %vm486_vm2, %v3339_v25  ;;  %v4964_v25 = vld.sshfl [vmem:[%s8004_s0 + $0x50] sm:$0x33 pattern:$0x75316420] }
0x110e   :  { %3475 = vmatpush1.bf16.msra.mxu1 %v7087_v27  ;;  %4945 = vmatprep.mubr.msk.bf16.mxu1 %vm264_vm0, %v3427_v17  ;;  %v5933_v17 = vld [vmem:[%s8007_s3 + $0x138] sm:$0xff]  }
0x110f   :  { %3476 = vmatprep.subr.bf16.mxu1 %v6046_v1 }
0x1112   :  { %3477 = vmatpush1.bf16.msra.mxu1 %v7095_v62 }
0x1113   :  { %3478 = vmatprep.subr.bf16.mxu1 %v6046_v1 }
0x1116   :  { %3479 = vmatpush1.bf16.msra.mxu1 %v7102_v2 }
0x1117   :  { %3480 = vmatprep.subr.bf16.mxu1 %v6046_v1 }
0x111a   :  { %3481 = vmatpush1.bf16.msra.mxu1 %v7109_v0 }
0x111b   :  { %3482 = vmatprep.subr.bf16.mxu1 %v6046_v1 }
0x111e   :  { %3483 = vmatpush1.bf16.msra.mxu1 %v7231_v34 }
0x111f   :  { %3484 = vmatprep.subr.bf16.mxu1 %v6046_v1 }
0x1122   :  { %3485 = vmatpush1.bf16.msra.mxu1 %v7238_v46 }
0x1123   :  { %3486 = vmatprep.subr.bf16.mxu1 %v6046_v1 }
0x1126   :  { %3487 = vmatpush1.bf16.msra.mxu1 %v7245_v47  ;;  %v5482_v57 = vpop.f32.mrb[108].mxu0 }
0x1127   :  { %3488 = vmatprep.subr.bf16.mxu1 %v6046_v1  ;;  %v5483_v29 = vpop.f32.mrb[109].mxu0 }
0x1128   :  { %v5484_v59 = vadd.f32 %v5483_v29, %v5482_v57  ;;  %v5485_v63 = vpop.f32.mrb[110].mxu0  ;;  %v3770_v57 = vrot.slane %v4964_v25, %v6248_v33 }
0x1129   :  { %v5486_v21 = vpop.f32.mrb[111].mxu0 }
0x112a   :  { %3489 = vmatpush1.bf16.msra.mxu1 %v7252_v48  ;;  %v3469_v24 = vadd.f32 %v7430_v20, %v5484_v59 }
0x112b   :  { %3490 = vmatprep.subr.bf16.mxu1 %v6046_v1 }
0x112e   :  { %3491 = vmatpush1.bf16.msra.mxu1 %v7259_v50 }
0x112f   :  { %5491 = vmatprep.subr.bf16.mxu1 %v7125_v9 }
0x1131   :  { %3507 = vmatmul.mubr.bf16.vlgmr.msra.gmra.mrb[108].mxu1 %v3426_v42  ;;  %v3763_v42 = vcombine.high %v4964_v25, %v4964_v25  ;;  %v7737_v25 = vld [vmem:[%s8005_s1 + $0x18] sm:$0xff]  }
0x1132   :  { %5492 = vmatpush3.bf16.msra.mxu1 %v7131_v10  ;;  %3642 = vmatprep.mubr.bf16.mxu1 %v3601_v4 }
0x1133   :  { %5493 = vmatprep.subr.bf16.mxu1 %v7137_v11  ;;  %v3777_v49 = vrot.slane %v3763_v42, %v6248_v33  ;;  %v7743_v42 = vld [vmem:[%s8005_s1 + $0x60] sm:$0xff]  }
0x1136   :  { %5494 = vmatpush3.bf16.msra.mxu1 %v7143_v12 }
0x1137   :  { %5495 = vmatprep.subr.bf16.mxu1 %v7149_v15 }
0x113a   :  { %5496 = vmatpush3.bf16.msra.mxu1 %v7155_v5 }
0x113b   :  { %5497 = vmatprep.subr.bf16.mxu1 %v7161_v6 }
0x113e   :  { %5498 = vmatpush3.bf16.msra.mxu1 %v7167_v8 }
0x113f   :  { %5499 = vmatprep.subr.bf16.mxu1 %v7173_v3 }
0x1142   :  { %5500 = vmatpush3.bf16.msra.mxu1 %v7179_v13 }
0x1143   :  { %5501 = vmatprep.subr.bf16.mxu1 %v7185_v30 }
0x1146   :  { %5502 = vmatpush3.bf16.msra.mxu1 %v7191_v31 }
0x1147   :  { %5503 = vmatprep.subr.bf16.mxu1 %v7277_v51 }
0x114a   :  { %5504 = vmatpush3.bf16.msra.mxu1 %v7283_v52 }
0x114b   :  { %5505 = vmatprep.subr.bf16.mxu1 %v7289_v56 }
0x114e   :  { %5506 = vmatpush3.bf16.msra.mxu1 %v7295_v53 }
0x114f   :  { %5798 = vmatprep.subr.bf16.mxu1 %v6048_v45 }
0x1151   :  { %3643 = vmatmul.mubr.bf16.vlgmr.msra.gmra.mrb[112].mxu1 %v3594_v32 }
0x1152   :  { %5802 = vmatprep.mubr.msk.bf16.mxu1 %vm6049_vm1, %v6048_v45  ;;  %5799 = vmatpush3.bf16.msra.mxu1 %v5932_v23  ;;  %v7657_v23 = vld [vmem:[%s8005_s1 + $0x80] sm:$0xff]  }
0x1153   :  { %5800 = vmatprep.subr.bf16.mxu1 %v6048_v45 }
0x1156   :  { %5801 = vmatpush3.bf16.msra.mxu1 %v5933_v17  ;;  %v7731_v17 = vld [vmem:[%s8005_s1 + $0x58] sm:$0xff]  }
0x1157   :  { %3826 = vmatprep.subr.bf16.mxu1 %v6046_v1 }
0x11e0   :  { %v3394_v36 = vpop.f32.mrb[104].mxu1 }
0x11e1   :  { %v7540_v37 = vadd.f32 %v3394_v36, %v7485_v44  ;;  %v5788_v39 = vpop.f32.mrb[105].mxu1  ;;  %v3602_v44 = vcombine.high %v3594_v32, %v3594_v32 }
0x11e2   :  { %v3397_v16 = vpop.f32.mrb[106].mxu1 }
0x11e3   :  { %v5789_v18 = vpop.f32.mrb[107].mxu1 }
0x11e4   :  { %v3779_v18 = vcombine.high %v3777_v49, %v3777_v49 }
0x1204   :  { %v3508_v7 = vpop.f32.mrb[108].mxu1 }
0x1205   :  { %v3509_v38 = vadd.f32 %v3508_v7, %v3469_v24  ;;  %v3510_v28 = vpop.f32.mrb[109].mxu1 }
0x1206   :  { %v3511_v35 = vpop.f32.mrb[110].mxu1 }
0x1207   :  { %v3514_v54 = vmax.f32 %v3509_v38, 0.0  ;;  %v3512_v58 = vpop.f32.mrb[111].mxu1 }
0x1209   :  { %v3515_v22 = vpack.c.bf16 %v3514_v54, %v3514_v54 }
0x120b   :  { %5795 = vmatmul.mubr.msk.bf16.vlgmr.msra.gmra.mrb[112].mxu0 %vm486_vm2, %v3515_v22 }
0x120c   :  { %3651 = vmatpush1.bf16.msra.mxu0 %v7087_v27  ;;  %4955 = vmatprep.mubr.msk.bf16.mxu0 %vm264_vm0, %v3603_v19 }
0x120d   :  { %3652 = vmatprep.subr.bf16.mxu0 %v6046_v1 }
0x1210   :  { %3653 = vmatpush1.bf16.msra.mxu0 %v7095_v62 }
0x1211   :  { %3654 = vmatprep.subr.bf16.mxu0 %v6046_v1 }
0x1214   :  { %3655 = vmatpush1.bf16.msra.mxu0 %v7102_v2 }
0x1215   :  { %3656 = vmatprep.subr.bf16.mxu0 %v6046_v1 }
0x1218   :  { %3657 = vmatpush1.bf16.msra.mxu0 %v7109_v0 }
0x1219   :  { %3658 = vmatprep.subr.bf16.mxu0 %v6046_v1 }
0x121c   :  { %3659 = vmatpush1.bf16.msra.mxu0 %v7231_v34 }
0x121d   :  { %3660 = vmatprep.subr.bf16.mxu0 %v6046_v1 }
0x1220   :  { %3661 = vmatpush1.bf16.msra.mxu0 %v7238_v46 }
0x1221   :  { %3662 = vmatprep.subr.bf16.mxu0 %v6046_v1 }
0x1224   :  { %3663 = vmatpush1.bf16.msra.mxu0 %v7245_v47  ;;  %v5507_v55 = vpop.f32.mrb[112].mxu1 }
0x1225   :  { %3664 = vmatprep.subr.bf16.mxu0 %v6046_v1  ;;  %v5508_v40 = vpop.f32.mrb[113].mxu1 }
0x1226   :  { %v5509_v41 = vadd.f32 %v5508_v40, %v5507_v55  ;;  %v5510_v43 = vpop.f32.mrb[114].mxu1  ;;  %v7665_v55 = vld [vmem:[%s8005_s1 + $0x88] sm:$0xff]   ;;  %v7672_v40 = vld [vmem:[%s8005_s1 + $0x90] sm:$0xff]  }
0x1227   :  { %v5511_v14 = vpop.f32.mrb[115].mxu1 }
0x1228   :  { %3665 = vmatpush1.bf16.msra.mxu0 %v7252_v48  ;;  %v3645_v60 = vadd.f32 %v7430_v20, %v5509_v41  ;;  %v7679_v41 = vld [vmem:[%s8005_s1 + $0x98] sm:$0xff]   ;;  %v7725_v14 = vld [vmem:[%s8005_s1 + $0x10] sm:$0xff]  }
0x1229   :  { %3666 = vmatprep.subr.bf16.mxu0 %v6046_v1 }
0x122c   :  { %3667 = vmatpush1.bf16.msra.mxu0 %v7259_v50 }
0x122d   :  { %5516 = vmatprep.subr.bf16.mxu0 %v7125_v9 }
0x122f   :  { %3683 = vmatmul.mubr.bf16.vlgmr.msra.gmra.mrb[116].mxu0 %v3602_v44 }
0x1230   :  { %5517 = vmatpush3.bf16.msra.mxu0 %v7131_v10  ;;  %3818 = vmatprep.mubr.bf16.mxu0 %v3777_v49  ;;  %v7749_v49 = vld [vmem:[%s8005_s1 + $0x20] sm:$0xff]  }
0x1231   :  { %5518 = vmatprep.subr.bf16.mxu0 %v7137_v11 }
0x1234   :  { %5519 = vmatpush3.bf16.msra.mxu0 %v7143_v12 }
0x1235   :  { %5520 = vmatprep.subr.bf16.mxu0 %v7149_v15 }
0x1238   :  { %5521 = vmatpush3.bf16.msra.mxu0 %v7155_v5 }
0x1239   :  { %5522 = vmatprep.subr.bf16.mxu0 %v7161_v6 }
0x123c   :  { %5523 = vmatpush3.bf16.msra.mxu0 %v7167_v8 }
0x123d   :  { %5524 = vmatprep.subr.bf16.mxu0 %v7173_v3 }
0x1240   :  { %5525 = vmatpush3.bf16.msra.mxu0 %v7179_v13 }
0x1241   :  { %5526 = vmatprep.subr.bf16.mxu0 %v7185_v30 }
0x1244   :  { %5527 = vmatpush3.bf16.msra.mxu0 %v7191_v31 }
0x1245   :  { %5528 = vmatprep.subr.bf16.mxu0 %v7277_v51 }
0x1248   :  { %5529 = vmatpush3.bf16.msra.mxu0 %v7283_v52 }
0x1249   :  { %5530 = vmatprep.subr.bf16.mxu0 %v7289_v56 }
0x124c   :  { %5531 = vmatpush3.bf16.msra.mxu0 %v7295_v53 }
0x124d   :  { %5806 = vmatprep.subr.bf16.mxu0 %v6048_v45 }
0x124f   :  { %3819 = vmatmul.mubr.bf16.vlgmr.msra.gmra.mrb[120].mxu0 %v3770_v57 }
0x1250   :  { %5810 = vmatprep.mubr.msk.bf16.mxu0 %vm6049_vm1, %v6048_v45 }
0x12de   :  { %v3570_v29 = vpop.f32.mrb[112].mxu0 }
0x12df   :  { %v7595_v59 = vadd.f32 %v3570_v29, %v7540_v37  ;;  %v5796_v63 = vpop.f32.mrb[113].mxu0  ;;  %v7761_v29 = vld [vmem:[%s8005_s1 + $0x28] sm:$0xff]  }
0x12e0   :  { %v3573_v21 = vpop.f32.mrb[114].mxu0 }
0x12e1   :  { %v5797_v26 = vpop.f32.mrb[115].mxu0 }
0x1302   :  { %v3684_v61 = vpop.f32.mrb[116].mxu0 }
0x1303   :  { %v3685_v4 = vadd.f32 %v3684_v61, %v3645_v60  ;;  %v3686_v32 = vpop.f32.mrb[117].mxu0 }
0x1304   :  { %v3687_v36 = vpop.f32.mrb[118].mxu0 }
0x1305   :  { %v3690_v39 = vmax.f32 %v3685_v4, 0.0  ;;  %v3688_v16 = vpop.f32.mrb[119].mxu0 }
0x1307   :  { %v3691_v24 = vpack.c.bf16 %v3690_v39, %v3690_v39 }
0x1309   :  { %5803 = vmatmul.mubr.msk.bf16.vlgmr.msra.gmra.mrb[116].mxu1 %vm486_vm2, %v3691_v24 }
0x130a   :  { %3827 = vmatpush1.bf16.msra.mxu1 %v7087_v27  ;;  %4965 = vmatprep.mubr.msk.bf16.mxu1 %vm264_vm0, %v3779_v18  ;;  %v3778_v27 = vcombine.high %v3770_v57, %v3770_v57  ;;  %v7755_v57 = vld [vmem:[%s8005_s1 + $0x68] sm:$0xff]  }
0x130b   :  { %3828 = vmatprep.subr.bf16.mxu1 %v6046_v1 }
0x130e   :  { %3829 = vmatpush1.bf16.msra.mxu1 %v7095_v62  ;;  %v5934_v62 = vld [vmem:[%s8007_s3 + $0x140] sm:$0xff]  }
0x130f   :  { %3830 = vmatprep.subr.bf16.mxu1 %v6046_v1  ;;  %5807 = vmatpush3.bf16.msra.mxu0 %v5934_v62 }
0x1310   :  { %5808 = vmatprep.subr.bf16.mxu0 %v6048_v45 }
0x1312   :  { %3831 = vmatpush1.bf16.msra.mxu1 %v7102_v2 }
0x1313   :  { %3832 = vmatprep.subr.bf16.mxu1 %v6046_v1 }
0x1316   :  { %3833 = vmatpush1.bf16.msra.mxu1 %v7109_v0 }
0x1317   :  { %3834 = vmatprep.subr.bf16.mxu1 %v6046_v1 }
0x131a   :  { %3835 = vmatpush1.bf16.msra.mxu1 %v7231_v34 }
0x131b   :  { %3836 = vmatprep.subr.bf16.mxu1 %v6046_v1 }
0x131e   :  { %3837 = vmatpush1.bf16.msra.mxu1 %v7238_v46 }
0x131f   :  { %3838 = vmatprep.subr.bf16.mxu1 %v6046_v1 }
0x1322   :  { %3839 = vmatpush1.bf16.msra.mxu1 %v7245_v47  ;;  %v5532_v2 = vpop.f32.mrb[120].mxu0 }
0x1323   :  { %3840 = vmatprep.subr.bf16.mxu1 %v6046_v1  ;;  %v5533_v0 = vpop.f32.mrb[121].mxu0 }
0x1326   :  { %3841 = vmatpush1.bf16.msra.mxu1 %v7252_v48 }
0x1327   :  { %3842 = vmatprep.subr.bf16.mxu1 %v6046_v1 }
0x132a   :  { %3843 = vmatpush1.bf16.msra.mxu1 %v7259_v50 }
0x132b   :  { %5541 = vmatprep.subr.bf16.mxu1 %v7125_v9  ;;  %v5534_v9 = vadd.f32 %v5533_v0, %v5532_v2 }
0x132d   :  { %3859 = vmatmul.mubr.bf16.vlgmr.msra.gmra.mrb[120].mxu1 %v3778_v27  ;;  %v3821_v7 = vadd.f32 %v7430_v20, %v5534_v9 }
0x132e   :  { %5542 = vmatpush3.bf16.msra.mxu1 %v7131_v10  ;;  %v5535_v10 = vpop.f32.mrb[122].mxu0 }
0x132f   :  { %5543 = vmatprep.subr.bf16.mxu1 %v7137_v11  ;;  %v5536_v11 = vpop.f32.mrb[123].mxu0 }
0x1332   :  { %5544 = vmatpush3.bf16.msra.mxu1 %v7143_v12  ;;  %v5935_v12 = vld [vmem:[%s8007_s3 + $0x148] sm:$0xff]  }
0x1333   :  { %5545 = vmatprep.subr.bf16.mxu1 %v7149_v15  ;;  %5809 = vmatpush3.bf16.msra.mxu0 %v5935_v12  ;;  %v4974_v15 = vld.sshfl [vmem:[%s8004_s0 + $0x54] sm:$0x33 pattern:$0x75316420] }
0x1334   :  { %4002 = vmatprep.subr.bf16.mxu0 %v6046_v1 }
0x1336   :  { %5546 = vmatpush3.bf16.msra.mxu1 %v7155_v5  ;;  %v3939_v5 = vcombine.high %v4974_v15, %v4974_v15 }
0x1337   :  { %5547 = vmatprep.subr.bf16.mxu1 %v7161_v6 }
0x1338   :  { %v3953_v6 = vrot.slane %v3939_v5, %v6248_v33  ;;  %v7808_v5 = vld [vmem:[%s8005_s1 + $0xa8] sm:$0xff]  }
0x133a   :  { %5548 = vmatpush3.bf16.msra.mxu1 %v7167_v8  ;;  %v3946_v8 = vrot.slane %v4974_v15, %v6248_v33  ;;  %3994 = vmatprep.mubr.bf16.mxu1 %v3953_v6  ;;  %v3955_v22 = vcombine.high %v3953_v6, %v3953_v6  ;;  %v7801_v15 = vld [vmem:[%s8005_s1 + $0xa0] sm:$0xff]   ;;  %v7815_v6 = vld [vmem:[%s8005_s1 + $0xb0] sm:$0xff]  }
0x133b   :  { %5549 = vmatprep.subr.bf16.mxu1 %v7173_v3 }
0x133c   :  { %v3954_v43 = vcombine.high %v3946_v8, %v3946_v8 }
0x133e   :  { %5550 = vmatpush3.bf16.msra.mxu1 %v7179_v13 }
0x133f   :  { %5551 = vmatprep.subr.bf16.mxu1 %v7185_v30 }
0x1342   :  { %5552 = vmatpush3.bf16.msra.mxu1 %v7191_v31 }
0x1343   :  { %5553 = vmatprep.subr.bf16.mxu1 %v7277_v51 }
0x1346   :  { %5554 = vmatpush3.bf16.msra.mxu1 %v7283_v52 }
0x1347   :  { %5555 = vmatprep.subr.bf16.mxu1 %v7289_v56 }
0x134a   :  { %5556 = vmatpush3.bf16.msra.mxu1 %v7295_v53 }
0x134b   :  { %5814 = vmatprep.subr.bf16.mxu1 %v6048_v45 }
0x134d   :  { %3995 = vmatmul.mubr.bf16.vlgmr.msra.gmra.mrb[124].mxu1 %v3946_v8  ;;  %v7822_v8 = vld [vmem:[%s8005_s1 + $0xb8] sm:$0xff]  }
0x134e   :  { %5818 = vmatprep.mubr.msk.bf16.mxu1 %vm6049_vm1, %v6048_v45 }
0x13dc   :  { %v3746_v3 = vpop.f32.mrb[116].mxu1 }
0x13dd   :  { %v7650_v13 = vadd.f32 %v3746_v3, %v7595_v59  ;;  %v5804_v30 = vpop.f32.mrb[117].mxu1  ;;  %v5936_v59 = vld [vmem:[%s8007_s3 + $0x150] sm:$0xff]  }
0x13de   :  { %v3749_v31 = vpop.f32.mrb[118].mxu1  ;;  %5815 = vmatpush3.bf16.msra.mxu1 %v5936_v59  ;;  %v7847_v30 = vld [vmem:[%s8005_s1 + $0x70] sm:$0xff]  }
0x13df   :  { %v5805_v37 = vpop.f32.mrb[119].mxu1  ;;  %5816 = vmatprep.subr.bf16.mxu1 %v6048_v45  ;;  %v7853_v31 = vld [vmem:[%s8005_s1 + $0x30] sm:$0xff]  }
0x13e0   :  { %v7859_v37 = vld [vmem:[%s8005_s1 + $0x78] sm:$0xff]  }
0x1400   :  { %v3860_v38 = vpop.f32.mrb[120].mxu1 }
0x1401   :  { %v3861_v28 = vadd.f32 %v3860_v38, %v3821_v7  ;;  %v3862_v35 = vpop.f32.mrb[121].mxu1  ;;  %v7865_v7 = vld [vmem:[%s8005_s1 + $0x38] sm:$0xff]   ;;  %v5938_v38 = vld [vmem:[%s8007_s3 + $0x160] sm:$0xff]  }
0x1402   :  { %v3863_v54 = vpop.f32.mrb[122].mxu1 }
0x1403   :  { %v3866_v58 = vmax.f32 %v3861_v28, 0.0  ;;  %v3864_v19 = vpop.f32.mrb[123].mxu1 }
0x1405   :  { %v3867_v44 = vpack.c.bf16 %v3866_v58, %v3866_v58 }
0x1407   :  { %5811 = vmatmul.mubr.msk.bf16.vlgmr.msra.gmra.mrb[124].mxu0 %vm486_vm2, %v3867_v44  ;;  %v4994_v44 = vld.sshfl [vmem:[%s8004_s0 + $0x5c] sm:$0x33 pattern:$0x75316420] }
0x1408   :  { %4003 = vmatpush1.bf16.msra.mxu0 %v7657_v23  ;;  %4975 = vmatprep.mubr.msk.bf16.mxu0 %vm264_vm0, %v3955_v22  ;;  %v5939_v22 = vld [vmem:[%s8007_s3 + $0x168] sm:$0xff]  }
0x1409   :  { %4004 = vmatprep.subr.bf16.mxu0 %v6046_v1 }
0x140c   :  { %4005 = vmatpush1.bf16.msra.mxu0 %v7665_v55 }
0x140d   :  { %4006 = vmatprep.subr.bf16.mxu0 %v6046_v1 }
0x1410   :  { %4007 = vmatpush1.bf16.msra.mxu0 %v7672_v40 }
0x1411   :  { %4008 = vmatprep.subr.bf16.mxu0 %v6046_v1 }
0x1414   :  { %4009 = vmatpush1.bf16.msra.mxu0 %v7679_v41 }
0x1415   :  { %4010 = vmatprep.subr.bf16.mxu0 %v6046_v1 }
0x1418   :  { %4011 = vmatpush1.bf16.msra.mxu0 %v7231_v34  ;;  %v7695_v34 = vld [vmem:[%s8005_s1 + $0x40] sm:$0xff]  }
0x1419   :  { %4012 = vmatprep.subr.bf16.mxu0 %v6046_v1 }
0x141c   :  { %4013 = vmatpush1.bf16.msra.mxu0 %v7238_v46  ;;  %v7701_v46 = vld [vmem:[%s8005_s1] sm:$0xff]  }
0x141d   :  { %4014 = vmatprep.subr.bf16.mxu0 %v6046_v1 }
0x1420   :  { %4015 = vmatpush1.bf16.msra.mxu0 %v7245_v47  ;;  %v7707_v47 = vld [vmem:[%s8005_s1 + $0x48] sm:$0xff]   ;;  %v5557_v63 = vpop.f32.mrb[124].mxu1 }
0x1421   :  { %4016 = vmatprep.subr.bf16.mxu0 %v6046_v1  ;;  %v5558_v21 = vpop.f32.mrb[125].mxu1 }
0x1422   :  { %v5559_v26 = vadd.f32 %v5558_v21, %v5557_v63  ;;  %v5560_v60 = vpop.f32.mrb[126].mxu1  ;;  %v4298_v63 = vrot.slane %v4994_v44, %v6248_v33 }
0x1424   :  { %4017 = vmatpush1.bf16.msra.mxu0 %v7252_v48  ;;  %v7713_v48 = vld [vmem:[%s8005_s1 + $0x8] sm:$0xff]   ;;  %v3997_v24 = vadd.f32 %v7430_v20, %v5559_v26 }
0x1425   :  { %4018 = vmatprep.subr.bf16.mxu0 %v6046_v1 }
0x1428   :  { %4019 = vmatpush1.bf16.msra.mxu0 %v7259_v50  ;;  %v7719_v50 = vld [vmem:[%s8005_s1 + $0x50] sm:$0xff]  }
0x1429   :  { %5566 = vmatprep.subr.bf16.mxu0 %v7695_v34 }
0x142b   :  { %4035 = vmatmul.mubr.bf16.vlgmr.msra.gmra.mrb[128].mxu0 %v3954_v43  ;;  %v4291_v43 = vcombine.high %v4994_v44, %v4994_v44 }
0x142c   :  { %5567 = vmatpush3.bf16.msra.mxu0 %v7701_v46 }
0x142d   :  { %5568 = vmatprep.subr.bf16.mxu0 %v7707_v47  ;;  %v4305_v59 = vrot.slane %v4291_v43, %v6248_v33 }
0x1430   :  { %5569 = vmatpush3.bf16.msra.mxu0 %v7713_v48 }
0x1431   :  { %5570 = vmatprep.subr.bf16.mxu0 %v7719_v50 }
0x1434   :  { %5571 = vmatpush3.bf16.msra.mxu0 %v7725_v14 }
0x1435   :  { %5572 = vmatprep.subr.bf16.mxu0 %v7731_v17 }
0x1438   :  { %5573 = vmatpush3.bf16.msra.mxu0 %v7737_v25 }
0x1439   :  { %5574 = vmatprep.subr.bf16.mxu0 %v7743_v42 }
0x143c   :  { %5575 = vmatpush3.bf16.msra.mxu0 %v7749_v49 }
0x143d   :  { %5576 = vmatprep.subr.bf16.mxu0 %v7755_v57 }
0x1440   :  { %5577 = vmatpush3.bf16.msra.mxu0 %v7761_v29 }
0x1441   :  { %5578 = vmatprep.subr.bf16.mxu0 %v7277_v51  ;;  %v5561_v51 = vpop.f32.mrb[127].mxu1 }
0x1444   :  { %5579 = vmatpush3.bf16.msra.mxu0 %v7283_v52  ;;  %v5937_v52 = vld [vmem:[%s8007_s3 + $0x158] sm:$0xff]  }
0x1445   :  { %5580 = vmatprep.subr.bf16.mxu0 %v7289_v56  ;;  %5817 = vmatpush3.bf16.msra.mxu1 %v5937_v52  ;;  %v4984_v56 = vld.sshfl [vmem:[%s8004_s0 + $0x58] sm:$0x33 pattern:$0x75316420] }
0x1446   :  { %4178 = vmatprep.subr.bf16.mxu1 %v6046_v1  ;;  %v4122_v4 = vrot.slane %v4984_v56, %v6248_v33 }
0x1448   :  { %5581 = vmatpush3.bf16.msra.mxu0 %v7295_v53  ;;  %v4115_v53 = vcombine.high %v4984_v56, %v4984_v56  ;;  %v4130_v3 = vcombine.high %v4122_v4, %v4122_v4 }
0x1449   :  { %5822 = vmatprep.subr.bf16.mxu0 %v6048_v45 }
0x144a   :  { %v4129_v61 = vrot.slane %v4115_v53, %v6248_v33 }
0x144c   :  { %4170 = vmatprep.mubr.bf16.mxu0 %v4129_v61  ;;  %v4131_v11 = vcombine.high %v4129_v61, %v4129_v61 }
0x144d   :  { %4171 = vmatmul.mubr.bf16.vlgmr.msra.gmra.mrb[132].mxu0 %v4122_v4 }
0x144e   :  { %5826 = vmatprep.mubr.msk.bf16.mxu0 %vm6049_vm1, %v6048_v45  ;;  %5823 = vmatpush3.bf16.msra.mxu0 %v5938_v38 }
0x144f   :  { %5824 = vmatprep.subr.bf16.mxu0 %v6048_v45 }
0x1452   :  { %5825 = vmatpush3.bf16.msra.mxu0 %v5939_v22 }
0x1453   :  { %4354 = vmatprep.subr.bf16.mxu0 %v6046_v1 }
0x14da   :  { %v3922_v32 = vpop.f32.mrb[124].mxu0 }
0x14db   :  { %v7785_v36 = vadd.f32 %v3922_v32, %v7650_v13  ;;  %v5812_v39 = vpop.f32.mrb[125].mxu0  ;;  %v7829_v13 = vld [vmem:[%s8005_s1 + $0xc0] sm:$0xff]  }
0x14dc   :  { %v3925_v16 = vpop.f32.mrb[126].mxu0 }
0x14dd   :  { %v5813_v18 = vpop.f32.mrb[127].mxu0 }
0x14de   :  { %v4307_v18 = vcombine.high %v4305_v59, %v4305_v59 }
0x14fe   :  { %v4036_v27 = vpop.f32.mrb[128].mxu0 }
0x14ff   :  { %v4037_v62 = vadd.f32 %v4036_v27, %v3997_v24  ;;  %v4038_v2 = vpop.f32.mrb[129].mxu0 }
0x1500   :  { %v4039_v0 = vpop.f32.mrb[130].mxu0 }
0x1501   :  { %v4042_v9 = vmax.f32 %v4037_v62, 0.0  ;;  %v4040_v10 = vpop.f32.mrb[131].mxu0 }
0x1503   :  { %v4043_v12 = vpack.c.bf16 %v4042_v9, %v4042_v9 }
0x1505   :  { %5819 = vmatmul.mubr.msk.bf16.vlgmr.msra.gmra.mrb[128].mxu1 %vm486_vm2, %v4043_v12 }
0x1506   :  { %4179 = vmatpush1.bf16.msra.mxu1 %v7657_v23  ;;  %4985 = vmatprep.mubr.msk.bf16.mxu1 %vm264_vm0, %v4131_v11 }
0x1507   :  { %4180 = vmatprep.subr.bf16.mxu1 %v6046_v1 }
0x150a   :  { %4181 = vmatpush1.bf16.msra.mxu1 %v7665_v55 }
0x150b   :  { %4182 = vmatprep.subr.bf16.mxu1 %v6046_v1 }
0x150e   :  { %4183 = vmatpush1.bf16.msra.mxu1 %v7672_v40 }
0x150f   :  { %4184 = vmatprep.subr.bf16.mxu1 %v6046_v1 }
0x1512   :  { %4185 = vmatpush1.bf16.msra.mxu1 %v7679_v41 }
0x1513   :  { %4186 = vmatprep.subr.bf16.mxu1 %v6046_v1 }
0x1516   :  { %4187 = vmatpush1.bf16.msra.mxu1 %v7801_v15 }
0x1517   :  { %4188 = vmatprep.subr.bf16.mxu1 %v6046_v1 }
0x151a   :  { %4189 = vmatpush1.bf16.msra.mxu1 %v7808_v5 }
0x151b   :  { %4190 = vmatprep.subr.bf16.mxu1 %v6046_v1 }
0x151e   :  { %4191 = vmatpush1.bf16.msra.mxu1 %v7815_v6 }
0x151f   :  { %4192 = vmatprep.subr.bf16.mxu1 %v6046_v1 }
0x1520   :  { %v5582_v28 = vpop.f32.mrb[132].mxu0 }
0x1521   :  { %v5583_v35 = vpop.f32.mrb[133].mxu0 }
0x1522   :  { %4193 = vmatpush1.bf16.msra.mxu1 %v7822_v8  ;;  %v5584_v54 = vadd.f32 %v5583_v35, %v5582_v28  ;;  %v5585_v58 = vpop.f32.mrb[134].mxu0 }
0x1523   :  { %4194 = vmatprep.subr.bf16.mxu1 %v6046_v1  ;;  %v5586_v19 = vpop.f32.mrb[135].mxu0  ;;  %v6021_v58 = vld [vmem:[%s8006_s2] ss:$0 sm:$0xff] }
0x1524   :  { %v4173_v56 = vadd.f32 %v7430_v20, %v5584_v54 }
0x1526   :  { %4195 = vmatpush1.bf16.msra.mxu1 %v7829_v13 }
0x1527   :  { %5591 = vmatprep.subr.bf16.mxu1 %v7695_v34 }
0x1529   :  { %4211 = vmatmul.mubr.bf16.vlgmr.msra.gmra.mrb[132].mxu1 %v4130_v3 }
0x152a   :  { %5592 = vmatpush3.bf16.msra.mxu1 %v7701_v46  ;;  %4346 = vmatprep.mubr.bf16.mxu1 %v4305_v59 }
0x152b   :  { %5593 = vmatprep.subr.bf16.mxu1 %v7707_v47 }
0x152e   :  { %5594 = vmatpush3.bf16.msra.mxu1 %v7713_v48 }
0x152f   :  { %5595 = vmatprep.subr.bf16.mxu1 %v7719_v50 }
0x1532   :  { %5596 = vmatpush3.bf16.msra.mxu1 %v7725_v14 }
0x1533   :  { %5597 = vmatprep.subr.bf16.mxu1 %v7731_v17 }
0x1536   :  { %5598 = vmatpush3.bf16.msra.mxu1 %v7737_v25 }
0x1537   :  { %5599 = vmatprep.subr.bf16.mxu1 %v7743_v42 }
0x153a   :  { %5600 = vmatpush3.bf16.msra.mxu1 %v7749_v49 }
0x153b   :  { %5601 = vmatprep.subr.bf16.mxu1 %v7755_v57 }
0x153e   :  { %5602 = vmatpush3.bf16.msra.mxu1 %v7761_v29 }
0x153f   :  { %5603 = vmatprep.subr.bf16.mxu1 %v7847_v30 }
0x1542   :  { %5604 = vmatpush3.bf16.msra.mxu1 %v7853_v31 }
0x1543   :  { %5605 = vmatprep.subr.bf16.mxu1 %v7859_v37 }
0x1546   :  { %5606 = vmatpush3.bf16.msra.mxu1 %v7865_v7 }
0x1547   :  { %5830 = vmatprep.subr.bf16.mxu1 %v6048_v45 }
0x1549   :  { %4347 = vmatmul.mubr.bf16.vlgmr.msra.gmra.mrb[136].mxu1 %v4298_v63 }
0x154a   :  { %5834 = vmatprep.mubr.msk.bf16.mxu1 %vm6049_vm1, %v6048_v45 }
0x15d8   :  { %v4098_v21 = vpop.f32.mrb[128].mxu1 }
0x15d9   :  { %v7885_v26 = vadd.f32 %v4098_v21, %v7785_v36  ;;  %v5820_v60 = vpop.f32.mrb[129].mxu1  ;;  %v4306_v36 = vcombine.high %v4298_v63, %v4298_v63 }
0x15da   :  { %v4101_v51 = vpop.f32.mrb[130].mxu1  ;;  %v4644_v60 = vld [vmem:[%s8009_s5 + $0x10] sm:$0xff] }
0x15db   :  { %v5821_v52 = vpop.f32.mrb[131].mxu1  ;;  %v4645_v51 = vld [vmem:[%s8009_s5 + $0x18] sm:$0xff] }
0x15dc   :  { %v5861_v52 = vpack.c.bf16 %v4645_v51, %v4644_v60 }
0x15fc   :  { %v4212_v53 = vpop.f32.mrb[132].mxu1 }
0x15fd   :  { %v4213_v61 = vadd.f32 %v4212_v53, %v4173_v56  ;;  %v4214_v4 = vpop.f32.mrb[133].mxu1  ;;  %v5013_v53 = vld [vmem:[%s8008_s4] ss:$0 sm:$0xff] }
0x15fe   :  { %v4215_v32 = vpop.f32.mrb[134].mxu1 }
0x15ff   :  { %v4218_v39 = vmax.f32 %v4213_v61, 0.0  ;;  %v4216_v16 = vpop.f32.mrb[135].mxu1 }
0x1601   :  { %v4219_v24 = vpack.c.bf16 %v4218_v39, %v4218_v39 }
0x1603   :  { %5827 = vmatmul.mubr.msk.bf16.vlgmr.msra.gmra.mrb[136].mxu0 %vm486_vm2, %v4219_v24  ;;  %v5014_v24 = vld [vmem:[%s8010_s6] ss:$0 sm:$0xff] }
0x1604   :  { %4355 = vmatpush1.bf16.msra.mxu0 %v7657_v23  ;;  %4995 = vmatprep.mubr.msk.bf16.mxu0 %vm264_vm0, %v4307_v18 }
0x1605   :  { %4356 = vmatprep.subr.bf16.mxu0 %v6046_v1 }
0x1608   :  { %4357 = vmatpush1.bf16.msra.mxu0 %v7665_v55 }
0x1609   :  { %4358 = vmatprep.subr.bf16.mxu0 %v6046_v1 }
0x160c   :  { %4359 = vmatpush1.bf16.msra.mxu0 %v7672_v40 }
0x160d   :  { %4360 = vmatprep.subr.bf16.mxu0 %v6046_v1 }
0x1610   :  { %4361 = vmatpush1.bf16.msra.mxu0 %v7679_v41 }
0x1611   :  { %4362 = vmatprep.subr.bf16.mxu0 %v6046_v1 }
0x1614   :  { %4363 = vmatpush1.bf16.msra.mxu0 %v7801_v15 }
0x1615   :  { %4364 = vmatprep.subr.bf16.mxu0 %v6046_v1 }
0x1618   :  { %4365 = vmatpush1.bf16.msra.mxu0 %v7808_v5 }
0x1619   :  { %4366 = vmatprep.subr.bf16.mxu0 %v6046_v1 }
0x161c   :  { %4367 = vmatpush1.bf16.msra.mxu0 %v7815_v6 }
0x161d   :  { %4368 = vmatprep.subr.bf16.mxu0 %v6046_v1 }
0x1620   :  { %4369 = vmatpush1.bf16.msra.mxu0 %v7822_v8 }
0x1621   :  { %4370 = vmatprep.subr.bf16.mxu0 %v6046_v1 }
0x1624   :  { %4371 = vmatpush1.bf16.msra.mxu0 %v7829_v13 }
0x1625   :  { %5616 = vmatprep.subr.bf16.mxu0 %v7695_v34  ;;  %v5940_v34 = vld [vmem:[%s8007_s3 + $0x170] sm:$0xff]  }
0x1626   :  { %5831 = vmatpush3.bf16.msra.mxu1 %v5940_v34 }
0x1627   :  { %4387 = vmatmul.mubr.bf16.vlgmr.msra.gmra.mrb[140].mxu0 %v4306_v36  ;;  %5832 = vmatprep.subr.bf16.mxu1 %v6048_v45 }
0x1628   :  { %5617 = vmatpush3.bf16.msra.mxu0 %v7701_v46  ;;  %v5607_v46 = vpop.f32.mrb[136].mxu1 }
0x1629   :  { %5618 = vmatprep.subr.bf16.mxu0 %v7707_v47  ;;  %v5608_v47 = vpop.f32.mrb[137].mxu1 }
0x162c   :  { %5619 = vmatpush3.bf16.msra.mxu0 %v7713_v48  ;;  %v5609_v48 = vadd.f32 %v5608_v47, %v5607_v46 }
0x162d   :  { %5620 = vmatprep.subr.bf16.mxu0 %v7719_v50  ;;  %v5610_v50 = vpop.f32.mrb[138].mxu1 }
0x162e   :  { %v4349_v9 = vadd.f32 %v7430_v20, %v5609_v48 }
0x1630   :  { %5621 = vmatpush3.bf16.msra.mxu0 %v7725_v14  ;;  %v5611_v14 = vpop.f32.mrb[139].mxu1 }
0x1631   :  { %5622 = vmatprep.subr.bf16.mxu0 %v7731_v17  ;;  %v5941_v17 = vld [vmem:[%s8007_s3 + $0x178] sm:$0xff]  }
0x1632   :  { %5833 = vmatpush3.bf16.msra.mxu1 %v5941_v17 }
0x1633   :  { %4530 = vmatprep.subr.bf16.mxu1 %v6046_v1 }
0x1634   :  { %5623 = vmatpush3.bf16.msra.mxu0 %v7737_v25  ;;  %v5004_v25 = vld.sshfl [vmem:[%s8004_s0 + $0x60] sm:$0x33 pattern:$0x75316420] }
0x1635   :  { %5624 = vmatprep.subr.bf16.mxu0 %v7743_v42  ;;  %v4467_v42 = vcombine.high %v5004_v25, %v5004_v25 }
0x1638   :  { %5625 = vmatpush3.bf16.msra.mxu0 %v7749_v49  ;;  %v4481_v49 = vrot.slane %v4467_v42, %v6248_v33 }
0x1639   :  { %5626 = vmatprep.subr.bf16.mxu0 %v7755_v57  ;;  %v4474_v57 = vrot.slane %v5004_v25, %v6248_v33 }
0x163a   :  { %4522 = vmatprep.mubr.bf16.mxu0 %v4481_v49  ;;  %v4483_v33 = vcombine.high %v4481_v49, %v4481_v49 }
0x163b   :  { %v4482_v20 = vcombine.high %v4474_v57, %v4474_v57 }
0x163c   :  { %5627 = vmatpush3.bf16.msra.mxu0 %v7761_v29 }
0x163d   :  { %5628 = vmatprep.subr.bf16.mxu0 %v7847_v30 }
0x1640   :  { %5629 = vmatpush3.bf16.msra.mxu0 %v7853_v31 }
0x1641   :  { %5630 = vmatprep.subr.bf16.mxu0 %v7859_v37 }
0x1644   :  { %5631 = vmatpush3.bf16.msra.mxu0 %v7865_v7 }
0x1645   :  { %5838 = vmatprep.subr.bf16.mxu0 %v6048_v45 }
0x1647   :  { %4523 = vmatmul.mubr.bf16.vlgmr.msra.gmra.mrb[144].mxu0 %v4474_v57 }
0x1648   :  { %5842 = vmatprep.mubr.msk.bf16.mxu0 %vm6049_vm1, %v6048_v45 }
0x16d6   :  { %v4274_v29 = vpop.f32.mrb[136].mxu0 }
0x16d7   :  { %v4280_v27 = vadd.f32 %v4274_v29, %v7885_v26  ;;  %v5828_v62 = vpop.f32.mrb[137].mxu0 }
0x16d8   :  { %v4277_v2 = vpop.f32.mrb[138].mxu0 }
0x16d9   :  { %v5829_v0 = vpop.f32.mrb[139].mxu0 }
0x16fa   :  { %v4388_v10 = vpop.f32.mrb[140].mxu0 }
0x16fb   :  { %v4389_v11 = vadd.f32 %v4388_v10, %v4349_v9  ;;  %v4390_v12 = vpop.f32.mrb[141].mxu0 }
0x16fc   :  { %v4391_v3 = vpop.f32.mrb[142].mxu0 }
0x16fd   :  { %v4394_v30 = vmax.f32 %v4389_v11, 0.0  ;;  %v4392_v31 = vpop.f32.mrb[143].mxu0 }
0x16ff   :  { %v4395_v37 = vpack.c.bf16 %v4394_v30, %v4394_v30 }
0x1701   :  { %5835 = vmatmul.mubr.msk.bf16.vlgmr.msra.gmra.mrb[140].mxu1 %vm486_vm2, %v4395_v37 }
0x1702   :  { %4531 = vmatpush1.bf16.msra.mxu1 %v7657_v23  ;;  %5005 = vmatprep.mubr.msk.bf16.mxu1 %vm264_vm0, %v4483_v33  ;;  %v5942_v23 = vld [vmem:[%s8007_s3 + $0x180] sm:$0xff]  }
0x1703   :  { %4532 = vmatprep.subr.bf16.mxu1 %v6046_v1  ;;  %5839 = vmatpush3.bf16.msra.mxu0 %v5942_v23 }
0x1704   :  { %5840 = vmatprep.subr.bf16.mxu0 %v6048_v45 }
0x1706   :  { %4533 = vmatpush1.bf16.msra.mxu1 %v7665_v55 }
0x1707   :  { %4534 = vmatprep.subr.bf16.mxu1 %v6046_v1 }
0x170a   :  { %4535 = vmatpush1.bf16.msra.mxu1 %v7672_v40 }
0x170b   :  { %4536 = vmatprep.subr.bf16.mxu1 %v6046_v1 }
0x170e   :  { %4537 = vmatpush1.bf16.msra.mxu1 %v7679_v41 }
0x170f   :  { %4538 = vmatprep.subr.bf16.mxu1 %v6046_v1 }
0x1712   :  { %4539 = vmatpush1.bf16.msra.mxu1 %v7801_v15 }
0x1713   :  { %4540 = vmatprep.subr.bf16.mxu1 %v6046_v1 }
0x1716   :  { %4541 = vmatpush1.bf16.msra.mxu1 %v7808_v5 }
0x1717   :  { %4542 = vmatprep.subr.bf16.mxu1 %v6046_v1 }
0x171a   :  { %4543 = vmatpush1.bf16.msra.mxu1 %v7815_v6  ;;  %v5632_v55 = vpop.f32.mrb[144].mxu0  ;;  %v4642_v6 = vld [vmem:[%s8009_s5] sm:$0xff] }
0x171b   :  { %4544 = vmatprep.subr.bf16.mxu1 %v6046_v1  ;;  %v5633_v40 = vpop.f32.mrb[145].mxu0 }
0x171c   :  { %v5634_v41 = vadd.f32 %v5633_v40, %v5632_v55  ;;  %v5635_v15 = vpop.f32.mrb[146].mxu0 }
0x171d   :  { %v5636_v5 = vpop.f32.mrb[147].mxu0 }
0x171e   :  { %4545 = vmatpush1.bf16.msra.mxu1 %v7822_v8  ;;  %v4643_v8 = vld [vmem:[%s8009_s5 + $0x8] sm:$0xff]  ;;  %v4525_v19 = vadd.f32 %v6021_v58, %v5634_v41  ;;  %s6051_s5 = smov [#allocation2]  }
0x171f   :  { %4546 = vmatprep.subr.bf16.mxu1 %v6046_v1  ;;  %v5943_v1 = vld [vmem:[%s8007_s3 + $0x188] sm:$0xff]   ;;  %s4734_s22 = sshll.u32 %s6051_s5, 4  ;;  %s4735_s22 = int_to_ptr.vmem [resolvable:$true] %s4734_s22 }
0x1720   :  { %5841 = vmatpush3.bf16.msra.mxu0 %v5943_v1  ;;  %s6022_s4 = scalar_lea.vmem %s4735_s22, 32  ;;  %p6027_p1 = scmp.lt.s32.totalorder %s4735_s22, %s4735_s22 }
0x1721   :  { %p6023_p0 = scmp.ne.s32.totalorder %s4735_s22, %s6022_s4  ;;  %p6028_p2 = scmp.lt.s32.totalorder %s6022_s4, %s6022_s4 }
0x1722   :  { %4547 = vmatpush1.bf16.msra.mxu1 %v7829_v13  ;;  %v6050_v13 = vmov 0.0|0.0  }
0x1723   :  { %5857 = vmatprep.subr.bf16.mxu1 %v6050_v13  ;;  %p6029_p3 = por %p6028_p2, %p6027_p1 }
0x1725   :  { %4563 = vmatmul.mubr.bf16.vlgmr.msra.gmra.mrb[144].mxu1 %v4482_v20  ;;  %p6030_p4 = pnand %p6029_p3, %p6023_p0 }
0x1726   :  { %5854 = vmatprep.mubr.msk.f32.mxu1 %vm6049_vm1, %v6048_v45  ;;  %v5858_v45 = vpack.c.bf16 %v4643_v8, %v4642_v6 }
0x1728   :  { %5859 = vmatpush3.bf16.msra.mxu1 %v5858_v45 }
0x1729   :  { %5860 = vmatprep.subr.bf16.mxu1 %v6050_v13 }
0x172c   :  { %5862 = vmatpush3.bf16.msra.mxu1 %v5861_v52 }
0x17d4   :  { %v4450_v7 = vpop.f32.mrb[140].mxu1 }
0x17d5   :  { %v4456_v38 = vadd.f32 %v4450_v7, %v4280_v27  ;;  %v5836_v28 = vpop.f32.mrb[141].mxu1 }
0x17d6   :  { %v4453_v35 = vpop.f32.mrb[142].mxu1 }
0x17d7   :  { %v5837_v54 = vpop.f32.mrb[143].mxu1 }
0x17f8   :  { %v4564_v22 = vpop.f32.mrb[144].mxu1 }
0x17f9   :  { %v4565_v44 = vadd.f32 %v4564_v22, %v4525_v19  ;;  %v4566_v43 = vpop.f32.mrb[145].mxu1 }
0x17fa   :  { %v4567_v59 = vpop.f32.mrb[146].mxu1 }
0x17fb   :  { %v4570_v63 = vmax.f32 %v4565_v44, 0.0  ;;  %v4568_v21 = vpop.f32.mrb[147].mxu1 }
0x17fd   :  { %v4571_v26 = vpack.c.bf16 %v4570_v63, %v4570_v63 }
0x17ff   :  { %5843 = vmatmul.mubr.msk.bf16.vlgmr.msra.gmra.mrb[148].mxu0 %vm486_vm2, %v4571_v26 }
0x18d2   :  { %v4626_v56 = vpop.f32.mrb[148].mxu0 }
0x18d3   :  { %v4632_v61 = vadd.f32 %v4626_v56, %v4456_v38  ;;  %v5844_v4 = vpop.f32.mrb[149].mxu0 }
0x18d4   :  { %v4629_v32 = vpop.f32.mrb[150].mxu0 }
0x18d5   :  { %v4640_v39 = vadd.f32 %v5013_v53, %v4632_v61  ;;  %v5845_v16 = vpop.f32.mrb[151].mxu0 }
0x18d7   :  { %v4641_v18 = vmax.f32 %v4640_v39, 0.0 }
0x18d9   :  { %5855 = vmatmul.mubr.msk.f32.vlgmr.msra.gmra.mrb[148].mxu1 %vm486_vm2, %v4641_v18 }
0x19ac   :  { %v4722_v36 = vpop.f32.mrb[148].mxu1 }
0x19ad   :  { %v4723_v34 = vadd.f32 %v5014_v24, %v4722_v36  ;;  %v5856_v46 = vpop.f32.mrb[149].mxu1 }
0x19af   :  { %4727 = vst.msk [vmem:[#allocation2] sm:$0x3] %vm4726_vm3, %v4723_v34 }
0x19b0   :  { %6033 = shalt.err (!%p6030_p4)
}
0x19b1   :  { %s6034_s24 = scalar_lea.hbm %s8011_s7, 32 }
0x19b2   :  { %p6035_p5 = scmp.ne.s32.totalorder %s8011_s7, %s6034_s24  ;;  %p6038_p6 = scmp.lt.u32.totalorder %s6034_s24, %s8011_s7 }
0x19b4   :  { %p6040_p7 = pnand %p6038_p6, %p6035_p5 }
0x19b6   :  { %6043 = shalt.err (!%p6040_p7)
}
0x19b7   :  { %4737 = dma.vmem_to_hbm [thread:$0]  %s4735_s22, 32, %s8011_s7, [#allocation3]  }
0x19b8   :  { %6044 = dma.done.wait [#allocation3], 32  }
0x19b9   :  { %6045 = vsyncadd [#allocation3], 4294967264 }
0x19ba   :  { %4741 = vsyncpa [#allocation3], 1 }

</bundles_post_ra>
